<compile_context>
chip_gen: v7x
topology: tpu7x:2x2x1
jax: 0.10.0
libtpu: 0.0.40
codegen_flags: <defaults>
</compile_context>

<pallas_src>
import functools

import jax
import jax.numpy as jnp
from jax.experimental import pallas as pl
from jax.experimental.pallas import tpu as pltpu

EPS = 1e-5

_PARAM_ORDER = (
    "patch_w", "tok", "pre_ln_g", "pre_ln_b",
    "ln1_g", "ln1_b", "wqkv", "bqkv", "wo", "bo",
    "ln2_g", "ln2_b", "w1", "b1", "w2", "b2",
)


def _layernorm(x, g, b):
    # one-pass variance: two independent lane reductions instead of two serialized ones
    mu = jnp.mean(x, axis=-1, keepdims=True)
    ms = jnp.mean(x * x, axis=-1, keepdims=True)
    var = ms - mu * mu
    return (x - mu) * jax.lax.rsqrt(var + EPS) * g + b


# ----------------------------------------------------------------------------
# Fused Pallas kernel: patch embed + pre-LN + all encoder layers + view-max
# ----------------------------------------------------------------------------
def _fused_mv_clip_kernel(patches_ref, patch_w_ref, tok_ref, pre_g_ref, pre_b_ref,
                          ln1_g_ref, ln1_b_ref, wqkv_ref, bqkv_ref, wo_ref, bo_ref,
                          ln2_g_ref, ln2_b_ref, w1_ref, b1_ref, w2_ref, b2_ref,
                          o_ref, *, batch, num_views, seq, hidden, heads, head_dim,
                          num_layers):
    V, S, D, H, HD = num_views, seq, hidden, heads, head_dim
    BV = batch * V
    T = BV * S

    # ---- patch embedding: conv(kernel=stride=patch, bias=False) == one 2D matmul.
    # cls rows of `patches` are zero, so the matmul yields the full (T, D) token grid;
    # the pre-baked cls+pos template is just added (no sublane concatenate).
    x = jnp.dot(patches_ref[...], patch_w_ref[...],
                preferred_element_type=jnp.float32)                  # (T, D)
    x = x + tok_ref[...]

    # ---- pre-LayerNorm ----
    x = _layernorm(x, pre_g_ref[...], pre_b_ref[...])

    # ---- transformer encoder layers (tiny synthetic config: static unroll) ----
    for l in range(num_layers):
        # self-attention (HF CLIPAttention; q-scale folded into wqkv/bqkv at prep time)
        residual = x
        h = _layernorm(x, ln1_g_ref[l], ln1_b_ref[l])
        qkv = jnp.dot(h, wqkv_ref[l],
                      preferred_element_type=jnp.float32) + bqkv_ref[l]   # (T, 3D)
        qkv3 = qkv.reshape(BV, S, 3 * D)                             # views -> page dim

        head_outs = []
        for hh in range(H):                                          # static lane slices
            q_h = qkv3[:, :, hh * HD:(hh + 1) * HD]
            k_h = qkv3[:, :, D + hh * HD:D + (hh + 1) * HD]
            v_h = qkv3[:, :, 2 * D + hh * HD:2 * D + (hh + 1) * HD]
            s = jnp.einsum("vqe,vke->vqk", q_h, k_h,
                           preferred_element_type=jnp.float32)       # (BV, S, S)
            s = s - jnp.max(s, axis=-1, keepdims=True)
            p = jnp.exp(s)
            # approx reciprocal runs on the EUP slot; use exact divide if bitwise
            # parity with a torch reference softmax is required.
            p = p * pl.reciprocal(jnp.sum(p, axis=-1, keepdims=True), approx=True)
            head_outs.append(jnp.einsum("vqk,vke->vqe", p, v_h,
                                        preferred_element_type=jnp.float32))
        ao = jnp.concatenate(head_outs, axis=-1).reshape(T, D)       # lane concat only
        attn = jnp.dot(ao, wo_ref[l], preferred_element_type=jnp.float32) + bo_ref[l]
        x = residual + attn

        # MLP (quick_gelu)
        residual = x
        h = _layernorm(x, ln2_g_ref[l], ln2_b_ref[l])
        h1 = jnp.dot(h, w1_ref[l], preferred_element_type=jnp.float32) + b1_ref[l]
        h1 = h1 * jax.nn.sigmoid(1.702 * h1)
        h2 = jnp.dot(h1, w2_ref[l], preferred_element_type=jnp.float32) + b2_ref[l]
        x = residual + h2

    # ---- max over views: torch.max(features.view(-1, V, S, D), dim=1)[0] ----
    o_ref[...] = jnp.max(x.reshape(batch, V, S, D), axis=1)


# ----------------------------------------------------------------------------
# Pallas wrapper
# ----------------------------------------------------------------------------
def pallas_mv_clip(patches, prepped, cfg, batch):
    S, D = cfg["seq"], cfg["hidden"]
    ordered = [prepped[k] for k in _PARAM_ORDER]

    # full-array blocks, constant index maps: everything resident in VMEM, one step
    in_specs = [pl.BlockSpec(a.shape, lambda i, n=a.ndim: (0,) * n)
                for a in (patches, *ordered)]

    kernel = functools.partial(
        _fused_mv_clip_kernel,
        batch=batch, num_views=cfg["num_views"], seq=S, hidden=D,
        heads=cfg["heads"], head_dim=cfg["head_dim"], num_layers=cfg["layers"])

    return pl.pallas_call(
        kernel,
        out_shape=jax.ShapeDtypeStruct((batch, S, D), jnp.float32),
        grid=(1,),
        in_specs=in_specs,
        out_specs=pl.BlockSpec((batch, S, D), lambda i: (0, 0, 0)),
        compiler_params=pltpu.CompilerParams(dimension_semantics=("arbitrary",)),
    )(patches, *ordered)


# ----------------------------------------------------------------------------
# One-time wrapper-side parameter prep (would happen at checkpoint-load time)
# ----------------------------------------------------------------------------
def _prep_params(params, cfg, n_imgs):
    D, S = cfg["hidden"], cfg["seq"]
    qscale = cfg["head_dim"] ** -0.5
    cpp = params["patch_w"].shape[0]
    cpp_pad = ((cpp + 127) // 128) * 128                 # 192 -> 256 contraction lanes

    # HF CLIPAttention applies the scale AFTER the q bias add -> scale wq AND bq.
    wqkv = jnp.concatenate([params["wq"] * qscale, params["wk"], params["wv"]], axis=-1)
    bqkv = jnp.concatenate([params["bq"] * qscale, params["bk"], params["bv"]], axis=-1)

    # token template: row 0 gets the class embedding, every row gets its pos embedding
    cls_row = jnp.concatenate(
        [params["class_emb"], jnp.zeros((S - 1, D), jnp.float32)], axis=0)
    tok = jnp.tile(params["pos_emb"] + cls_row, (n_imgs, 1))          # (n_imgs*S, D)

    return {
        "patch_w": jnp.pad(params["patch_w"], ((0, cpp_pad - cpp), (0, 0))),
        "tok": tok,
        "pre_ln_g": params["pre_ln_g"], "pre_ln_b": params["pre_ln_b"],
        "ln1_g": params["ln1_g"], "ln1_b": params["ln1_b"],
        "wqkv": wqkv, "bqkv": bqkv,
        "wo": params["wo"], "bo": params["bo"],
        "ln2_g": params["ln2_g"], "ln2_b": params["ln2_b"],
        "w1": params["w1"], "b1": params["b1"],
        "w2": params["w2"], "b2": params["b2"],
    }, cpp_pad


# ----------------------------------------------------------------------------
# MV_CLIP.forward
# ----------------------------------------------------------------------------
def mv_clip_forward(x, params, cfg):
    V = cfg["num_views"]
    n, c, h, w = x.shape
    b = n // V
    # reproduce torch: view(-1,V,C,H,W).permute(0,2,1,3,4).contiguous().view(-1,C,H,W)
    x = x.reshape(b, V, c, h, w)
    x = jnp.transpose(x, (0, 2, 1, 3, 4)).reshape(b * V, c, h, w)

    # patch unfold (pure layout glue); flatten order (c, ph, pw) must match
    # conv_w.reshape(D, C*P*P).T when porting real Conv2d weights.
    p = cfg["patch"]
    hp, wp = h // p, w // p
    cpp = c * p * p
    patches = x.reshape(b * V, c, hp, p, wp, p)
    patches = jnp.transpose(patches, (0, 2, 4, 1, 3, 5)).reshape(b * V, hp * wp, cpp)
    # zero row per image at the [CLS] position: the bias-free patch matmul then emits
    # the full token grid directly (no sublane concatenate inside the kernel).
    patches = jnp.concatenate(
        [jnp.zeros((b * V, 1, cpp), patches.dtype), patches], axis=1)  # (BV, S, cpp)

    prepped, cpp_pad = _prep_params(params, cfg, b * V)
    patches = jnp.pad(patches, ((0, 0), (0, 0), (0, cpp_pad - cpp)))
    patches = patches.reshape(b * V * cfg["seq"], cpp_pad)             # (T, cpp_pad)

    return pallas_mv_clip(patches, prepped, cfg, b)                    # (B, S, D)


# ----------------------------------------------------------------------------
# Deterministic synthetic parameter init (per-layer params stacked on a layer axis)
# ----------------------------------------------------------------------------
def init_params(key, cfg):
    c, p, d = cfg["channels"], cfg["patch"], cfg["hidden"]
    dm, L, s = cfg["mlp"], cfg["layers"], cfg["seq"]
    keys = iter(jax.random.split(key, 32))

    def nrm(shape, scale=0.02):
        return (scale * jax.random.normal(next(keys), shape)).astype(jnp.float32)

    return {
        "patch_w": nrm((c * p * p, d)),
        "class_emb": nrm((1, d)),
        "pos_emb": nrm((s, d)),
        "pre_ln_g": jnp.ones((1, d), jnp.float32),
        "pre_ln_b": jnp.zeros((1, d), jnp.float32),
        "ln1_g": jnp.ones((L, 1, d), jnp.float32),
        "ln1_b": jnp.zeros((L, 1, d), jnp.float32),
        "wq": nrm((L, d, d)), "bq": nrm((L, 1, d)),   # nonzero bq exercises q-scale fold
        "wk": nrm((L, d, d)), "bk": nrm((L, 1, d)),
        "wv": nrm((L, d, d)), "bv": nrm((L, 1, d)),
        "wo": nrm((L, d, d)), "bo": nrm((L, 1, d)),
        "ln2_g": jnp.ones((L, 1, d), jnp.float32),
        "ln2_b": jnp.zeros((L, 1, d), jnp.float32),
        "w1": nrm((L, d, dm)), "b1": nrm((L, 1, dm)),
        "w2": nrm((L, dm, d)), "b2": nrm((L, 1, d)),
    }


if __name__ == "__main__":
    cfg = {
        "num_views": 2,
        "channels": 3,
        "image": 16,
        "patch": 8,
        "hidden": 32,
        "heads": 4,
        "head_dim": 8,
        "mlp": 64,
        "layers": 2,
    }
    cfg["seq"] = 1 + (cfg["image"] // cfg["patch"]) ** 2   # cls + 4 patches = 5

    key = jax.random.PRNGKey(0)
    k_x, k_p = jax.random.split(key)

    batch = 2
    n_imgs = batch * cfg["num_views"]
    x = jax.random.normal(
        k_x, (n_imgs, cfg["channels"], cfg["image"], cfg["image"]), jnp.float32)

    params = init_params(k_p, cfg)

    out = jax.block_until_ready(mv_clip_forward(x, params, cfg))

    expected = (batch, cfg["seq"], cfg["hidden"])
    assert out.shape == expected, (out.shape, expected)
    assert jnp.all(jnp.isfinite(out))
    print("KERNEL_OK")
</pallas_src>

<mosaic_0001>
module attributes {stable_mosaic.version = 11 : i64} {
  func.func @_fused_mv_clip_kernel(%arg0: i32, %arg1: memref<20x256xf32, #tpu.memory_space<vmem>>, %arg2: memref<256x32xf32, #tpu.memory_space<vmem>>, %arg3: memref<20x32xf32, #tpu.memory_space<vmem>>, %arg4: memref<1x32xf32, #tpu.memory_space<vmem>>, %arg5: memref<1x32xf32, #tpu.memory_space<vmem>>, %arg6: memref<2x1x32xf32, #tpu.memory_space<vmem>>, %arg7: memref<2x1x32xf32, #tpu.memory_space<vmem>>, %arg8: memref<2x32x96xf32, #tpu.memory_space<vmem>>, %arg9: memref<2x1x96xf32, #tpu.memory_space<vmem>>, %arg10: memref<2x32x32xf32, #tpu.memory_space<vmem>>, %arg11: memref<2x1x32xf32, #tpu.memory_space<vmem>>, %arg12: memref<2x1x32xf32, #tpu.memory_space<vmem>>, %arg13: memref<2x1x32xf32, #tpu.memory_space<vmem>>, %arg14: memref<2x32x64xf32, #tpu.memory_space<vmem>>, %arg15: memref<2x1x64xf32, #tpu.memory_space<vmem>>, %arg16: memref<2x64x32xf32, #tpu.memory_space<vmem>>, %arg17: memref<2x1x32xf32, #tpu.memory_space<vmem>>, %arg18: memref<2x5x32xf32, #tpu.memory_space<vmem>>) attributes {dimension_semantics = [#tpu.dimension_semantics<arbitrary>], iteration_bounds = array<i64: 1>, scalar_prefetch = 0 : i64, scratch_operands = 0 : i64, tpu.core_type = #tpu.core_type<tc>, window_params = [{pipeline_mode = #tpu.pipeline_mode<synchronous>, transform_indices = @transform_0, window_bounds = array<i64: 20, 256>}, {pipeline_mode = #tpu.pipeline_mode<synchronous>, transform_indices = @transform_1, window_bounds = array<i64: 256, 32>}, {pipeline_mode = #tpu.pipeline_mode<synchronous>, transform_indices = @transform_2, window_bounds = array<i64: 20, 32>}, {pipeline_mode = #tpu.pipeline_mode<synchronous>, transform_indices = @transform_3, window_bounds = array<i64: 1, 32>}, {pipeline_mode = #tpu.pipeline_mode<synchronous>, transform_indices = @transform_4, window_bounds = array<i64: 1, 32>}, {pipeline_mode = #tpu.pipeline_mode<synchronous>, transform_indices = @transform_5, window_bounds = array<i64: 2, 1, 32>}, {pipeline_mode = #tpu.pipeline_mode<synchronous>, transform_indices = @transform_6, window_bounds = array<i64: 2, 1, 32>}, {pipeline_mode = #tpu.pipeline_mode<synchronous>, transform_indices = @transform_7, window_bounds = array<i64: 2, 32, 96>}, {pipeline_mode = #tpu.pipeline_mode<synchronous>, transform_indices = @transform_8, window_bounds = array<i64: 2, 1, 96>}, {pipeline_mode = #tpu.pipeline_mode<synchronous>, transform_indices = @transform_9, window_bounds = array<i64: 2, 32, 32>}, {pipeline_mode = #tpu.pipeline_mode<synchronous>, transform_indices = @transform_10, window_bounds = array<i64: 2, 1, 32>}, {pipeline_mode = #tpu.pipeline_mode<synchronous>, transform_indices = @transform_11, window_bounds = array<i64: 2, 1, 32>}, {pipeline_mode = #tpu.pipeline_mode<synchronous>, transform_indices = @transform_12, window_bounds = array<i64: 2, 1, 32>}, {pipeline_mode = #tpu.pipeline_mode<synchronous>, transform_indices = @transform_13, window_bounds = array<i64: 2, 32, 64>}, {pipeline_mode = #tpu.pipeline_mode<synchronous>, transform_indices = @transform_14, window_bounds = array<i64: 2, 1, 64>}, {pipeline_mode = #tpu.pipeline_mode<synchronous>, transform_indices = @transform_15, window_bounds = array<i64: 2, 64, 32>}, {pipeline_mode = #tpu.pipeline_mode<synchronous>, transform_indices = @transform_16, window_bounds = array<i64: 2, 1, 32>}, {pipeline_mode = #tpu.pipeline_mode<synchronous>, transform_indices = @transform_17, window_bounds = array<i64: 2, 5, 32>}]} {
    %c0 = arith.constant 0 : index
    %c0_0 = arith.constant 0 : index
    %0 = vector.load %arg1[%c0, %c0_0] : memref<20x256xf32, #tpu.memory_space<vmem>>, vector<20x256xf32>
    %c0_1 = arith.constant 0 : index
    %c0_2 = arith.constant 0 : index
    %1 = vector.load %arg2[%c0_1, %c0_2] : memref<256x32xf32, #tpu.memory_space<vmem>>, vector<256x32xf32>
    %cst = arith.constant dense<0.000000e+00> : vector<20x32xf32>
    %2 = tpu.matmul %0, %1, %cst {dimension_numbers = #tpu.dot_dimension_numbers<[1], [0], [0], [1], [0, 0, 1, 1], [], []>} : vector<20x256xf32>, vector<256x32xf32>, vector<20x32xf32> -> vector<20x32xf32>
    %c0_3 = arith.constant 0 : index
    %c0_4 = arith.constant 0 : index
    %3 = vector.load %arg3[%c0_3, %c0_4] : memref<20x32xf32, #tpu.memory_space<vmem>>, vector<20x32xf32>
    %4 = arith.addf %2, %3 : vector<20x32xf32>
    %c0_5 = arith.constant 0 : index
    %c0_6 = arith.constant 0 : index
    %5 = vector.load %arg4[%c0_5, %c0_6] : memref<1x32xf32, #tpu.memory_space<vmem>>, vector<1x32xf32>
    %c0_7 = arith.constant 0 : index
    %c0_8 = arith.constant 0 : index
    %6 = vector.load %arg5[%c0_7, %c0_8] : memref<1x32xf32, #tpu.memory_space<vmem>>, vector<1x32xf32>
    %cst_9 = arith.constant dense<0.000000e+00> : vector<20xf32>
    %7 = vector.multi_reduction <add>, %4, %cst_9 [1] : vector<20x32xf32> to vector<20xf32>
    %8 = vector.shape_cast %7 : vector<20xf32> to vector<20x1xf32>
    %cst_10 = arith.constant 3.200000e+01 : f32
    %9 = vector.broadcast %cst_10 : f32 to vector<20x1xf32>
    %10 = arith.divf %8, %9 : vector<20x1xf32>
    %11 = arith.mulf %4, %4 : vector<20x32xf32>
    %cst_11 = arith.constant dense<0.000000e+00> : vector<20xf32>
    %12 = vector.multi_reduction <add>, %11, %cst_11 [1] : vector<20x32xf32> to vector<20xf32>
    %13 = vector.shape_cast %12 : vector<20xf32> to vector<20x1xf32>
    %cst_12 = arith.constant 3.200000e+01 : f32
    %14 = vector.broadcast %cst_12 : f32 to vector<20x1xf32>
    %15 = arith.divf %13, %14 : vector<20x1xf32>
    %16 = arith.mulf %10, %10 : vector<20x1xf32>
    %17 = arith.subf %15, %16 : vector<20x1xf32>
    %18 = vector.broadcast %10 : vector<20x1xf32> to vector<20x32xf32>
    %19 = arith.subf %4, %18 : vector<20x32xf32>
    %cst_13 = arith.constant 9.99999974E-6 : f32
    %20 = vector.broadcast %cst_13 : f32 to vector<20x1xf32>
    %21 = arith.addf %17, %20 : vector<20x1xf32>
    %22 = math.rsqrt %21 : vector<20x1xf32>
    %23 = vector.broadcast %22 : vector<20x1xf32> to vector<20x32xf32>
    %24 = arith.mulf %19, %23 : vector<20x32xf32>
    %25 = vector.broadcast %5 : vector<1x32xf32> to vector<20x32xf32>
    %26 = arith.mulf %24, %25 : vector<20x32xf32>
    %27 = vector.broadcast %6 : vector<1x32xf32> to vector<20x32xf32>
    %28 = arith.addf %26, %27 : vector<20x32xf32>
    %c0_14 = arith.constant 0 : index
    %c0_15 = arith.constant 0 : index
    %c0_16 = arith.constant 0 : index
    %29 = vector.load %arg6[%c0_14, %c0_15, %c0_16] : memref<2x1x32xf32, #tpu.memory_space<vmem>>, vector<1x1x32xf32>
    %30 = vector.shape_cast %29 : vector<1x1x32xf32> to vector<1x32xf32>
    %c0_17 = arith.constant 0 : index
    %c0_18 = arith.constant 0 : index
    %c0_19 = arith.constant 0 : index
    %31 = vector.load %arg7[%c0_17, %c0_18, %c0_19] : memref<2x1x32xf32, #tpu.memory_space<vmem>>, vector<1x1x32xf32>
    %32 = vector.shape_cast %31 : vector<1x1x32xf32> to vector<1x32xf32>
    %cst_20 = arith.constant dense<0.000000e+00> : vector<20xf32>
    %33 = vector.multi_reduction <add>, %28, %cst_20 [1] : vector<20x32xf32> to vector<20xf32>
    %34 = vector.shape_cast %33 : vector<20xf32> to vector<20x1xf32>
    %cst_21 = arith.constant 3.200000e+01 : f32
    %35 = vector.broadcast %cst_21 : f32 to vector<20x1xf32>
    %36 = arith.divf %34, %35 : vector<20x1xf32>
    %37 = arith.mulf %28, %28 : vector<20x32xf32>
    %cst_22 = arith.constant dense<0.000000e+00> : vector<20xf32>
    %38 = vector.multi_reduction <add>, %37, %cst_22 [1] : vector<20x32xf32> to vector<20xf32>
    %39 = vector.shape_cast %38 : vector<20xf32> to vector<20x1xf32>
    %cst_23 = arith.constant 3.200000e+01 : f32
    %40 = vector.broadcast %cst_23 : f32 to vector<20x1xf32>
    %41 = arith.divf %39, %40 : vector<20x1xf32>
    %42 = arith.mulf %36, %36 : vector<20x1xf32>
    %43 = arith.subf %41, %42 : vector<20x1xf32>
    %44 = vector.broadcast %36 : vector<20x1xf32> to vector<20x32xf32>
    %45 = arith.subf %28, %44 : vector<20x32xf32>
    %cst_24 = arith.constant 9.99999974E-6 : f32
    %46 = vector.broadcast %cst_24 : f32 to vector<20x1xf32>
    %47 = arith.addf %43, %46 : vector<20x1xf32>
    %48 = math.rsqrt %47 : vector<20x1xf32>
    %49 = vector.broadcast %48 : vector<20x1xf32> to vector<20x32xf32>
    %50 = arith.mulf %45, %49 : vector<20x32xf32>
    %51 = vector.broadcast %30 : vector<1x32xf32> to vector<20x32xf32>
    %52 = arith.mulf %50, %51 : vector<20x32xf32>
    %53 = vector.broadcast %32 : vector<1x32xf32> to vector<20x32xf32>
    %54 = arith.addf %52, %53 : vector<20x32xf32>
    %c0_25 = arith.constant 0 : index
    %c0_26 = arith.constant 0 : index
    %c0_27 = arith.constant 0 : index
    %55 = vector.load %arg8[%c0_25, %c0_26, %c0_27] : memref<2x32x96xf32, #tpu.memory_space<vmem>>, vector<1x32x96xf32>
    %56 = vector.shape_cast %55 : vector<1x32x96xf32> to vector<32x96xf32>
    %cst_28 = arith.constant dense<0.000000e+00> : vector<20x96xf32>
    %57 = tpu.matmul %54, %56, %cst_28 {dimension_numbers = #tpu.dot_dimension_numbers<[1], [0], [0], [1], [0, 0, 1, 1], [], []>} : vector<20x32xf32>, vector<32x96xf32>, vector<20x96xf32> -> vector<20x96xf32>
    %c0_29 = arith.constant 0 : index
    %c0_30 = arith.constant 0 : index
    %c0_31 = arith.constant 0 : index
    %58 = vector.load %arg9[%c0_29, %c0_30, %c0_31] : memref<2x1x96xf32, #tpu.memory_space<vmem>>, vector<1x1x96xf32>
    %59 = vector.shape_cast %58 : vector<1x1x96xf32> to vector<1x96xf32>
    %60 = vector.broadcast %59 : vector<1x96xf32> to vector<20x96xf32>
    %61 = arith.addf %57, %60 : vector<20x96xf32>
    %62 = vector.shape_cast %61 : vector<20x96xf32> to vector<4x5x96xf32>
    %63 = vector.extract_strided_slice %62 {offsets = [0, 0, 0], sizes = [4, 5, 8], strides = [1, 1, 1]} : vector<4x5x96xf32> to vector<4x5x8xf32>
    %64 = vector.extract_strided_slice %62 {offsets = [0, 0, 32], sizes = [4, 5, 8], strides = [1, 1, 1]} : vector<4x5x96xf32> to vector<4x5x8xf32>
    %65 = vector.extract_strided_slice %62 {offsets = [0, 0, 64], sizes = [4, 5, 8], strides = [1, 1, 1]} : vector<4x5x96xf32> to vector<4x5x8xf32>
    "tpu.trace_start"() <{level = 10 : i32, message = "vqe,vke->vqk"}> : () -> ()
    %cst_32 = arith.constant dense<0.000000e+00> : vector<4x5x5xf32>
    %66 = tpu.matmul %63, %64, %cst_32 {dimension_numbers = #tpu.dot_dimension_numbers<[2], [2], [1], [1], [0, 0, 0, 1, 1, 1], [0], [0]>} : vector<4x5x8xf32>, vector<4x5x8xf32>, vector<4x5x5xf32> -> vector<4x5x5xf32>
    "tpu.trace_stop"() : () -> ()
    %cst_33 = arith.constant dense<0xFF800000> : vector<4x5xf32>
    %67 = vector.multi_reduction <maximumf>, %66, %cst_33 [2] : vector<4x5x5xf32> to vector<4x5xf32>
    %68 = vector.shape_cast %67 : vector<4x5xf32> to vector<4x5x1xf32>
    %69 = vector.broadcast %68 : vector<4x5x1xf32> to vector<4x5x5xf32>
    %70 = arith.subf %66, %69 : vector<4x5x5xf32>
    %71 = math.exp %70 : vector<4x5x5xf32>
    %cst_34 = arith.constant dense<0.000000e+00> : vector<4x5xf32>
    %72 = vector.multi_reduction <add>, %71, %cst_34 [2] : vector<4x5x5xf32> to vector<4x5xf32>
    %73 = vector.shape_cast %72 : vector<4x5xf32> to vector<4x5x1xf32>
    %74 = tpu.reciprocal %73 {approx = true} : vector<4x5x1xf32> -> vector<4x5x1xf32>
    %75 = vector.broadcast %74 : vector<4x5x1xf32> to vector<4x5x5xf32>
    %76 = arith.mulf %71, %75 : vector<4x5x5xf32>
    "tpu.trace_start"() <{level = 10 : i32, message = "vqk,vke->vqe"}> : () -> ()
    %cst_35 = arith.constant dense<0.000000e+00> : vector<4x5x8xf32>
    %77 = tpu.matmul %76, %65, %cst_35 {dimension_numbers = #tpu.dot_dimension_numbers<[2], [1], [1], [2], [0, 0, 0, 1, 1, 2], [0], [0]>} : vector<4x5x5xf32>, vector<4x5x8xf32>, vector<4x5x8xf32> -> vector<4x5x8xf32>
    "tpu.trace_stop"() : () -> ()
    %78 = vector.extract_strided_slice %62 {offsets = [0, 0, 8], sizes = [4, 5, 8], strides = [1, 1, 1]} : vector<4x5x96xf32> to vector<4x5x8xf32>
    %79 = vector.extract_strided_slice %62 {offsets = [0, 0, 40], sizes = [4, 5, 8], strides = [1, 1, 1]} : vector<4x5x96xf32> to vector<4x5x8xf32>
    %80 = vector.extract_strided_slice %62 {offsets = [0, 0, 72], sizes = [4, 5, 8], strides = [1, 1, 1]} : vector<4x5x96xf32> to vector<4x5x8xf32>
    "tpu.trace_start"() <{level = 10 : i32, message = "vqe,vke->vqk"}> : () -> ()
    %cst_36 = arith.constant dense<0.000000e+00> : vector<4x5x5xf32>
    %81 = tpu.matmul %78, %79, %cst_36 {dimension_numbers = #tpu.dot_dimension_numbers<[2], [2], [1], [1], [0, 0, 0, 1, 1, 1], [0], [0]>} : vector<4x5x8xf32>, vector<4x5x8xf32>, vector<4x5x5xf32> -> vector<4x5x5xf32>
    "tpu.trace_stop"() : () -> ()
    %cst_37 = arith.constant dense<0xFF800000> : vector<4x5xf32>
    %82 = vector.multi_reduction <maximumf>, %81, %cst_37 [2] : vector<4x5x5xf32> to vector<4x5xf32>
    %83 = vector.shape_cast %82 : vector<4x5xf32> to vector<4x5x1xf32>
    %84 = vector.broadcast %83 : vector<4x5x1xf32> to vector<4x5x5xf32>
    %85 = arith.subf %81, %84 : vector<4x5x5xf32>
    %86 = math.exp %85 : vector<4x5x5xf32>
    %cst_38 = arith.constant dense<0.000000e+00> : vector<4x5xf32>
    %87 = vector.multi_reduction <add>, %86, %cst_38 [2] : vector<4x5x5xf32> to vector<4x5xf32>
    %88 = vector.shape_cast %87 : vector<4x5xf32> to vector<4x5x1xf32>
    %89 = tpu.reciprocal %88 {approx = true} : vector<4x5x1xf32> -> vector<4x5x1xf32>
    %90 = vector.broadcast %89 : vector<4x5x1xf32> to vector<4x5x5xf32>
    %91 = arith.mulf %86, %90 : vector<4x5x5xf32>
    "tpu.trace_start"() <{level = 10 : i32, message = "vqk,vke->vqe"}> : () -> ()
    %cst_39 = arith.constant dense<0.000000e+00> : vector<4x5x8xf32>
    %92 = tpu.matmul %91, %80, %cst_39 {dimension_numbers = #tpu.dot_dimension_numbers<[2], [1], [1], [2], [0, 0, 0, 1, 1, 2], [0], [0]>} : vector<4x5x5xf32>, vector<4x5x8xf32>, vector<4x5x8xf32> -> vector<4x5x8xf32>
    "tpu.trace_stop"() : () -> ()
    %93 = vector.extract_strided_slice %62 {offsets = [0, 0, 16], sizes = [4, 5, 8], strides = [1, 1, 1]} : vector<4x5x96xf32> to vector<4x5x8xf32>
    %94 = vector.extract_strided_slice %62 {offsets = [0, 0, 48], sizes = [4, 5, 8], strides = [1, 1, 1]} : vector<4x5x96xf32> to vector<4x5x8xf32>
    %95 = vector.extract_strided_slice %62 {offsets = [0, 0, 80], sizes = [4, 5, 8], strides = [1, 1, 1]} : vector<4x5x96xf32> to vector<4x5x8xf32>
    "tpu.trace_start"() <{level = 10 : i32, message = "vqe,vke->vqk"}> : () -> ()
    %cst_40 = arith.constant dense<0.000000e+00> : vector<4x5x5xf32>
    %96 = tpu.matmul %93, %94, %cst_40 {dimension_numbers = #tpu.dot_dimension_numbers<[2], [2], [1], [1], [0, 0, 0, 1, 1, 1], [0], [0]>} : vector<4x5x8xf32>, vector<4x5x8xf32>, vector<4x5x5xf32> -> vector<4x5x5xf32>
    "tpu.trace_stop"() : () -> ()
    %cst_41 = arith.constant dense<0xFF800000> : vector<4x5xf32>
    %97 = vector.multi_reduction <maximumf>, %96, %cst_41 [2] : vector<4x5x5xf32> to vector<4x5xf32>
    %98 = vector.shape_cast %97 : vector<4x5xf32> to vector<4x5x1xf32>
    %99 = vector.broadcast %98 : vector<4x5x1xf32> to vector<4x5x5xf32>
    %100 = arith.subf %96, %99 : vector<4x5x5xf32>
    %101 = math.exp %100 : vector<4x5x5xf32>
    %cst_42 = arith.constant dense<0.000000e+00> : vector<4x5xf32>
    %102 = vector.multi_reduction <add>, %101, %cst_42 [2] : vector<4x5x5xf32> to vector<4x5xf32>
    %103 = vector.shape_cast %102 : vector<4x5xf32> to vector<4x5x1xf32>
    %104 = tpu.reciprocal %103 {approx = true} : vector<4x5x1xf32> -> vector<4x5x1xf32>
    %105 = vector.broadcast %104 : vector<4x5x1xf32> to vector<4x5x5xf32>
    %106 = arith.mulf %101, %105 : vector<4x5x5xf32>
    "tpu.trace_start"() <{level = 10 : i32, message = "vqk,vke->vqe"}> : () -> ()
    %cst_43 = arith.constant dense<0.000000e+00> : vector<4x5x8xf32>
    %107 = tpu.matmul %106, %95, %cst_43 {dimension_numbers = #tpu.dot_dimension_numbers<[2], [1], [1], [2], [0, 0, 0, 1, 1, 2], [0], [0]>} : vector<4x5x5xf32>, vector<4x5x8xf32>, vector<4x5x8xf32> -> vector<4x5x8xf32>
    "tpu.trace_stop"() : () -> ()
    %108 = vector.extract_strided_slice %62 {offsets = [0, 0, 24], sizes = [4, 5, 8], strides = [1, 1, 1]} : vector<4x5x96xf32> to vector<4x5x8xf32>
    %109 = vector.extract_strided_slice %62 {offsets = [0, 0, 56], sizes = [4, 5, 8], strides = [1, 1, 1]} : vector<4x5x96xf32> to vector<4x5x8xf32>
    %110 = vector.extract_strided_slice %62 {offsets = [0, 0, 88], sizes = [4, 5, 8], strides = [1, 1, 1]} : vector<4x5x96xf32> to vector<4x5x8xf32>
    "tpu.trace_start"() <{level = 10 : i32, message = "vqe,vke->vqk"}> : () -> ()
    %cst_44 = arith.constant dense<0.000000e+00> : vector<4x5x5xf32>
    %111 = tpu.matmul %108, %109, %cst_44 {dimension_numbers = #tpu.dot_dimension_numbers<[2], [2], [1], [1], [0, 0, 0, 1, 1, 1], [0], [0]>} : vector<4x5x8xf32>, vector<4x5x8xf32>, vector<4x5x5xf32> -> vector<4x5x5xf32>
    "tpu.trace_stop"() : () -> ()
    %cst_45 = arith.constant dense<0xFF800000> : vector<4x5xf32>
    %112 = vector.multi_reduction <maximumf>, %111, %cst_45 [2] : vector<4x5x5xf32> to vector<4x5xf32>
    %113 = vector.shape_cast %112 : vector<4x5xf32> to vector<4x5x1xf32>
    %114 = vector.broadcast %113 : vector<4x5x1xf32> to vector<4x5x5xf32>
    %115 = arith.subf %111, %114 : vector<4x5x5xf32>
    %116 = math.exp %115 : vector<4x5x5xf32>
    %cst_46 = arith.constant dense<0.000000e+00> : vector<4x5xf32>
    %117 = vector.multi_reduction <add>, %116, %cst_46 [2] : vector<4x5x5xf32> to vector<4x5xf32>
    %118 = vector.shape_cast %117 : vector<4x5xf32> to vector<4x5x1xf32>
    %119 = tpu.reciprocal %118 {approx = true} : vector<4x5x1xf32> -> vector<4x5x1xf32>
    %120 = vector.broadcast %119 : vector<4x5x1xf32> to vector<4x5x5xf32>
    %121 = arith.mulf %116, %120 : vector<4x5x5xf32>
    "tpu.trace_start"() <{level = 10 : i32, message = "vqk,vke->vqe"}> : () -> ()
    %cst_47 = arith.constant dense<0.000000e+00> : vector<4x5x8xf32>
    %122 = tpu.matmul %121, %110, %cst_47 {dimension_numbers = #tpu.dot_dimension_numbers<[2], [1], [1], [2], [0, 0, 0, 1, 1, 2], [0], [0]>} : vector<4x5x5xf32>, vector<4x5x8xf32>, vector<4x5x8xf32> -> vector<4x5x8xf32>
    "tpu.trace_stop"() : () -> ()
    %123 = tpu.concatenate %77, %92, %107, %122 in 2 : vector<4x5x8xf32>, vector<4x5x8xf32>, vector<4x5x8xf32>, vector<4x5x8xf32> -> vector<4x5x32xf32>
    %124 = vector.shape_cast %123 : vector<4x5x32xf32> to vector<20x32xf32>
    %c0_48 = arith.constant 0 : index
    %c0_49 = arith.constant 0 : index
    %c0_50 = arith.constant 0 : index
    %125 = vector.load %arg10[%c0_48, %c0_49, %c0_50] : memref<2x32x32xf32, #tpu.memory_space<vmem>>, vector<1x32x32xf32>
    %126 = vector.shape_cast %125 : vector<1x32x32xf32> to vector<32x32xf32>
    %cst_51 = arith.constant dense<0.000000e+00> : vector<20x32xf32>
    %127 = tpu.matmul %124, %126, %cst_51 {dimension_numbers = #tpu.dot_dimension_numbers<[1], [0], [0], [1], [0, 0, 1, 1], [], []>} : vector<20x32xf32>, vector<32x32xf32>, vector<20x32xf32> -> vector<20x32xf32>
    %c0_52 = arith.constant 0 : index
    %c0_53 = arith.constant 0 : index
    %c0_54 = arith.constant 0 : index
    %128 = vector.load %arg11[%c0_52, %c0_53, %c0_54] : memref<2x1x32xf32, #tpu.memory_space<vmem>>, vector<1x1x32xf32>
    %129 = vector.shape_cast %128 : vector<1x1x32xf32> to vector<1x32xf32>
    %130 = vector.broadcast %129 : vector<1x32xf32> to vector<20x32xf32>
    %131 = arith.addf %127, %130 : vector<20x32xf32>
    %132 = arith.addf %28, %131 : vector<20x32xf32>
    %c0_55 = arith.constant 0 : index
    %c0_56 = arith.constant 0 : index
    %c0_57 = arith.constant 0 : index
    %133 = vector.load %arg12[%c0_55, %c0_56, %c0_57] : memref<2x1x32xf32, #tpu.memory_space<vmem>>, vector<1x1x32xf32>
    %134 = vector.shape_cast %133 : vector<1x1x32xf32> to vector<1x32xf32>
    %c0_58 = arith.constant 0 : index
    %c0_59 = arith.constant 0 : index
    %c0_60 = arith.constant 0 : index
    %135 = vector.load %arg13[%c0_58, %c0_59, %c0_60] : memref<2x1x32xf32, #tpu.memory_space<vmem>>, vector<1x1x32xf32>
    %136 = vector.shape_cast %135 : vector<1x1x32xf32> to vector<1x32xf32>
    %cst_61 = arith.constant dense<0.000000e+00> : vector<20xf32>
    %137 = vector.multi_reduction <add>, %132, %cst_61 [1] : vector<20x32xf32> to vector<20xf32>
    %138 = vector.shape_cast %137 : vector<20xf32> to vector<20x1xf32>
    %cst_62 = arith.constant 3.200000e+01 : f32
    %139 = vector.broadcast %cst_62 : f32 to vector<20x1xf32>
    %140 = arith.divf %138, %139 : vector<20x1xf32>
    %141 = arith.mulf %132, %132 : vector<20x32xf32>
    %cst_63 = arith.constant dense<0.000000e+00> : vector<20xf32>
    %142 = vector.multi_reduction <add>, %141, %cst_63 [1] : vector<20x32xf32> to vector<20xf32>
    %143 = vector.shape_cast %142 : vector<20xf32> to vector<20x1xf32>
    %cst_64 = arith.constant 3.200000e+01 : f32
    %144 = vector.broadcast %cst_64 : f32 to vector<20x1xf32>
    %145 = arith.divf %143, %144 : vector<20x1xf32>
    %146 = arith.mulf %140, %140 : vector<20x1xf32>
    %147 = arith.subf %145, %146 : vector<20x1xf32>
    %148 = vector.broadcast %140 : vector<20x1xf32> to vector<20x32xf32>
    %149 = arith.subf %132, %148 : vector<20x32xf32>
    %cst_65 = arith.constant 9.99999974E-6 : f32
    %150 = vector.broadcast %cst_65 : f32 to vector<20x1xf32>
    %151 = arith.addf %147, %150 : vector<20x1xf32>
    %152 = math.rsqrt %151 : vector<20x1xf32>
    %153 = vector.broadcast %152 : vector<20x1xf32> to vector<20x32xf32>
    %154 = arith.mulf %149, %153 : vector<20x32xf32>
    %155 = vector.broadcast %134 : vector<1x32xf32> to vector<20x32xf32>
    %156 = arith.mulf %154, %155 : vector<20x32xf32>
    %157 = vector.broadcast %136 : vector<1x32xf32> to vector<20x32xf32>
    %158 = arith.addf %156, %157 : vector<20x32xf32>
    %c0_66 = arith.constant 0 : index
    %c0_67 = arith.constant 0 : index
    %c0_68 = arith.constant 0 : index
    %159 = vector.load %arg14[%c0_66, %c0_67, %c0_68] : memref<2x32x64xf32, #tpu.memory_space<vmem>>, vector<1x32x64xf32>
    %160 = vector.shape_cast %159 : vector<1x32x64xf32> to vector<32x64xf32>
    %cst_69 = arith.constant dense<0.000000e+00> : vector<20x64xf32>
    %161 = tpu.matmul %158, %160, %cst_69 {dimension_numbers = #tpu.dot_dimension_numbers<[1], [0], [0], [1], [0, 0, 1, 1], [], []>} : vector<20x32xf32>, vector<32x64xf32>, vector<20x64xf32> -> vector<20x64xf32>
    %c0_70 = arith.constant 0 : index
    %c0_71 = arith.constant 0 : index
    %c0_72 = arith.constant 0 : index
    %162 = vector.load %arg15[%c0_70, %c0_71, %c0_72] : memref<2x1x64xf32, #tpu.memory_space<vmem>>, vector<1x1x64xf32>
    %163 = vector.shape_cast %162 : vector<1x1x64xf32> to vector<1x64xf32>
    %164 = vector.broadcast %163 : vector<1x64xf32> to vector<20x64xf32>
    %165 = arith.addf %161, %164 : vector<20x64xf32>
    %cst_73 = arith.constant 1.702000e+00 : f32
    %166 = vector.broadcast %cst_73 : f32 to vector<20x64xf32>
    %167 = arith.mulf %166, %165 : vector<20x64xf32>
    %168 = arith.negf %167 : vector<20x64xf32>
    %169 = math.exp %168 : vector<20x64xf32>
    %cst_74 = arith.constant 1.000000e+00 : f32
    %170 = vector.broadcast %cst_74 : f32 to vector<20x64xf32>
    %171 = arith.addf %170, %169 : vector<20x64xf32>
    %172 = arith.divf %170, %171 : vector<20x64xf32>
    %173 = arith.mulf %165, %172 : vector<20x64xf32>
    %c0_75 = arith.constant 0 : index
    %c0_76 = arith.constant 0 : index
    %c0_77 = arith.constant 0 : index
    %174 = vector.load %arg16[%c0_75, %c0_76, %c0_77] : memref<2x64x32xf32, #tpu.memory_space<vmem>>, vector<1x64x32xf32>
    %175 = vector.shape_cast %174 : vector<1x64x32xf32> to vector<64x32xf32>
    %cst_78 = arith.constant dense<0.000000e+00> : vector<20x32xf32>
    %176 = tpu.matmul %173, %175, %cst_78 {dimension_numbers = #tpu.dot_dimension_numbers<[1], [0], [0], [1], [0, 0, 1, 1], [], []>} : vector<20x64xf32>, vector<64x32xf32>, vector<20x32xf32> -> vector<20x32xf32>
    %c0_79 = arith.constant 0 : index
    %c0_80 = arith.constant 0 : index
    %c0_81 = arith.constant 0 : index
    %177 = vector.load %arg17[%c0_79, %c0_80, %c0_81] : memref<2x1x32xf32, #tpu.memory_space<vmem>>, vector<1x1x32xf32>
    %178 = vector.shape_cast %177 : vector<1x1x32xf32> to vector<1x32xf32>
    %179 = vector.broadcast %178 : vector<1x32xf32> to vector<20x32xf32>
    %180 = arith.addf %176, %179 : vector<20x32xf32>
    %181 = arith.addf %132, %180 : vector<20x32xf32>
    %c1 = arith.constant 1 : index
    %c0_82 = arith.constant 0 : index
    %c0_83 = arith.constant 0 : index
    %182 = vector.load %arg6[%c1, %c0_82, %c0_83] : memref<2x1x32xf32, #tpu.memory_space<vmem>>, vector<1x1x32xf32>
    %183 = vector.shape_cast %182 : vector<1x1x32xf32> to vector<1x32xf32>
    %c1_84 = arith.constant 1 : index
    %c0_85 = arith.constant 0 : index
    %c0_86 = arith.constant 0 : index
    %184 = vector.load %arg7[%c1_84, %c0_85, %c0_86] : memref<2x1x32xf32, #tpu.memory_space<vmem>>, vector<1x1x32xf32>
    %185 = vector.shape_cast %184 : vector<1x1x32xf32> to vector<1x32xf32>
    %cst_87 = arith.constant dense<0.000000e+00> : vector<20xf32>
    %186 = vector.multi_reduction <add>, %181, %cst_87 [1] : vector<20x32xf32> to vector<20xf32>
    %187 = vector.shape_cast %186 : vector<20xf32> to vector<20x1xf32>
    %cst_88 = arith.constant 3.200000e+01 : f32
    %188 = vector.broadcast %cst_88 : f32 to vector<20x1xf32>
    %189 = arith.divf %187, %188 : vector<20x1xf32>
    %190 = arith.mulf %181, %181 : vector<20x32xf32>
    %cst_89 = arith.constant dense<0.000000e+00> : vector<20xf32>
    %191 = vector.multi_reduction <add>, %190, %cst_89 [1] : vector<20x32xf32> to vector<20xf32>
    %192 = vector.shape_cast %191 : vector<20xf32> to vector<20x1xf32>
    %cst_90 = arith.constant 3.200000e+01 : f32
    %193 = vector.broadcast %cst_90 : f32 to vector<20x1xf32>
    %194 = arith.divf %192, %193 : vector<20x1xf32>
    %195 = arith.mulf %189, %189 : vector<20x1xf32>
    %196 = arith.subf %194, %195 : vector<20x1xf32>
    %197 = vector.broadcast %189 : vector<20x1xf32> to vector<20x32xf32>
    %198 = arith.subf %181, %197 : vector<20x32xf32>
    %cst_91 = arith.constant 9.99999974E-6 : f32
    %199 = vector.broadcast %cst_91 : f32 to vector<20x1xf32>
    %200 = arith.addf %196, %199 : vector<20x1xf32>
    %201 = math.rsqrt %200 : vector<20x1xf32>
    %202 = vector.broadcast %201 : vector<20x1xf32> to vector<20x32xf32>
    %203 = arith.mulf %198, %202 : vector<20x32xf32>
    %204 = vector.broadcast %183 : vector<1x32xf32> to vector<20x32xf32>
    %205 = arith.mulf %203, %204 : vector<20x32xf32>
    %206 = vector.broadcast %185 : vector<1x32xf32> to vector<20x32xf32>
    %207 = arith.addf %205, %206 : vector<20x32xf32>
    %c1_92 = arith.constant 1 : index
    %c0_93 = arith.constant 0 : index
    %c0_94 = arith.constant 0 : index
    %208 = vector.load %arg8[%c1_92, %c0_93, %c0_94] : memref<2x32x96xf32, #tpu.memory_space<vmem>>, vector<1x32x96xf32>
    %209 = vector.shape_cast %208 : vector<1x32x96xf32> to vector<32x96xf32>
    %cst_95 = arith.constant dense<0.000000e+00> : vector<20x96xf32>
    %210 = tpu.matmul %207, %209, %cst_95 {dimension_numbers = #tpu.dot_dimension_numbers<[1], [0], [0], [1], [0, 0, 1, 1], [], []>} : vector<20x32xf32>, vector<32x96xf32>, vector<20x96xf32> -> vector<20x96xf32>
    %c1_96 = arith.constant 1 : index
    %c0_97 = arith.constant 0 : index
    %c0_98 = arith.constant 0 : index
    %211 = vector.load %arg9[%c1_96, %c0_97, %c0_98] : memref<2x1x96xf32, #tpu.memory_space<vmem>>, vector<1x1x96xf32>
    %212 = vector.shape_cast %211 : vector<1x1x96xf32> to vector<1x96xf32>
    %213 = vector.broadcast %212 : vector<1x96xf32> to vector<20x96xf32>
    %214 = arith.addf %210, %213 : vector<20x96xf32>
    %215 = vector.shape_cast %214 : vector<20x96xf32> to vector<4x5x96xf32>
    %216 = vector.extract_strided_slice %215 {offsets = [0, 0, 0], sizes = [4, 5, 8], strides = [1, 1, 1]} : vector<4x5x96xf32> to vector<4x5x8xf32>
    %217 = vector.extract_strided_slice %215 {offsets = [0, 0, 32], sizes = [4, 5, 8], strides = [1, 1, 1]} : vector<4x5x96xf32> to vector<4x5x8xf32>
    %218 = vector.extract_strided_slice %215 {offsets = [0, 0, 64], sizes = [4, 5, 8], strides = [1, 1, 1]} : vector<4x5x96xf32> to vector<4x5x8xf32>
    "tpu.trace_start"() <{level = 10 : i32, message = "vqe,vke->vqk"}> : () -> ()
    %cst_99 = arith.constant dense<0.000000e+00> : vector<4x5x5xf32>
    %219 = tpu.matmul %216, %217, %cst_99 {dimension_numbers = #tpu.dot_dimension_numbers<[2], [2], [1], [1], [0, 0, 0, 1, 1, 1], [0], [0]>} : vector<4x5x8xf32>, vector<4x5x8xf32>, vector<4x5x5xf32> -> vector<4x5x5xf32>
    "tpu.trace_stop"() : () -> ()
    %cst_100 = arith.constant dense<0xFF800000> : vector<4x5xf32>
    %220 = vector.multi_reduction <maximumf>, %219, %cst_100 [2] : vector<4x5x5xf32> to vector<4x5xf32>
    %221 = vector.shape_cast %220 : vector<4x5xf32> to vector<4x5x1xf32>
    %222 = vector.broadcast %221 : vector<4x5x1xf32> to vector<4x5x5xf32>
    %223 = arith.subf %219, %222 : vector<4x5x5xf32>
    %224 = math.exp %223 : vector<4x5x5xf32>
    %cst_101 = arith.constant dense<0.000000e+00> : vector<4x5xf32>
    %225 = vector.multi_reduction <add>, %224, %cst_101 [2] : vector<4x5x5xf32> to vector<4x5xf32>
    %226 = vector.shape_cast %225 : vector<4x5xf32> to vector<4x5x1xf32>
    %227 = tpu.reciprocal %226 {approx = true} : vector<4x5x1xf32> -> vector<4x5x1xf32>
    %228 = vector.broadcast %227 : vector<4x5x1xf32> to vector<4x5x5xf32>
    %229 = arith.mulf %224, %228 : vector<4x5x5xf32>
    "tpu.trace_start"() <{level = 10 : i32, message = "vqk,vke->vqe"}> : () -> ()
    %cst_102 = arith.constant dense<0.000000e+00> : vector<4x5x8xf32>
    %230 = tpu.matmul %229, %218, %cst_102 {dimension_numbers = #tpu.dot_dimension_numbers<[2], [1], [1], [2], [0, 0, 0, 1, 1, 2], [0], [0]>} : vector<4x5x5xf32>, vector<4x5x8xf32>, vector<4x5x8xf32> -> vector<4x5x8xf32>
    "tpu.trace_stop"() : () -> ()
    %231 = vector.extract_strided_slice %215 {offsets = [0, 0, 8], sizes = [4, 5, 8], strides = [1, 1, 1]} : vector<4x5x96xf32> to vector<4x5x8xf32>
    %232 = vector.extract_strided_slice %215 {offsets = [0, 0, 40], sizes = [4, 5, 8], strides = [1, 1, 1]} : vector<4x5x96xf32> to vector<4x5x8xf32>
    %233 = vector.extract_strided_slice %215 {offsets = [0, 0, 72], sizes = [4, 5, 8], strides = [1, 1, 1]} : vector<4x5x96xf32> to vector<4x5x8xf32>
    "tpu.trace_start"() <{level = 10 : i32, message = "vqe,vke->vqk"}> : () -> ()
    %cst_103 = arith.constant dense<0.000000e+00> : vector<4x5x5xf32>
    %234 = tpu.matmul %231, %232, %cst_103 {dimension_numbers = #tpu.dot_dimension_numbers<[2], [2], [1], [1], [0, 0, 0, 1, 1, 1], [0], [0]>} : vector<4x5x8xf32>, vector<4x5x8xf32>, vector<4x5x5xf32> -> vector<4x5x5xf32>
    "tpu.trace_stop"() : () -> ()
    %cst_104 = arith.constant dense<0xFF800000> : vector<4x5xf32>
    %235 = vector.multi_reduction <maximumf>, %234, %cst_104 [2] : vector<4x5x5xf32> to vector<4x5xf32>
    %236 = vector.shape_cast %235 : vector<4x5xf32> to vector<4x5x1xf32>
    %237 = vector.broadcast %236 : vector<4x5x1xf32> to vector<4x5x5xf32>
    %238 = arith.subf %234, %237 : vector<4x5x5xf32>
    %239 = math.exp %238 : vector<4x5x5xf32>
    %cst_105 = arith.constant dense<0.000000e+00> : vector<4x5xf32>
    %240 = vector.multi_reduction <add>, %239, %cst_105 [2] : vector<4x5x5xf32> to vector<4x5xf32>
    %241 = vector.shape_cast %240 : vector<4x5xf32> to vector<4x5x1xf32>
    %242 = tpu.reciprocal %241 {approx = true} : vector<4x5x1xf32> -> vector<4x5x1xf32>
    %243 = vector.broadcast %242 : vector<4x5x1xf32> to vector<4x5x5xf32>
    %244 = arith.mulf %239, %243 : vector<4x5x5xf32>
    "tpu.trace_start"() <{level = 10 : i32, message = "vqk,vke->vqe"}> : () -> ()
    %cst_106 = arith.constant dense<0.000000e+00> : vector<4x5x8xf32>
    %245 = tpu.matmul %244, %233, %cst_106 {dimension_numbers = #tpu.dot_dimension_numbers<[2], [1], [1], [2], [0, 0, 0, 1, 1, 2], [0], [0]>} : vector<4x5x5xf32>, vector<4x5x8xf32>, vector<4x5x8xf32> -> vector<4x5x8xf32>
    "tpu.trace_stop"() : () -> ()
    %246 = vector.extract_strided_slice %215 {offsets = [0, 0, 16], sizes = [4, 5, 8], strides = [1, 1, 1]} : vector<4x5x96xf32> to vector<4x5x8xf32>
    %247 = vector.extract_strided_slice %215 {offsets = [0, 0, 48], sizes = [4, 5, 8], strides = [1, 1, 1]} : vector<4x5x96xf32> to vector<4x5x8xf32>
    %248 = vector.extract_strided_slice %215 {offsets = [0, 0, 80], sizes = [4, 5, 8], strides = [1, 1, 1]} : vector<4x5x96xf32> to vector<4x5x8xf32>
    "tpu.trace_start"() <{level = 10 : i32, message = "vqe,vke->vqk"}> : () -> ()
    %cst_107 = arith.constant dense<0.000000e+00> : vector<4x5x5xf32>
    %249 = tpu.matmul %246, %247, %cst_107 {dimension_numbers = #tpu.dot_dimension_numbers<[2], [2], [1], [1], [0, 0, 0, 1, 1, 1], [0], [0]>} : vector<4x5x8xf32>, vector<4x5x8xf32>, vector<4x5x5xf32> -> vector<4x5x5xf32>
    "tpu.trace_stop"() : () -> ()
    %cst_108 = arith.constant dense<0xFF800000> : vector<4x5xf32>
    %250 = vector.multi_reduction <maximumf>, %249, %cst_108 [2] : vector<4x5x5xf32> to vector<4x5xf32>
    %251 = vector.shape_cast %250 : vector<4x5xf32> to vector<4x5x1xf32>
    %252 = vector.broadcast %251 : vector<4x5x1xf32> to vector<4x5x5xf32>
    %253 = arith.subf %249, %252 : vector<4x5x5xf32>
    %254 = math.exp %253 : vector<4x5x5xf32>
    %cst_109 = arith.constant dense<0.000000e+00> : vector<4x5xf32>
    %255 = vector.multi_reduction <add>, %254, %cst_109 [2] : vector<4x5x5xf32> to vector<4x5xf32>
    %256 = vector.shape_cast %255 : vector<4x5xf32> to vector<4x5x1xf32>
    %257 = tpu.reciprocal %256 {approx = true} : vector<4x5x1xf32> -> vector<4x5x1xf32>
    %258 = vector.broadcast %257 : vector<4x5x1xf32> to vector<4x5x5xf32>
    %259 = arith.mulf %254, %258 : vector<4x5x5xf32>
    "tpu.trace_start"() <{level = 10 : i32, message = "vqk,vke->vqe"}> : () -> ()
    %cst_110 = arith.constant dense<0.000000e+00> : vector<4x5x8xf32>
    %260 = tpu.matmul %259, %248, %cst_110 {dimension_numbers = #tpu.dot_dimension_numbers<[2], [1], [1], [2], [0, 0, 0, 1, 1, 2], [0], [0]>} : vector<4x5x5xf32>, vector<4x5x8xf32>, vector<4x5x8xf32> -> vector<4x5x8xf32>
    "tpu.trace_stop"() : () -> ()
    %261 = vector.extract_strided_slice %215 {offsets = [0, 0, 24], sizes = [4, 5, 8], strides = [1, 1, 1]} : vector<4x5x96xf32> to vector<4x5x8xf32>
    %262 = vector.extract_strided_slice %215 {offsets = [0, 0, 56], sizes = [4, 5, 8], strides = [1, 1, 1]} : vector<4x5x96xf32> to vector<4x5x8xf32>
    %263 = vector.extract_strided_slice %215 {offsets = [0, 0, 88], sizes = [4, 5, 8], strides = [1, 1, 1]} : vector<4x5x96xf32> to vector<4x5x8xf32>
    "tpu.trace_start"() <{level = 10 : i32, message = "vqe,vke->vqk"}> : () -> ()
    %cst_111 = arith.constant dense<0.000000e+00> : vector<4x5x5xf32>
    %264 = tpu.matmul %261, %262, %cst_111 {dimension_numbers = #tpu.dot_dimension_numbers<[2], [2], [1], [1], [0, 0, 0, 1, 1, 1], [0], [0]>} : vector<4x5x8xf32>, vector<4x5x8xf32>, vector<4x5x5xf32> -> vector<4x5x5xf32>
    "tpu.trace_stop"() : () -> ()
    %cst_112 = arith.constant dense<0xFF800000> : vector<4x5xf32>
    %265 = vector.multi_reduction <maximumf>, %264, %cst_112 [2] : vector<4x5x5xf32> to vector<4x5xf32>
    %266 = vector.shape_cast %265 : vector<4x5xf32> to vector<4x5x1xf32>
    %267 = vector.broadcast %266 : vector<4x5x1xf32> to vector<4x5x5xf32>
    %268 = arith.subf %264, %267 : vector<4x5x5xf32>
    %269 = math.exp %268 : vector<4x5x5xf32>
    %cst_113 = arith.constant dense<0.000000e+00> : vector<4x5xf32>
    %270 = vector.multi_reduction <add>, %269, %cst_113 [2] : vector<4x5x5xf32> to vector<4x5xf32>
    %271 = vector.shape_cast %270 : vector<4x5xf32> to vector<4x5x1xf32>
    %272 = tpu.reciprocal %271 {approx = true} : vector<4x5x1xf32> -> vector<4x5x1xf32>
    %273 = vector.broadcast %272 : vector<4x5x1xf32> to vector<4x5x5xf32>
    %274 = arith.mulf %269, %273 : vector<4x5x5xf32>
    "tpu.trace_start"() <{level = 10 : i32, message = "vqk,vke->vqe"}> : () -> ()
    %cst_114 = arith.constant dense<0.000000e+00> : vector<4x5x8xf32>
    %275 = tpu.matmul %274, %263, %cst_114 {dimension_numbers = #tpu.dot_dimension_numbers<[2], [1], [1], [2], [0, 0, 0, 1, 1, 2], [0], [0]>} : vector<4x5x5xf32>, vector<4x5x8xf32>, vector<4x5x8xf32> -> vector<4x5x8xf32>
    "tpu.trace_stop"() : () -> ()
    %276 = tpu.concatenate %230, %245, %260, %275 in 2 : vector<4x5x8xf32>, vector<4x5x8xf32>, vector<4x5x8xf32>, vector<4x5x8xf32> -> vector<4x5x32xf32>
    %277 = vector.shape_cast %276 : vector<4x5x32xf32> to vector<20x32xf32>
    %c1_115 = arith.constant 1 : index
    %c0_116 = arith.constant 0 : index
    %c0_117 = arith.constant 0 : index
    %278 = vector.load %arg10[%c1_115, %c0_116, %c0_117] : memref<2x32x32xf32, #tpu.memory_space<vmem>>, vector<1x32x32xf32>
    %279 = vector.shape_cast %278 : vector<1x32x32xf32> to vector<32x32xf32>
    %cst_118 = arith.constant dense<0.000000e+00> : vector<20x32xf32>
    %280 = tpu.matmul %277, %279, %cst_118 {dimension_numbers = #tpu.dot_dimension_numbers<[1], [0], [0], [1], [0, 0, 1, 1], [], []>} : vector<20x32xf32>, vector<32x32xf32>, vector<20x32xf32> -> vector<20x32xf32>
    %c1_119 = arith.constant 1 : index
    %c0_120 = arith.constant 0 : index
    %c0_121 = arith.constant 0 : index
    %281 = vector.load %arg11[%c1_119, %c0_120, %c0_121] : memref<2x1x32xf32, #tpu.memory_space<vmem>>, vector<1x1x32xf32>
    %282 = vector.shape_cast %281 : vector<1x1x32xf32> to vector<1x32xf32>
    %283 = vector.broadcast %282 : vector<1x32xf32> to vector<20x32xf32>
    %284 = arith.addf %280, %283 : vector<20x32xf32>
    %285 = arith.addf %181, %284 : vector<20x32xf32>
    %c1_122 = arith.constant 1 : index
    %c0_123 = arith.constant 0 : index
    %c0_124 = arith.constant 0 : index
    %286 = vector.load %arg12[%c1_122, %c0_123, %c0_124] : memref<2x1x32xf32, #tpu.memory_space<vmem>>, vector<1x1x32xf32>
    %287 = vector.shape_cast %286 : vector<1x1x32xf32> to vector<1x32xf32>
    %c1_125 = arith.constant 1 : index
    %c0_126 = arith.constant 0 : index
    %c0_127 = arith.constant 0 : index
    %288 = vector.load %arg13[%c1_125, %c0_126, %c0_127] : memref<2x1x32xf32, #tpu.memory_space<vmem>>, vector<1x1x32xf32>
    %289 = vector.shape_cast %288 : vector<1x1x32xf32> to vector<1x32xf32>
    %cst_128 = arith.constant dense<0.000000e+00> : vector<20xf32>
    %290 = vector.multi_reduction <add>, %285, %cst_128 [1] : vector<20x32xf32> to vector<20xf32>
    %291 = vector.shape_cast %290 : vector<20xf32> to vector<20x1xf32>
    %cst_129 = arith.constant 3.200000e+01 : f32
    %292 = vector.broadcast %cst_129 : f32 to vector<20x1xf32>
    %293 = arith.divf %291, %292 : vector<20x1xf32>
    %294 = arith.mulf %285, %285 : vector<20x32xf32>
    %cst_130 = arith.constant dense<0.000000e+00> : vector<20xf32>
    %295 = vector.multi_reduction <add>, %294, %cst_130 [1] : vector<20x32xf32> to vector<20xf32>
    %296 = vector.shape_cast %295 : vector<20xf32> to vector<20x1xf32>
    %cst_131 = arith.constant 3.200000e+01 : f32
    %297 = vector.broadcast %cst_131 : f32 to vector<20x1xf32>
    %298 = arith.divf %296, %297 : vector<20x1xf32>
    %299 = arith.mulf %293, %293 : vector<20x1xf32>
    %300 = arith.subf %298, %299 : vector<20x1xf32>
    %301 = vector.broadcast %293 : vector<20x1xf32> to vector<20x32xf32>
    %302 = arith.subf %285, %301 : vector<20x32xf32>
    %cst_132 = arith.constant 9.99999974E-6 : f32
    %303 = vector.broadcast %cst_132 : f32 to vector<20x1xf32>
    %304 = arith.addf %300, %303 : vector<20x1xf32>
    %305 = math.rsqrt %304 : vector<20x1xf32>
    %306 = vector.broadcast %305 : vector<20x1xf32> to vector<20x32xf32>
    %307 = arith.mulf %302, %306 : vector<20x32xf32>
    %308 = vector.broadcast %287 : vector<1x32xf32> to vector<20x32xf32>
    %309 = arith.mulf %307, %308 : vector<20x32xf32>
    %310 = vector.broadcast %289 : vector<1x32xf32> to vector<20x32xf32>
    %311 = arith.addf %309, %310 : vector<20x32xf32>
    %c1_133 = arith.constant 1 : index
    %c0_134 = arith.constant 0 : index
    %c0_135 = arith.constant 0 : index
    %312 = vector.load %arg14[%c1_133, %c0_134, %c0_135] : memref<2x32x64xf32, #tpu.memory_space<vmem>>, vector<1x32x64xf32>
    %313 = vector.shape_cast %312 : vector<1x32x64xf32> to vector<32x64xf32>
    %cst_136 = arith.constant dense<0.000000e+00> : vector<20x64xf32>
    %314 = tpu.matmul %311, %313, %cst_136 {dimension_numbers = #tpu.dot_dimension_numbers<[1], [0], [0], [1], [0, 0, 1, 1], [], []>} : vector<20x32xf32>, vector<32x64xf32>, vector<20x64xf32> -> vector<20x64xf32>
    %c1_137 = arith.constant 1 : index
    %c0_138 = arith.constant 0 : index
    %c0_139 = arith.constant 0 : index
    %315 = vector.load %arg15[%c1_137, %c0_138, %c0_139] : memref<2x1x64xf32, #tpu.memory_space<vmem>>, vector<1x1x64xf32>
    %316 = vector.shape_cast %315 : vector<1x1x64xf32> to vector<1x64xf32>
    %317 = vector.broadcast %316 : vector<1x64xf32> to vector<20x64xf32>
    %318 = arith.addf %314, %317 : vector<20x64xf32>
    %cst_140 = arith.constant 1.702000e+00 : f32
    %319 = vector.broadcast %cst_140 : f32 to vector<20x64xf32>
    %320 = arith.mulf %319, %318 : vector<20x64xf32>
    %321 = arith.negf %320 : vector<20x64xf32>
    %322 = math.exp %321 : vector<20x64xf32>
    %cst_141 = arith.constant 1.000000e+00 : f32
    %323 = vector.broadcast %cst_141 : f32 to vector<20x64xf32>
    %324 = arith.addf %323, %322 : vector<20x64xf32>
    %325 = arith.divf %323, %324 : vector<20x64xf32>
    %326 = arith.mulf %318, %325 : vector<20x64xf32>
    %c1_142 = arith.constant 1 : index
    %c0_143 = arith.constant 0 : index
    %c0_144 = arith.constant 0 : index
    %327 = vector.load %arg16[%c1_142, %c0_143, %c0_144] : memref<2x64x32xf32, #tpu.memory_space<vmem>>, vector<1x64x32xf32>
    %328 = vector.shape_cast %327 : vector<1x64x32xf32> to vector<64x32xf32>
    %cst_145 = arith.constant dense<0.000000e+00> : vector<20x32xf32>
    %329 = tpu.matmul %326, %328, %cst_145 {dimension_numbers = #tpu.dot_dimension_numbers<[1], [0], [0], [1], [0, 0, 1, 1], [], []>} : vector<20x64xf32>, vector<64x32xf32>, vector<20x32xf32> -> vector<20x32xf32>
    %c1_146 = arith.constant 1 : index
    %c0_147 = arith.constant 0 : index
    %c0_148 = arith.constant 0 : index
    %330 = vector.load %arg17[%c1_146, %c0_147, %c0_148] : memref<2x1x32xf32, #tpu.memory_space<vmem>>, vector<1x1x32xf32>
    %331 = vector.shape_cast %330 : vector<1x1x32xf32> to vector<1x32xf32>
    %332 = vector.broadcast %331 : vector<1x32xf32> to vector<20x32xf32>
    %333 = arith.addf %329, %332 : vector<20x32xf32>
    %334 = arith.addf %285, %333 : vector<20x32xf32>
    %335 = vector.shape_cast %334 : vector<20x32xf32> to vector<2x2x5x32xf32>
    %cst_149 = arith.constant dense<0xFF800000> : vector<2x5x32xf32>
    %336 = vector.multi_reduction <maximumf>, %335, %cst_149 [1] : vector<2x2x5x32xf32> to vector<2x5x32xf32>
    %c0_150 = arith.constant 0 : index
    %c0_151 = arith.constant 0 : index
    %c0_152 = arith.constant 0 : index
    %337 = vector.load %arg18[%c0_150, %c0_151, %c0_152] : memref<2x5x32xf32, #tpu.memory_space<vmem>>, vector<2x5x32xf32>
    tpu.vector_store %arg18[%c0_150, %c0_151, %c0_152], %336 {strides = array<i32>} : memref<2x5x32xf32, #tpu.memory_space<vmem>>, vector<2x5x32xf32>,
    return
  }
  func.func @transform_0(%arg0: i32) -> (i32, i32) {
    %c0_i32 = arith.constant 0 : i32
    %c0_i32_0 = arith.constant 0 : i32
    %c0_i32_1 = arith.constant 0 : i32
    return %c0_i32, %c0_i32_0 : i32, i32
  }
  func.func @transform_1(%arg0: i32) -> (i32, i32) {
    %c0_i32 = arith.constant 0 : i32
    %c0_i32_0 = arith.constant 0 : i32
    %c0_i32_1 = arith.constant 0 : i32
    return %c0_i32, %c0_i32_0 : i32, i32
  }
  func.func @transform_2(%arg0: i32) -> (i32, i32) {
    %c0_i32 = arith.constant 0 : i32
    %c0_i32_0 = arith.constant 0 : i32
    %c0_i32_1 = arith.constant 0 : i32
    return %c0_i32, %c0_i32_0 : i32, i32
  }
  func.func @transform_3(%arg0: i32) -> (i32, i32) {
    %c0_i32 = arith.constant 0 : i32
    %c0_i32_0 = arith.constant 0 : i32
    %c0_i32_1 = arith.constant 0 : i32
    return %c0_i32, %c0_i32_0 : i32, i32
  }
  func.func @transform_4(%arg0: i32) -> (i32, i32) {
    %c0_i32 = arith.constant 0 : i32
    %c0_i32_0 = arith.constant 0 : i32
    %c0_i32_1 = arith.constant 0 : i32
    return %c0_i32, %c0_i32_0 : i32, i32
  }
  func.func @transform_5(%arg0: i32) -> (i32, i32, i32) {
    %c0_i32 = arith.constant 0 : i32
    %c0_i32_0 = arith.constant 0 : i32
    %c0_i32_1 = arith.constant 0 : i32
    %c0_i32_2 = arith.constant 0 : i32
    return %c0_i32, %c0_i32_0, %c0_i32_1 : i32, i32, i32
  }
  func.func @transform_6(%arg0: i32) -> (i32, i32, i32) {
    %c0_i32 = arith.constant 0 : i32
    %c0_i32_0 = arith.constant 0 : i32
    %c0_i32_1 = arith.constant 0 : i32
    %c0_i32_2 = arith.constant 0 : i32
    return %c0_i32, %c0_i32_0, %c0_i32_1 : i32, i32, i32
  }
  func.func @transform_7(%arg0: i32) -> (i32, i32, i32) {
    %c0_i32 = arith.constant 0 : i32
    %c0_i32_0 = arith.constant 0 : i32
    %c0_i32_1 = arith.constant 0 : i32
    %c0_i32_2 = arith.constant 0 : i32
    return %c0_i32, %c0_i32_0, %c0_i32_1 : i32, i32, i32
  }
  func.func @transform_8(%arg0: i32) -> (i32, i32, i32) {
    %c0_i32 = arith.constant 0 : i32
    %c0_i32_0 = arith.constant 0 : i32
    %c0_i32_1 = arith.constant 0 : i32
    %c0_i32_2 = arith.constant 0 : i32
    return %c0_i32, %c0_i32_0, %c0_i32_1 : i32, i32, i32
  }
  func.func @transform_9(%arg0: i32) -> (i32, i32, i32) {
    %c0_i32 = arith.constant 0 : i32
    %c0_i32_0 = arith.constant 0 : i32
    %c0_i32_1 = arith.constant 0 : i32
    %c0_i32_2 = arith.constant 0 : i32
    return %c0_i32, %c0_i32_0, %c0_i32_1 : i32, i32, i32
  }
  func.func @transform_10(%arg0: i32) -> (i32, i32, i32) {
    %c0_i32 = arith.constant 0 : i32
    %c0_i32_0 = arith.constant 0 : i32
    %c0_i32_1 = arith.constant 0 : i32
    %c0_i32_2 = arith.constant 0 : i32
    return %c0_i32, %c0_i32_0, %c0_i32_1 : i32, i32, i32
  }
  func.func @transform_11(%arg0: i32) -> (i32, i32, i32) {
    %c0_i32 = arith.constant 0 : i32
    %c0_i32_0 = arith.constant 0 : i32
    %c0_i32_1 = arith.constant 0 : i32
    %c0_i32_2 = arith.constant 0 : i32
    return %c0_i32, %c0_i32_0, %c0_i32_1 : i32, i32, i32
  }
  func.func @transform_12(%arg0: i32) -> (i32, i32, i32) {
    %c0_i32 = arith.constant 0 : i32
    %c0_i32_0 = arith.constant 0 : i32
    %c0_i32_1 = arith.constant 0 : i32
    %c0_i32_2 = arith.constant 0 : i32
    return %c0_i32, %c0_i32_0, %c0_i32_1 : i32, i32, i32
  }
  func.func @transform_13(%arg0: i32) -> (i32, i32, i32) {
    %c0_i32 = arith.constant 0 : i32
    %c0_i32_0 = arith.constant 0 : i32
    %c0_i32_1 = arith.constant 0 : i32
    %c0_i32_2 = arith.constant 0 : i32
    return %c0_i32, %c0_i32_0, %c0_i32_1 : i32, i32, i32
  }
  func.func @transform_14(%arg0: i32) -> (i32, i32, i32) {
    %c0_i32 = arith.constant 0 : i32
    %c0_i32_0 = arith.constant 0 : i32
    %c0_i32_1 = arith.constant 0 : i32
    %c0_i32_2 = arith.constant 0 : i32
    return %c0_i32, %c0_i32_0, %c0_i32_1 : i32, i32, i32
  }
  func.func @transform_15(%arg0: i32) -> (i32, i32, i32) {
    %c0_i32 = arith.constant 0 : i32
    %c0_i32_0 = arith.constant 0 : i32
    %c0_i32_1 = arith.constant 0 : i32
    %c0_i32_2 = arith.constant 0 : i32
    return %c0_i32, %c0_i32_0, %c0_i32_1 : i32, i32, i32
  }
  func.func @transform_16(%arg0: i32) -> (i32, i32, i32) {
    %c0_i32 = arith.constant 0 : i32
    %c0_i32_0 = arith.constant 0 : i32
    %c0_i32_1 = arith.constant 0 : i32
    %c0_i32_2 = arith.constant 0 : i32
    return %c0_i32, %c0_i32_0, %c0_i32_1 : i32, i32, i32
  }
  func.func @transform_17(%arg0: i32) -> (i32, i32, i32) {
    %c0_i32 = arith.constant 0 : i32
    %c0_i32_0 = arith.constant 0 : i32
    %c0_i32_1 = arith.constant 0 : i32
    %c0_i32_2 = arith.constant 0 : i32
    return %c0_i32, %c0_i32_0, %c0_i32_1 : i32, i32, i32
  }
}

</mosaic_0001>

<bundles_post_ra>
// kernel: tpu_custom_call.1
= control target key start
LH: loop header
LB: loop body
LE: loop exit
PB: predicated region body
PF: predicated region fallthrough
CT: control target
= control target key end

     0   :  { %vm179_vm0 = vcmask 261120   ;;  %vm186_vm1 = vcmask 257024   ;;  %vm9418_vm2 = vmmov 0   ;;  %vm576_vm3 = vcmask 64512   ;;  %s9422_s24 = smov 64   ;;  %s9423_s25 = smov 88   ;;  %s10938_s1 = inlined_call_operand.vmem [shape: f32[256,32], index: 1, kind: input, shape index: {}]   ;;  %s10939_s0 = inlined_call_operand.vmem [shape: f32[20,256], index: 0, kind: input, shape index: {}]   ;;  %s10940_s2 = inlined_call_operand.vmem [shape: f32[20,32], index: 2, kind: input, shape index: {}]   ;;  %s10941_s3 = inlined_call_operand.vmem [shape: f32[1,32], index: 3, kind: input, shape index: {}]   ;;  %s10942_s4 = inlined_call_operand.vmem [shape: f32[1,32], index: 4, kind: input, shape index: {}]   ;;  %s10943_s7 = inlined_call_operand.vmem [shape: f32[2,32,96], index: 7, kind: input, shape index: {}]   ;;  %s10944_s5 = inlined_call_operand.vmem [shape: f32[2,1,32], index: 5, kind: input, shape index: {}]   ;;  %s10945_s6 = inlined_call_operand.vmem [shape: f32[2,1,32], index: 6, kind: input, shape index: {}]   ;;  %s10946_s8 = inlined_call_operand.vmem [shape: f32[2,1,96], index: 8, kind: input, shape index: {}]   ;;  %s10947_s9 = inlined_call_operand.vmem [shape: f32[2,32,32], index: 9, kind: input, shape index: {}]   ;;  %s10948_s10 = inlined_call_operand.vmem [shape: f32[2,1,32], index: 10, kind: input, shape index: {}]   ;;  %s10949_s13 = inlined_call_operand.vmem [shape: f32[2,32,64], index: 13, kind: input, shape index: {}]   ;;  %s10950_s11 = inlined_call_operand.vmem [shape: f32[2,1,32], index: 11, kind: input, shape index: {}]   ;;  %s10951_s12 = inlined_call_operand.vmem [shape: f32[2,1,32], index: 12, kind: input, shape index: {}]   ;;  %s10952_s15 = inlined_call_operand.vmem [shape: f32[2,64,32], index: 15, kind: input, shape index: {}]   ;;  %s10953_s14 = inlined_call_operand.vmem [shape: f32[2,1,64], index: 14, kind: input, shape index: {}]   ;;  %s10954_s16 = inlined_call_operand.vmem [shape: f32[2,1,32], index: 16, kind: input, shape index: {}]   ;;  %s10955_s17 = inlined_call_operand.vmem [shape: f32[2,5,32], index: 17, kind: output, shape index: {}]  }
   0x1   :  { %10966 = sst [smem:[#allocation2_spill]] %s10938_s1  ;;  %v94_v55 = vld [vmem:[%s10940_s2] sm:$0xff]  ;;  %v95_v60 = vld [vmem:[%s10940_s2 + $0x8] sm:$0xff]  ;;  %vm996_vm4 = vcmask 36864   ;;  %vm1047_vm5 = vcmask 1044480   ;;  %s9424_s27 = smov 120  }
   0x2   :  { %10967 = sst [smem:[#allocation3_spill]] %s10939_s0  ;;  %s10968_s26 = sld [smem:[#allocation2_spill]]  ;;  %vm1043_vm6 = vcmask 39936   ;;  %vm3395_vm7 = vcmask 130048   ;;  %vm3400_vm8 = vcmask 195584   ;;  %vm3991_vm9 = vcmask 523264  }
   0x3   :  { %s10969_s20 = sld [smem:[#allocation3_spill]]  ;;  %s9427_s28 = smov 112   ;;  %vm8197_vm11 = vcmask 258048  }
   0x4   :  { %s9428_s29 = smov 48   ;;  %s9429_s1 = smov 72  }
   0x5   :  { %s10962_s30 = smov 40   ;;  %s10958_s18 = smov 8  }
   0x6   :  { %s10960_s19 = smov 16   ;;  %s9434_s0 = smov 24  }
   0x8   :  { %v78_v0 = vld [vmem:[%s10968_s26 + $0x80] sm:$0xff]  ;;  %v79_v1 = vld [vmem:[%s10968_s26 + $0x88] sm:$0xff]  ;;  %v80_v5 = vld [vmem:[%s10968_s26 + $0x90] sm:$0xff] }
   0x9   :  { %v62_v2 = vld [vmem:[%s10968_s26] sm:$0xff]  ;;  %v9121_v3 = vpack.c.bf16 %v79_v1, %v78_v0  ;;  %v63_v4 = vld [vmem:[%s10968_s26 + $0x8] sm:$0xff]  ;;  %v81_v6 = vld [vmem:[%s10968_s26 + $0x98] sm:$0xff] }
   0xa   :  { %v9123_v7 = vpack.c.bf16 %v63_v4, %v62_v2  ;;  %v9125_v8 = vpack.c.bf16 %v81_v6, %v80_v5  ;;  %v64_v9 = vld [vmem:[%s10968_s26 + $0x10] sm:$0xff]  ;;  %v65_v10 = vld [vmem:[%s10968_s26 + $0x18] sm:$0xff]  ;;  %v82_v11 = vld [vmem:[%s10968_s26 + $0xa0] sm:$0xff] }
   0xb   :  { %9122 = vmatprep.subr.bf16.mxu0 %v9121_v3  ;;  %v83_v12 = vld [vmem:[%s10968_s26 + $0xa8] sm:$0xff]  ;;  %v9127_v13 = vpack.c.bf16 %v65_v10, %v64_v9  ;;  %v66_v15 = vld [vmem:[%s10968_s26 + $0x20] sm:$0xff]  ;;  %v84_v17 = vld [vmem:[%s10968_s26 + $0xb0] sm:$0xff] }
   0xc   :  { %9124 = vmatpush3.bf16.msra.mxu0 %v9123_v7  ;;  %v9129_v14 = vpack.c.bf16 %v83_v12, %v82_v11  ;;  %v67_v16 = vld [vmem:[%s10968_s26 + $0x28] sm:$0xff]  ;;  %v85_v18 = vld [vmem:[%s10968_s26 + $0xb8] sm:$0xff]  ;;  %v68_v21 = vld [vmem:[%s10968_s26 + $0x30] sm:$0xff] }
   0xd   :  { %9126 = vmatprep.subr.bf16.mxu0 %v9125_v8  ;;  %v9131_v19 = vpack.c.bf16 %v67_v16, %v66_v15  ;;  %v9133_v20 = vpack.c.bf16 %v85_v18, %v84_v17  ;;  %v69_v22 = vld [vmem:[%s10968_s26 + $0x38] sm:$0xff]  ;;  %v86_v23 = vld [vmem:[%s10968_s26 + $0xc0] sm:$0xff]  ;;  %v87_v24 = vld [vmem:[%s10968_s26 + $0xc8] sm:$0xff] }
   0xe   :  { %v57_v25 = vld [vmem:[%s10969_s20 + $0x8] sm:$0xff]  ;;  %v9135_v26 = vpack.c.bf16 %v69_v22, %v68_v21  ;;  %v9137_v27 = vpack.c.bf16 %v87_v24, %v86_v23  ;;  %v70_v28 = vld [vmem:[%s10968_s26 + $0x40] sm:$0xff]  ;;  %v88_v30 = vld [vmem:[%s10968_s26 + $0xd0] sm:$0xff] }
   0xf   :  { %161 = vmatprep.mubr.f32.mxu0 %v57_v25  ;;  %v71_v29 = vld [vmem:[%s10968_s26 + $0x48] sm:$0xff]  ;;  %v89_v31 = vld [vmem:[%s10968_s26 + $0xd8] sm:$0xff]  ;;  %v72_v34 = vld [vmem:[%s10968_s26 + $0x50] sm:$0xff] }
  0x10   :  { %9128 = vmatpush3.bf16.msra.mxu0 %v9127_v13  ;;  %v9139_v32 = vpack.c.bf16 %v71_v29, %v70_v28  ;;  %v9141_v33 = vpack.c.bf16 %v89_v31, %v88_v30  ;;  %v73_v35 = vld [vmem:[%s10968_s26 + $0x58] sm:$0xff]  ;;  %v90_v36 = vld [vmem:[%s10968_s26 + $0xe0] sm:$0xff]  ;;  %v91_v37 = vld [vmem:[%s10968_s26 + $0xe8] sm:$0xff] }
  0x11   :  { %9130 = vmatprep.subr.bf16.mxu0 %v9129_v14  ;;  %v9143_v38 = vpack.c.bf16 %v73_v35, %v72_v34  ;;  %v9145_v39 = vpack.c.bf16 %v91_v37, %v90_v36  ;;  %v74_v40 = vld [vmem:[%s10968_s26 + $0x60] sm:$0xff]  ;;  %v75_v41 = vld [vmem:[%s10968_s26 + $0x68] sm:$0xff]  ;;  %v92_v42 = vld [vmem:[%s10968_s26 + $0xf0] sm:$0xff] }
  0x12   :  { %v93_v43 = vld [vmem:[%s10968_s26 + $0xf8] sm:$0xff]  ;;  %v9147_v44 = vpack.c.bf16 %v75_v41, %v74_v40  ;;  %v76_v46 = vld [vmem:[%s10968_s26 + $0x70] sm:$0xff]  ;;  %v56_v49 = vld [vmem:[%s10969_s20] sm:$0xff] }
  0x13   :  { %v9149_v45 = vpack.c.bf16 %v93_v43, %v92_v42  ;;  %v77_v47 = vld [vmem:[%s10968_s26 + $0x78] sm:$0xff]  ;;  %v58_v51 = vld [vmem:[%s10969_s20 + $0x10] sm:$0xff]  ;;  %v61_v52 = vld [vmem:[%s10969_s20 + $0x28] sm:$0xf]  ;;  %s10964_s26 = smov 104  }
  0x14   :  { %9132 = vmatpush3.bf16.msra.mxu0 %v9131_v19  ;;  %v9151_v48 = vpack.c.bf16 %v77_v47, %v76_v46  ;;  %v59_v50 = vld [vmem:[%s10969_s20 + $0x18] sm:$0xff]  ;;  %v60_v53 = vld [vmem:[%s10969_s20 + $0x20] sm:$0xf]  ;;  %v96_v3 = vld [vmem:[%s10940_s2 + $0x10] sm:$0xf]  ;;  %s9421_s2 = smov 96  }
  0x15   :  { %9134 = vmatprep.subr.bf16.mxu0 %v9133_v20  ;;  %v8204_v37 = vld [vmem:[%s10941_s3] ss:$0 sm:$0xff]  ;;  %s9425_s3 = smov 56  }
  0x18   :  { %9136 = vmatpush3.bf16.msra.mxu0 %v9135_v26 }
  0x19   :  { %9138 = vmatprep.subr.bf16.mxu0 %v9137_v27 }
  0x1c   :  { %9140 = vmatpush3.bf16.msra.mxu0 %v9139_v32 }
  0x1d   :  { %9142 = vmatprep.subr.bf16.mxu0 %v9141_v33 }
  0x20   :  { %9144 = vmatpush3.bf16.msra.mxu0 %v9143_v38 }
  0x21   :  { %9146 = vmatprep.subr.bf16.mxu0 %v9145_v39  ;;  %v8205_v39 = vld [vmem:[%s10942_s4] ss:$0 sm:$0xff]  ;;  %s9426_s4 = smov 80  }
  0x24   :  { %9148 = vmatpush3.bf16.msra.mxu0 %v9147_v44 }
  0x25   :  { %9150 = vmatprep.subr.bf16.mxu0 %v9149_v45 }
  0x28   :  { %9152 = vmatpush3.bf16.msra.mxu0 %v9151_v48 }
  0x2b   :  { %162 = vmatmul.mubr.f32.vlgmr.msra.gmra.mrb[0].mxu0 %v56_v49 }
  0x2c   :  { %166 = vmatprep.mubr.f32.mxu0 %v59_v50 }
  0x2f   :  { %167 = vmatmul.mubr.f32.gmra.mrb[2].mxu0 %v58_v51 }
  0x30   :  { %171 = vmatprep.mubr.f32.mxu0 %v61_v52 }
  0x33   :  { %172 = vmatmul.mubr.f32.gmra.mrb[4].mxu0 %v60_v53 }
  0xfe   :  { %v8448_v54 = vpop.f32.mrb[0].mxu0 }
  0xff   :  { %v8449_v56 = vpop.f32.mrb[1].mxu0 }
 0x100   :  { %v8450_v57 = vadd.f32 %v8449_v56, %v8448_v54 }
 0x102   :  { %v164_v58 = vadd.f32 %v8450_v57, %v94_v55  ;;  %v8451_v59 = vpop.f32.mrb[2].mxu0 }
 0x103   :  { %v8452_v61 = vpop.f32.mrb[3].mxu0 }
 0x104   :  { %v8453_v62 = vadd.f32 %v8452_v61, %v8451_v59  ;;  %v180_v63 = vsel %vm179_vm0, %v164_v58, 0.0  ;;  %v194_v0 = vmul.f32 %v164_v58, %v164_v58  ;;  %v310_v61 = vld [vmem:[%s10943_s7] sm:$0xff] }
 0x105   :  { %181 = vadd.xlane.f32.xlu0 %v180_v63 }
 0x106   :  { %v169_v1 = vadd.f32 %v8453_v62, %v95_v60  ;;  %v8454_v2 = vpop.f32.mrb[4].mxu0  ;;  %v197_v7 = vsel %vm179_vm0, %v194_v0, 0.0  ;;  %v311_v62 = vld [vmem:[%s10943_s7 + $0x8] sm:$0xff]  ;;  %v9417_v0 = vmov 0.0|0.0  }
 0x107   :  { %v8455_v4 = vpop.f32.mrb[5].mxu0  ;;  %v9154_v63 = vpack.c.bf16 %v311_v62, %v310_v61  ;;  %9153 = vmatprep.subr.bf16.mxu0 %v9417_v0  ;;  %9213 = vmatprep.subr.bf16.mxu1 %v9417_v0 }
 0x108   :  { %v8456_v5 = vadd.f32 %v8455_v4, %v8454_v2  ;;  %v183_v6 = vsel %vm179_vm0, %v169_v1, 0.0  ;;  %v195_v8 = vmul.f32 %v169_v1, %v169_v1  ;;  %v313_v2 = vld [vmem:[%s10943_s7 + $0x18] sm:$0xff]  ;;  %v9419_v4 = vmov 0.0  }
 0x109   :  { %184 = vadd.xlane.f32.xlu1 %v183_v6  ;;  %198 = vadd.xlane.f32.xlu0 %v197_v7 }
 0x10a   :  { %v174_v9 = vadd.f32 %v8456_v5, %v96_v3  ;;  %v200_v10 = vsel %vm179_vm0, %v195_v8, 0.0  ;;  %9155 = vmatpush3.bf16.msra.mxu0 %v9154_v63  ;;  %9215 = vmatpush3.bf16.msra.mxu1 %v9154_v63 }
 0x10b   :  { %9156 = vmatprep.subr.bf16.mxu0 %v9417_v0  ;;  %9214 = vmatprep.subr.bf16.mxu1 %v9417_v0 }
 0x10c   :  { %v187_v11 = vsel %vm186_vm1, %v174_v9, 0.0  ;;  %v196_v12 = vmul.f32 %v174_v9, %v174_v9  ;;  %8657 = vmatprep.mubr.msk.f32.mxu0 %vm9418_vm2, %v9419_v4  ;;  %8663 = vmatprep.mubr.msk.f32.mxu1 %vm9418_vm2, %v9419_v4 }
 0x10d   :  { %201 = vadd.xlane.f32.xlu1 %v200_v10  ;;  %188 = vadd.xlane.f32.xlu0 %v187_v11 }
 0x10e   :  { %v203_v13 = vsel %vm186_vm1, %v196_v12, 0.0 }
 0x111   :  { %204 = vadd.xlane.f32.xlu1 %v203_v13 }
 0x192   :  { %v182_v14 = vpop.xlane.xlu0 %181 }
 0x193   :  { %v191_v15 = vmul.f32 0.03125, %v182_v14 }
 0x195   :  { %v209_v18 = vmul.f32 %v191_v15, %v191_v15  ;;  %v215_v35 = vsub.f32 %v164_v58, %v191_v15 }
 0x196   :  { %v185_v16 = vpop.xlane.xlu1 %184  ;;  %v199_v17 = vpop.xlane.xlu0 %198 }
 0x197   :  { %v192_v19 = vmul.f32 0.03125, %v185_v16  ;;  %v206_v20 = vmul.f32 0.03125, %v199_v17 }
 0x199   :  { %v210_v21 = vmul.f32 %v192_v19, %v192_v19  ;;  %v212_v22 = vsub.f32 %v206_v20, %v209_v18  ;;  %v216_v40 = vsub.f32 %v169_v1, %v192_v19  ;;  %v312_v1 = vld [vmem:[%s10943_s7 + $0x10] sm:$0xff] }
 0x19a   :  { %v202_v23 = vpop.xlane.xlu1 %201  ;;  %v189_v24 = vpop.xlane.xlu0 %188  ;;  %v9157_v3 = vpack.c.bf16 %v313_v2, %v312_v1 }
 0x19b   :  { %v218_v25 = vadd.f32 1e-05, %v212_v22  ;;  %v207_v26 = vmul.f32 0.03125, %v202_v23  ;;  %v193_v27 = vmul.f32 0.03125, %v189_v24 }
 0x19c   :  { %9158 = vmatpush3.bf16.msra.mxu0 %v9157_v3  ;;  %9216 = vmatpush3.bf16.msra.mxu1 %v9157_v3 }
 0x19d   :  { %9235 = vrsqrt.f32 %v218_v25  ;;  %v213_v28 = vsub.f32 %v207_v26, %v210_v21  ;;  %v211_v29 = vmul.f32 %v193_v27, %v193_v27  ;;  %v217_v45 = vsub.f32 %v174_v9, %v193_v27  ;;  %8666 = vmatprep.subr.mxu1 %v9419_v4  ;;  %8696 = vmatprep.subr.mxu0 %v9419_v4 }
 0x19e   :  { %v205_v30 = vpop.xlane.xlu1 %204 }
 0x19f   :  { %v219_v31 = vadd.f32 1e-05, %v213_v28  ;;  %v208_v32 = vmul.f32 0.03125, %v205_v30  ;;  %v8206_v28 = vld [vmem:[%s10944_s5] ss:$0 sm:$0xff] }
 0x1a0   :  { %v8207_v30 = vld [vmem:[%s10945_s6] ss:$0 sm:$0xff] }
 0x1a1   :  { %9237 = vrsqrt.f32 %v219_v31  ;;  %v214_v33 = vsub.f32 %v208_v32, %v211_v29 }
 0x1a3   :  { %v220_v34 = vadd.f32 1e-05, %v214_v33 }
 0x1a5   :  { %9239 = vrsqrt.f32 %v220_v34 }
 0x1a7   :  { %v9236_v36 = vpop.eup %9235 }
 0x1a8   :  { %v224_v38 = vmul.f32 %v9236_v36, %v215_v35 }
 0x1aa   :  { %v233_v41 = vmul.f32 %v8204_v37, %v224_v38 }
 0x1ab   :  { %v9238_v42 = vpop.eup %9237 }
 0x1ac   :  { %v9660_v43 = vadd.f32 %v8205_v39, %v233_v41  ;;  %v225_v44 = vmul.f32 %v9238_v42, %v216_v40 }
 0x1ae   :  { %v247_v46 = vsel %vm179_vm0, %v9660_v43, 0.0  ;;  %v259_v47 = vmul.f32 %v9660_v43, %v9660_v43  ;;  %v234_v48 = vmul.f32 %v8204_v37, %v225_v44  ;;  %v9420_v44 = vmov 1966171168  }
 0x1af   :  { %v9240_v49 = vpop.eup %9239  ;;  %248 = vadd.xlane.f32.xlu0 %v247_v46  ;;  %v417_v46 = vlaneseq }
 0x1b0   :  { %v262_v50 = vsel %vm179_vm0, %v259_v47, 0.0  ;;  %v9667_v51 = vadd.f32 %v8205_v39, %v234_v48  ;;  %v226_v52 = vmul.f32 %v9240_v49, %v217_v45  ;;  %v415_v45 = vunpack.c.l.s4 %v9420_v44  ;;  %v8208_v49 = vld [vmem:[%s10946_s8] ss:$0 sm:$0xff] }
 0x1b1   :  { %263 = vadd.xlane.f32.xlu1 %v262_v50  ;;  %v418_v48 = vshrl.u32 %v417_v46, 7  ;;  %vm10867_vm10 = vcmp.lt.s32.totalorder %v417_v46, 32 }
 0x1b2   :  { %v250_v53 = vsel %vm179_vm0, %v9667_v51, 0.0  ;;  %v260_v54 = vmul.f32 %v9667_v51, %v9667_v51  ;;  %v235_v55 = vmul.f32 %v8204_v37, %v226_v52  ;;  %v416_v47 = vunpack.c.0.s8 %v415_v45 }
 0x1b3   :  { %251 = vadd.xlane.f32.xlu0 %v250_v53 }
 0x1b4   :  { %v265_v56 = vsel %vm179_vm0, %v260_v54, 0.0  ;;  %v9674_v57 = vadd.f32 %v8205_v39, %v235_v55  ;;  %v9725_v50 = vsub.s32 %v416_v47, %v418_v48 }
 0x1b5   :  { %266 = vadd.xlane.f32.xlu1 %v265_v56 }
 0x1b6   :  { %v253_v58 = vsel %vm186_vm1, %v9674_v57, 0.0  ;;  %v261_v59 = vmul.f32 %v9674_v57, %v9674_v57 }
 0x1b7   :  { %254 = vadd.xlane.f32.xlu0 %v253_v58 }
 0x1b8   :  { %v268_v60 = vsel %vm186_vm1, %v261_v59, 0.0 }
 0x1b9   :  { %269 = vadd.xlane.f32.xlu1 %v268_v60 }
 0x23c   :  { %v249_v5 = vpop.xlane.xlu0 %248 }
 0x23d   :  { %v256_v6 = vmul.f32 0.03125, %v249_v5 }
 0x23e   :  { %v264_v7 = vpop.xlane.xlu1 %263 }
 0x23f   :  { %v274_v8 = vmul.f32 %v256_v6, %v256_v6  ;;  %v271_v9 = vmul.f32 0.03125, %v264_v7  ;;  %v280_v26 = vsub.f32 %v9660_v43, %v256_v6 }
 0x240   :  { %v252_v10 = vpop.xlane.xlu0 %251 }
 0x241   :  { %v277_v11 = vsub.f32 %v271_v9, %v274_v8  ;;  %v257_v12 = vmul.f32 0.03125, %v252_v10 }
 0x242   :  { %v267_v13 = vpop.xlane.xlu1 %266 }
 0x243   :  { %v283_v14 = vadd.f32 1e-05, %v277_v11  ;;  %v275_v15 = vmul.f32 %v257_v12, %v257_v12  ;;  %v272_v16 = vmul.f32 0.03125, %v267_v13  ;;  %v281_v32 = vsub.f32 %v9667_v51, %v257_v12 }
 0x244   :  { %v255_v17 = vpop.xlane.xlu0 %254 }
 0x245   :  { %9241 = vrsqrt.f32 %v283_v14  ;;  %v278_v18 = vsub.f32 %v272_v16, %v275_v15  ;;  %v258_v19 = vmul.f32 0.03125, %v255_v17 }
 0x246   :  { %v270_v20 = vpop.xlane.xlu1 %269 }
 0x247   :  { %v284_v21 = vadd.f32 1e-05, %v278_v18  ;;  %v276_v22 = vmul.f32 %v258_v19, %v258_v19  ;;  %v273_v23 = vmul.f32 0.03125, %v270_v20  ;;  %v282_v36 = vsub.f32 %v9674_v57, %v258_v19 }
 0x249   :  { %9243 = vrsqrt.f32 %v284_v21  ;;  %v279_v24 = vsub.f32 %v273_v23, %v276_v22 }
 0x24b   :  { %v285_v25 = vadd.f32 1e-05, %v279_v24 }
 0x24d   :  { %9245 = vrsqrt.f32 %v285_v25 }
 0x24f   :  { %v9242_v27 = vpop.eup %9241 }
 0x250   :  { %v289_v29 = vmul.f32 %v9242_v27, %v280_v26 }
 0x252   :  { %v298_v31 = vmul.f32 %v8206_v28, %v289_v29 }
 0x253   :  { %v9244_v33 = vpop.eup %9243 }
 0x254   :  { %v307_v34 = vadd.f32 %v8207_v30, %v298_v31  ;;  %v290_v35 = vmul.f32 %v9244_v33, %v281_v32 }
 0x256   :  { %8658 = vmatmul.mubr.msk.f32.vlgmr.msra.gmra.mrb[6].mxu0 %vm179_vm0, %v307_v34  ;;  %v299_v37 = vmul.f32 %v8206_v28, %v290_v35 }
 0x257   :  { %v9246_v38 = vpop.eup %9245  ;;  %8660 = vmatprep.mubr.msk.f32.mxu0 %vm9418_vm2, %v9419_v4 }
 0x258   :  { %v308_v39 = vadd.f32 %v8207_v30, %v299_v37  ;;  %v291_v40 = vmul.f32 %v9246_v38, %v282_v36 }
 0x25a   :  { %8661 = vmatmul.mubr.msk.f32.gmra.mrb[8].mxu0 %vm179_vm0, %v308_v39  ;;  %v300_v41 = vmul.f32 %v8206_v28, %v291_v40 }
 0x25b   :  { %8698 = vmatprep.mubr.msk.f32.mxu0 %vm9418_vm2, %v9419_v4 }
 0x25c   :  { %v309_v42 = vadd.f32 %v8207_v30, %v300_v41 }
 0x25e   :  { %8664 = vmatmul.mubr.msk.f32.vlgmr.msra.gmra.mrb[0].mxu1 %vm179_vm0, %v309_v42 }
 0x25f   :  { %8668 = vmatprep.mubr.msk.f32.mxu1 %vm9418_vm2, %v9419_v4 }
 0x329   :  { %v396_v52 = vpop.f32.mrb[6].mxu0 }
 0x32a   :  { %v397_v53 = vadd.f32 %v8208_v49, %v396_v52  ;;  %v8659_v54 = vpop.f32.mrb[7].mxu0 }
 0x32c   :  { %v413_v55 = vcombine.high %v397_v53, %v397_v53  ;;  %v420_v56 = vrot.slane %v397_v53, %v9725_v50 }
 0x32d   :  { %v401_v58 = vpop.f32.mrb[8].mxu0 }
 0x32e   :  { %v427_v59 = vrot.slane %v413_v55, %v9725_v50  ;;  %v428_v60 = vcombine.high %v420_v56, %v420_v56  ;;  %v402_v61 = vadd.f32 %v8208_v49, %v401_v58  ;;  %v8662_v62 = vpop.f32.mrb[9].mxu0  ;;  %v436_v63 = vrot.slane %v420_v56, %v9725_v50 }
 0x330   :  { %v429_v1 = vcombine.high %v427_v59, %v427_v59  ;;  %v443_v2 = vrot.slane %v427_v59, %v9725_v50  ;;  %v450_v3 = vrot.slane %v428_v60, %v9725_v50  ;;  %v462_v5 = vcombine.high %v402_v61, %v402_v61 }
 0x331   :  { %v469_v6 = vrot.slane %v402_v61, %v9725_v50  ;;  %v406_v7 = vpop.f32.mrb[0].mxu1 }
 0x332   :  { %v457_v8 = vrot.slane %v429_v1, %v9725_v50  ;;  %v459_v9 = vcombine.high %v443_v2, %v443_v2  ;;  %v535_v10 = vcombine.low %v436_v63, %v450_v3  ;;  %v8212_v11 = vcombine.high %v436_v63, %v450_v3  ;;  %v8665_v12 = vpop.f32.mrb[1].mxu1 }
 0x333   :  { %v557_v13 = vrot.slane %v443_v2, %v9725_v50  ;;  %v476_v14 = vrot.slane %v462_v5, %v9725_v50  ;;  %v477_v15 = vcombine.high %v469_v6, %v469_v6  ;;  %v485_v16 = vrot.slane %v469_v6, %v9725_v50 }
 0x334   :  { %v543_v17 = vrot.slane %v535_v10, %v9725_v50  ;;  %v550_v18 = vrot.slane %v8212_v11, %v9725_v50  ;;  %v651_v19 = vcombine.low %v457_v8, %v459_v9  ;;  %v461_v20 = vcombine.high %v457_v8, %v457_v8 }
 0x335   :  { %v478_v21 = vcombine.high %v476_v14, %v476_v14  ;;  %v492_v22 = vrot.slane %v476_v14, %v9725_v50  ;;  %v499_v23 = vrot.slane %v477_v15, %v9725_v50  ;;  %v572_v25 = vrot.slane %v557_v13, %v9725_v50 }
 0x336   :  { %v558_v24 = vcombine.low %v543_v17, %v550_v18  ;;  %v652_v26 = vcombine.low %v461_v20, %v485_v16  ;;  %v407_v27 = vadd.f32 %v8208_v49, %v406_v7  ;;  %v659_v30 = vrot.slane %v651_v19, %v9725_v50 }
 0x337   :  { %v506_v28 = vrot.slane %v478_v21, %v9725_v50  ;;  %v508_v29 = vcombine.high %v492_v22, %v492_v22  ;;  %v8217_v31 = vcombine.high %v485_v16, %v499_v23  ;;  %v673_v34 = vrot.slane %v499_v23, %v9725_v50 }
 0x338   :  { %v565_v32 = vrot.slane %v558_v24, %v9725_v50  ;;  %v666_v33 = vrot.slane %v652_v26, %v9725_v50  ;;  %v517_v35 = vrot.slane %v407_v27, %v9725_v50 }
 0x339   :  { %v767_v36 = vcombine.low %v492_v22, %v506_v28  ;;  %v510_v39 = vcombine.high %v506_v28, %v506_v28  ;;  %v774_v41 = vrot.slane %v8217_v31, %v9725_v50  ;;  %v688_v47 = vrot.slane %v673_v34, %v9725_v50 }
 0x33a   :  { %v9748_v37 = vcombine.low %v565_v32, %v572_v25  ;;  %v674_v38 = vcombine.low %v659_v30, %v666_v33  ;;  %v518_v40 = vcombine.high %v517_v35, %v517_v35  ;;  %v525_v44 = vrot.slane %v517_v35, %v9725_v50 }
 0x33b   :  { %v781_v42 = vrot.slane %v767_v36, %v9725_v50  ;;  %v788_v48 = vrot.slane %v508_v29, %v9725_v50 }
 0x33c   :  { %v681_v45 = vrot.slane %v674_v38, %v9725_v50  ;;  %v532_v49 = vrot.slane %v518_v40, %v9725_v50  ;;  %574 = vrot.lane.b32.xlu0 %v9748_v37, %s9421_s2  ;;  %v533_v53 = vcombine.high %v525_v44, %v525_v44  ;;  %v881_v54 = vcombine.low %v510_v39, %v525_v44 }
 0x33d   :  { %v789_v52 = vcombine.low %v774_v41, %v781_v42  ;;  %v803_v61 = vrot.slane %v788_v48, %v9725_v50 }
 0x33e   :  { %v9759_v55 = vcombine.low %v681_v45, %v688_v47  ;;  %v534_v56 = vcombine.high %v532_v49, %v532_v49  ;;  %v882_v59 = vcombine.low %v532_v49, %v533_v53  ;;  %v889_v60 = vrot.slane %v881_v54, %v9725_v50 }
 0x33f   :  { %v796_v58 = vrot.slane %v789_v52, %v9725_v50 }
 0x340   :  { %690 = vrot.lane.b32.xlu1 %v9759_v55, %s9421_s2  ;;  %v896_v62 = vrot.slane %v882_v59, %v9725_v50  ;;  %v903_v63 = vrot.slane %v534_v56, %v9725_v50 }
 0x341   :  { %v9768_v1 = vcombine.low %v796_v58, %v803_v61 }
 0x342   :  { %v904_v2 = vcombine.low %v889_v60, %v896_v62  ;;  %v918_v5 = vrot.slane %v903_v63, %v9725_v50 }
 0x344   :  { %805 = vrot.lane.b32.xlu1 %v9768_v1, %s9421_s2  ;;  %v911_v3 = vrot.slane %v904_v2, %v9725_v50 }
 0x346   :  { %v9774_v6 = vcombine.low %v911_v3, %v918_v5 }
 0x348   :  { %920 = vrot.lane.b32.xlu1 %v9774_v6, %s9421_s2 }
 0x3ae   :  { %v575_v7 = vpop.permute.xlu0 %574 }
 0x3af   :  { %8667 = vmatpush3.xpose.msk.msra.mxu1 %vm576_vm3, %v575_v7 }
 0x3b0   :  { %8671 = vmatprep.subr.mxu1 %v9419_v4 }
 0x3b2   :  { %v691_v8 = vpop.permute.xlu1 %690  ;;  %8669 = vmatmul.mubr.msk.f32.vlgmr.msra.gmra.mrb[2].mxu1 %vm576_vm3, %v9748_v37 }
 0x3b3   :  { %8672 = vmatpush3.xpose.msk.msra.mxu1 %vm576_vm3, %v691_v8  ;;  %8673 = vmatprep.mubr.msk.f32.mxu1 %vm9418_vm2, %v9419_v4 }
 0x3b4   :  { %8676 = vmatprep.subr.mxu1 %v9419_v4 }
 0x3b6   :  { %v806_v9 = vpop.permute.xlu1 %805  ;;  %8674 = vmatmul.mubr.msk.f32.vlgmr.msra.gmra.mrb[4].mxu1 %vm576_vm3, %v9759_v55 }
 0x3b7   :  { %8677 = vmatpush3.xpose.msk.msra.mxu1 %vm576_vm3, %v806_v9  ;;  %8678 = vmatprep.mubr.msk.f32.mxu1 %vm9418_vm2, %v9419_v4 }
 0x3b8   :  { %8681 = vmatprep.subr.mxu1 %v9419_v4 }
 0x3ba   :  { %8679 = vmatmul.mubr.msk.f32.vlgmr.msra.gmra.mrb[6].mxu1 %vm576_vm3, %v9768_v1  ;;  %v921_v10 = vpop.permute.xlu1 %920 }
 0x3bb   :  { %8683 = vmatprep.mubr.msk.f32.mxu1 %vm9418_vm2, %v9419_v4  ;;  %8682 = vmatpush3.xpose.msk.msra.mxu1 %vm576_vm3, %v921_v10 }
 0x3bc   :  { %8686 = vmatprep.subr.mxu1 %v9419_v4 }
 0x3be   :  { %8684 = vmatmul.mubr.msk.f32.vlgmr.msra.gmra.mrb[8].mxu1 %vm576_vm3, %v9774_v6 }
 0x3bf   :  { %8688 = vmatprep.mubr.msk.f32.mxu1 %vm9418_vm2, %v9419_v4 }
 0x485   :  { %v647_v11 = vpop.f32.mrb[2].mxu1 }
 0x486   :  { %v8670_v12 = vpop.f32.mrb[3].mxu1  ;;  %v997_v13 = vsel %vm996_vm4, %v647_v11, -inf }
 0x487   :  { %998 = vmax.xlane.f32.xlu0 %v997_v13 }
 0x489   :  { %v762_v14 = vpop.f32.mrb[4].mxu1 }
 0x48a   :  { %v8675_v15 = vpop.f32.mrb[5].mxu1  ;;  %v1000_v16 = vsel %vm996_vm4, %v762_v14, -inf }
 0x48b   :  { %1001 = vmax.xlane.f32.xlu1 %v1000_v16 }
 0x48d   :  { %v877_v17 = vpop.f32.mrb[6].mxu1 }
 0x48e   :  { %v8680_v18 = vpop.f32.mrb[7].mxu1  ;;  %v1003_v19 = vsel %vm996_vm4, %v877_v17, -inf }
 0x48f   :  { %1004 = vmax.xlane.f32.xlu0 %v1003_v19 }
 0x491   :  { %v992_v20 = vpop.f32.mrb[8].mxu1 }
 0x492   :  { %v8685_v21 = vpop.f32.mrb[9].mxu1  ;;  %v1006_v22 = vsel %vm996_vm4, %v992_v20, -inf }
 0x493   :  { %1007 = vmax.xlane.f32.xlu0 %v1006_v22 }
 0x49c   :  { %1120 = vrot.lane.b32.xlu1 %v9759_v55, %s9422_s24 }
 0x4a0   :  { %1197 = vrot.lane.b32.xlu1 %v9768_v1, %s9422_s24 }
 0x4a4   :  { %1274 = vrot.lane.b32.xlu1 %v9774_v6, %s9422_s24 }
 0x4a8   :  { %1431 = vrot.lane.b32.xlu1 %v9759_v55, %s9423_s25 }
 0x4a9   :  { %1041 = vrot.lane.b32.xlu0 %v9748_v37, %s9422_s24 }
 0x514   :  { %v999_v23 = vpop.xlane.xlu0 %998 }
 0x515   :  { %v1009_v24 = vsub.f32 %v647_v11, %v999_v23 }
 0x517   :  { %v1013_v25 = vmul.f32 1.442695, %v1009_v24 }
 0x518   :  { %v1002_v26 = vpop.xlane.xlu1 %1001 }
 0x519   :  { %9247 = vpow2.f32 %v1013_v25  ;;  %v1010_v27 = vsub.f32 %v762_v14, %v1002_v26 }
 0x51b   :  { %v1015_v28 = vmul.f32 1.442695, %v1010_v27 }
 0x51c   :  { %v1121_v29 = vpop.permute.xlu1 %1120  ;;  %v1005_v30 = vpop.xlane.xlu0 %1004 }
 0x51d   :  { %9249 = vpow2.f32 %v1015_v28  ;;  %v1011_v39 = vsub.f32 %v877_v17, %v1005_v30 }
 0x51f   :  { %v1017_v40 = vmul.f32 1.442695, %v1011_v39 }
 0x520   :  { %v1198_v31 = vpop.permute.xlu1 %1197  ;;  %v1008_v32 = vpop.xlane.xlu0 %1007 }
 0x521   :  { %8697 = vmatpush3.msk.msra.mxu0 %vm1047_vm5, %v1198_v31  ;;  %v1012_v41 = vsub.f32 %v992_v20, %v1008_v32  ;;  %9251 = vpow2.f32 %v1017_v40 }
 0x522   :  { %8706 = vmatprep.subr.mxu0 %v9419_v4 }
 0x523   :  { %v9248_v33 = vpop.eup %9247  ;;  %v1019_v42 = vmul.f32 1.442695, %v1012_v41 }
 0x524   :  { %v1021_v34 = vsel %vm996_vm4, %v9248_v33, 0.0  ;;  %v1042_v35 = vpop.permute.xlu0 %1041  ;;  %v1275_v49 = vpop.permute.xlu1 %1274 }
 0x525   :  { %1022 = vadd.xlane.f32.xlu0 %v1021_v34  ;;  %8687 = vmatpush3.msk.msra.mxu1 %vm1047_vm5, %v1042_v35  ;;  %9253 = vpow2.f32 %v1019_v42 }
 0x526   :  { %8691 = vmatprep.subr.mxu1 %v9419_v4 }
 0x527   :  { %v9250_v36 = vpop.eup %9249 }
 0x528   :  { %v1024_v38 = vsel %vm996_vm4, %v9250_v36, 0.0  ;;  %v1432_v52 = vpop.permute.xlu1 %1431 }
 0x529   :  { %1025 = vadd.xlane.f32.xlu1 %v1024_v38 }
 0x52b   :  { %v9252_v44 = vpop.eup %9251 }
 0x52c   :  { %v1027_v45 = vsel %vm996_vm4, %v9252_v44, 0.0 }
 0x52f   :  { %v9254_v47 = vpop.eup %9253 }
 0x530   :  { %v1030_v48 = vsel %vm996_vm4, %v9254_v47, 0.0 }
 0x53a   :  { %1429 = vrot.lane.b32.xlu1 %v9759_v55, %s9424_s27 }
 0x53b   :  { %1353 = vrot.lane.b32.xlu0 %v9748_v37, %s9423_s25 }
 0x55a   :  { %1028 = vadd.xlane.f32.xlu0 %v1027_v45 }
 0x55e   :  { %1031 = vadd.xlane.f32.xlu1 %v1030_v48 }
 0x56f   :  { %1587 = vrot.lane.b32.xlu1 %v9774_v6, %s9423_s25 }
 0x570   :  { %1351 = vrot.lane.b32.xlu0 %v9748_v37, %s9424_s27 }
 0x573   :  { %1585 = vrot.lane.b32.xlu1 %v9774_v6, %s9424_s27 }
 0x574   :  { %1509 = vrot.lane.b32.xlu0 %v9768_v1, %s9423_s25 }
 0x578   :  { %1507 = vrot.lane.b32.xlu0 %v9768_v1, %s9424_s27 }
 0x5b2   :  { %v1023_v53 = vpop.xlane.xlu0 %1022 }
 0x5b3   :  { %9255 = vrcp.f32 %v1023_v53 }
 0x5b6   :  { %v1026_v54 = vpop.xlane.xlu1 %1025  ;;  %v1354_v61 = vpop.permute.xlu0 %1353 }
 0x5b7   :  { %9257 = vrcp.f32 %v1026_v54 }
 0x5ba   :  { %v1430_v62 = vpop.permute.xlu1 %1429 }
 0x5bd   :  { %v9256_v56 = vpop.eup %9255 }
 0x5be   :  { %v1037_v58 = vmul.f32 %v9256_v56, %v9248_v33 }
 0x5c0   :  { %8689 = vmatmul.mubr.msk.f32.vlgmr.msra.gmra.mrb[10].mxu1 %vm1043_vm6, %v1037_v58 }
 0x5c1   :  { %v9258_v59 = vpop.eup %9257  ;;  %8692 = vmatpush3.msk.msra.mxu1 %vm1047_vm5, %v1121_v29  ;;  %8693 = vmatprep.mubr.msk.f32.mxu1 %vm9418_vm2, %v9419_v4 }
 0x5c2   :  { %8701 = vmatprep.subr.mxu1 %v9419_v4  ;;  %v1038_v60 = vmul.f32 %v9258_v59, %v9250_v36 }
 0x5c4   :  { %8694 = vmatmul.mubr.msk.f32.vlgmr.msra.gmra.mrb[12].mxu1 %vm1043_vm6, %v1038_v60 }
 0x5c5   :  { %8702 = vmatpush3.msk.msra.mxu1 %vm1047_vm5, %v1275_v49  ;;  %8703 = vmatprep.mubr.msk.f32.mxu1 %vm9418_vm2, %v9419_v4 }
 0x5c6   :  { %8711 = vmatprep.subr.mxu1 %v9419_v4 }
 0x5e7   :  { %v1029_v63 = vpop.xlane.xlu0 %1028 }
 0x5e8   :  { %9259 = vrcp.f32 %v1029_v63 }
 0x5eb   :  { %v1032_v2 = vpop.xlane.xlu1 %1031  ;;  %v1352_v3 = vpop.permute.xlu0 %1351 }
 0x5ec   :  { %9261 = vrcp.f32 %v1032_v2 }
 0x5ef   :  { %v1510_v9 = vpop.permute.xlu0 %1509  ;;  %v1588_v11 = vpop.permute.xlu1 %1587 }
 0x5f2   :  { %v9260_v5 = vpop.eup %9259 }
 0x5f3   :  { %v1039_v7 = vmul.f32 %v9260_v5, %v9252_v44  ;;  %v1508_v12 = vpop.permute.xlu0 %1507  ;;  %v1586_v13 = vpop.permute.xlu1 %1585 }
 0x5f5   :  { %8699 = vmatmul.mubr.msk.f32.vlgmr.msra.gmra.mrb[10].mxu0 %vm1043_vm6, %v1039_v7 }
 0x5f6   :  { %v9262_v8 = vpop.eup %9261  ;;  %8707 = vmatpush3.xpose.msk.msra.mxu0 %vm576_vm3, %v1354_v61  ;;  %8708 = vmatprep.mubr.msk.f32.mxu0 %vm9418_vm2, %v9419_v4 }
 0x5f7   :  { %8716 = vmatprep.subr.mxu0 %v9419_v4  ;;  %v1040_v10 = vmul.f32 %v9262_v8, %v9254_v47 }
 0x5f9   :  { %8704 = vmatmul.mubr.msk.f32.vlgmr.msra.gmra.mrb[14].mxu1 %vm1043_vm6, %v1040_v10  ;;  %8709 = vmatmul.mubr.msk.f32.vlgmr.msra.gmra.mrb[12].mxu0 %vm576_vm3, %v1352_v3 }
 0x5fa   :  { %8712 = vmatpush3.xpose.msk.msra.mxu1 %vm576_vm3, %v1432_v52  ;;  %8717 = vmatpush3.xpose.msk.msra.mxu0 %vm576_vm3, %v1510_v9 }
 0x5fb   :  { %8713 = vmatprep.mubr.msk.f32.mxu1 %vm9418_vm2, %v9419_v4  ;;  %8718 = vmatprep.mubr.msk.f32.mxu0 %vm9418_vm2, %v9419_v4 }
 0x5fc   :  { %8721 = vmatprep.subr.mxu1 %v9419_v4  ;;  %8726 = vmatprep.subr.mxu0 %v9419_v4 }
 0x5fd   :  { %8714 = vmatmul.mubr.msk.f32.vlgmr.msra.gmra.mrb[16].mxu1 %vm576_vm3, %v1430_v62  ;;  %8719 = vmatmul.mubr.msk.f32.vlgmr.msra.gmra.mrb[14].mxu0 %vm576_vm3, %v1508_v12 }
 0x5fe   :  { %8722 = vmatpush3.xpose.msk.msra.mxu1 %vm576_vm3, %v1588_v11  ;;  %8723 = vmatprep.mubr.msk.f32.mxu1 %vm9418_vm2, %v9419_v4 }
 0x5ff   :  { %8731 = vmatprep.subr.mxu1 %v9419_v4  ;;  %8728 = vmatprep.mubr.msk.f32.mxu0 %vm9418_vm2, %v9419_v4 }
 0x601   :  { %8724 = vmatmul.mubr.msk.f32.vlgmr.msra.gmra.mrb[18].mxu1 %vm576_vm3, %v1586_v13 }
 0x602   :  { %8733 = vmatprep.mubr.msk.f32.mxu1 %vm9418_vm2, %v9419_v4 }
 0x693   :  { %v9874_v14 = vpop.f32.mrb[10].mxu1 }
 0x694   :  { %v8690_v15 = vpop.f32.mrb[11].mxu1 }
 0x697   :  { %v9876_v16 = vpop.f32.mrb[12].mxu1 }
 0x698   :  { %v8695_v17 = vpop.f32.mrb[13].mxu1 }
 0x6c8   :  { %v9878_v18 = vpop.f32.mrb[10].mxu0 }
 0x6c9   :  { %v8700_v19 = vpop.f32.mrb[11].mxu0 }
 0x6cc   :  { %v9880_v20 = vpop.f32.mrb[14].mxu1  ;;  %v1425_v21 = vpop.f32.mrb[12].mxu0 }
 0x6cd   :  { %v8705_v22 = vpop.f32.mrb[15].mxu1  ;;  %v8710_v23 = vpop.f32.mrb[13].mxu0  ;;  %v1663_v24 = vsel %vm996_vm4, %v1425_v21, -inf }
 0x6ce   :  { %1664 = vmax.xlane.f32.xlu0 %v1663_v24 }
 0x6d0   :  { %v1503_v25 = vpop.f32.mrb[16].mxu1  ;;  %v1581_v26 = vpop.f32.mrb[14].mxu0 }
 0x6d1   :  { %v8715_v27 = vpop.f32.mrb[17].mxu1  ;;  %v8720_v28 = vpop.f32.mrb[15].mxu0  ;;  %v1669_v29 = vsel %vm996_vm4, %v1581_v26, -inf  ;;  %v1666_v30 = vsel %vm996_vm4, %v1503_v25, -inf }
 0x6d2   :  { %1670 = vmax.xlane.f32.xlu0 %v1669_v29  ;;  %1667 = vmax.xlane.f32.xlu1 %v1666_v30 }
 0x6d4   :  { %v1659_v31 = vpop.f32.mrb[18].mxu1 }
 0x6d5   :  { %v8725_v32 = vpop.f32.mrb[19].mxu1  ;;  %v1672_v33 = vsel %vm996_vm4, %v1659_v31, -inf }
 0x6d6   :  { %1673 = vmax.xlane.f32.xlu0 %v1672_v33 }
 0x6e3   :  { %1784 = vrot.lane.b32.xlu1 %v9759_v55, %s9425_s3 }
 0x6e7   :  { %1861 = vrot.lane.b32.xlu1 %v9768_v1, %s9425_s3 }
 0x6eb   :  { %1938 = vrot.lane.b32.xlu1 %v9774_v6, %s9425_s3 }
 0x6ec   :  { %1707 = vrot.lane.b32.xlu0 %v9748_v37, %s9425_s3 }
 0x6ef   :  { %2095 = vrot.lane.b32.xlu1 %v9759_v55, %s9426_s4 }
 0x6f0   :  { %2017 = vrot.lane.b32.xlu0 %v9748_v37, %s9426_s4 }
 0x75b   :  { %v1665_v34 = vpop.xlane.xlu0 %1664 }
 0x75c   :  { %v1675_v35 = vsub.f32 %v1425_v21, %v1665_v34 }
 0x75e   :  { %v1679_v36 = vmul.f32 1.442695, %v1675_v35 }
 0x75f   :  { %v1671_v38 = vpop.xlane.xlu0 %1670  ;;  %v1668_v39 = vpop.xlane.xlu1 %1667 }
 0x760   :  { %9263 = vpow2.f32 %v1679_v36  ;;  %v1677_v40 = vsub.f32 %v1581_v26, %v1671_v38  ;;  %v1676_v41 = vsub.f32 %v1503_v25, %v1668_v39 }
 0x762   :  { %v1683_v42 = vmul.f32 1.442695, %v1677_v40  ;;  %v1681_v44 = vmul.f32 1.442695, %v1676_v41 }
 0x763   :  { %v1785_v45 = vpop.permute.xlu1 %1784  ;;  %v1674_v47 = vpop.xlane.xlu0 %1673 }
 0x764   :  { %9265 = vpow2.f32 %v1683_v42  ;;  %8732 = vmatpush3.msk.msra.mxu1 %vm1047_vm5, %v1785_v45  ;;  %v1678_v59 = vsub.f32 %v1659_v31, %v1674_v47 }
 0x765   :  { %9267 = vpow2.f32 %v1681_v44  ;;  %8741 = vmatprep.subr.mxu1 %v9419_v4 }
 0x766   :  { %v1685_v60 = vmul.f32 1.442695, %v1678_v59 }
 0x767   :  { %v1708_v48 = vpop.permute.xlu0 %1707  ;;  %v1862_v63 = vpop.permute.xlu1 %1861 }
 0x768   :  { %8727 = vmatpush3.msk.msra.mxu0 %vm1047_vm5, %v1708_v48  ;;  %9269 = vpow2.f32 %v1685_v60 }
 0x769   :  { %8736 = vmatprep.subr.mxu0 %v9419_v4 }
 0x76a   :  { %v9264_v49 = vpop.eup %9263 }
 0x76b   :  { %v1687_v52 = vsel %vm996_vm4, %v9264_v49, 0.0  ;;  %v1939_v2 = vpop.permute.xlu1 %1938  ;;  %v2018_v3 = vpop.permute.xlu0 %2017 }
 0x76c   :  { %1688 = vadd.xlane.f32.xlu0 %v1687_v52 }
 0x76e   :  { %v9266_v53 = vpop.eup %9265 }
 0x76f   :  { %v9268_v54 = vpop.eup %9267  ;;  %v1693_v56 = vsel %vm996_vm4, %v9266_v53, 0.0  ;;  %v2096_v7 = vpop.permute.xlu1 %2095 }
 0x770   :  { %v1690_v58 = vsel %vm996_vm4, %v9268_v54, 0.0  ;;  %1694 = vadd.xlane.f32.xlu0 %v1693_v56 }
 0x771   :  { %1691 = vadd.xlane.f32.xlu1 %v1690_v58 }
 0x772   :  { %v9270_v61 = vpop.eup %9269 }
 0x773   :  { %v1696_v62 = vsel %vm996_vm4, %v9270_v61, 0.0 }
 0x782   :  { %2093 = vrot.lane.b32.xlu1 %v9759_v55, %s9427_s28 }
 0x786   :  { %2015 = vrot.lane.b32.xlu0 %v9748_v37, %s9427_s28 }
 0x78a   :  { %2173 = vrot.lane.b32.xlu0 %v9768_v1, %s9426_s4 }
 0x78e   :  { %2171 = vrot.lane.b32.xlu0 %v9768_v1, %s9427_s28 }
 0x7a6   :  { %1697 = vadd.xlane.f32.xlu1 %v1696_v62 }
 0x7b7   :  { %2251 = vrot.lane.b32.xlu1 %v9774_v6, %s9426_s4 }
 0x7bb   :  { %2249 = vrot.lane.b32.xlu1 %v9774_v6, %s9427_s28 }
 0x7f9   :  { %v1689_v5 = vpop.xlane.xlu0 %1688 }
 0x7fa   :  { %9271 = vrcp.f32 %v1689_v5 }
 0x7fd   :  { %v1695_v8 = vpop.xlane.xlu0 %1694 }
 0x7fe   :  { %v1692_v9 = vpop.xlane.xlu1 %1691  ;;  %9273 = vrcp.f32 %v1695_v8 }
 0x7ff   :  { %9275 = vrcp.f32 %v1692_v9 }
 0x801   :  { %v2016_v15 = vpop.permute.xlu0 %2015 }
 0x802   :  { %v2094_v23 = vpop.permute.xlu1 %2093 }
 0x804   :  { %v9272_v10 = vpop.eup %9271 }
 0x805   :  { %v1703_v11 = vmul.f32 %v9272_v10, %v9264_v49  ;;  %v2174_v21 = vpop.permute.xlu0 %2173 }
 0x807   :  { %8729 = vmatmul.mubr.msk.f32.vlgmr.msra.gmra.mrb[16].mxu0 %vm1043_vm6, %v1703_v11 }
 0x808   :  { %v9274_v12 = vpop.eup %9273  ;;  %8737 = vmatpush3.msk.msra.mxu0 %vm1047_vm5, %v1862_v63  ;;  %8738 = vmatprep.mubr.msk.f32.mxu0 %vm9418_vm2, %v9419_v4 }
 0x809   :  { %v9276_v13 = vpop.eup %9275  ;;  %v1705_v17 = vmul.f32 %v9274_v12, %v9266_v53  ;;  %8746 = vmatprep.subr.mxu0 %v9419_v4  ;;  %v2172_v22 = vpop.permute.xlu0 %2171 }
 0x80a   :  { %v1704_v19 = vmul.f32 %v9276_v13, %v9268_v54 }
 0x80b   :  { %8739 = vmatmul.mubr.msk.f32.vlgmr.msra.gmra.mrb[18].mxu0 %vm1043_vm6, %v1705_v17 }
 0x80c   :  { %8734 = vmatmul.mubr.msk.f32.vlgmr.msra.gmra.mrb[20].mxu1 %vm1043_vm6, %v1704_v19  ;;  %8748 = vmatprep.mubr.msk.f32.mxu0 %vm9418_vm2, %v9419_v4 }
 0x80d   :  { %8742 = vmatpush3.msk.msra.mxu1 %vm1047_vm5, %v1939_v2  ;;  %8743 = vmatprep.mubr.msk.f32.mxu1 %vm9418_vm2, %v9419_v4 }
 0x80e   :  { %8751 = vmatprep.subr.mxu1 %v9419_v4 }
 0x80f   :  { %8747 = vmatpush3.xpose.msk.msra.mxu0 %vm576_vm3, %v2018_v3 }
 0x810   :  { %8756 = vmatprep.subr.mxu0 %v9419_v4 }
 0x812   :  { %8749 = vmatmul.mubr.msk.f32.vlgmr.msra.gmra.mrb[20].mxu0 %vm576_vm3, %v2016_v15 }
 0x813   :  { %8757 = vmatpush3.xpose.msk.msra.mxu0 %vm576_vm3, %v2174_v21  ;;  %8758 = vmatprep.mubr.msk.f32.mxu0 %vm9418_vm2, %v9419_v4 }
 0x814   :  { %8766 = vmatprep.subr.mxu0 %v9419_v4 }
 0x816   :  { %8759 = vmatmul.mubr.msk.f32.vlgmr.msra.gmra.mrb[22].mxu0 %vm576_vm3, %v2172_v22 }
 0x817   :  { %8768 = vmatprep.mubr.msk.f32.mxu0 %vm9418_vm2, %v9419_v4 }
 0x833   :  { %v1698_v24 = vpop.xlane.xlu1 %1697 }
 0x834   :  { %9277 = vrcp.f32 %v1698_v24 }
 0x837   :  { %v2252_v27 = vpop.permute.xlu1 %2251 }
 0x83b   :  { %v2250_v28 = vpop.permute.xlu1 %2249 }
 0x83e   :  { %v9278_v25 = vpop.eup %9277 }
 0x83f   :  { %v1706_v26 = vmul.f32 %v9278_v25, %v9270_v61 }
 0x841   :  { %8744 = vmatmul.mubr.msk.f32.vlgmr.msra.gmra.mrb[22].mxu1 %vm1043_vm6, %v1706_v26 }
 0x842   :  { %8752 = vmatpush3.xpose.msk.msra.mxu1 %vm576_vm3, %v2096_v7  ;;  %8753 = vmatprep.mubr.msk.f32.mxu1 %vm9418_vm2, %v9419_v4 }
 0x843   :  { %8761 = vmatprep.subr.mxu1 %v9419_v4 }
 0x845   :  { %8754 = vmatmul.mubr.msk.f32.vlgmr.msra.gmra.mrb[24].mxu1 %vm576_vm3, %v2094_v23 }
 0x846   :  { %8762 = vmatpush3.xpose.msk.msra.mxu1 %vm576_vm3, %v2252_v27  ;;  %8763 = vmatprep.mubr.msk.f32.mxu1 %vm9418_vm2, %v9419_v4 }
 0x847   :  { %8771 = vmatprep.subr.mxu1 %v9419_v4 }
 0x849   :  { %8764 = vmatmul.mubr.msk.f32.vlgmr.msra.gmra.mrb[26].mxu1 %vm576_vm3, %v2250_v28 }
 0x84a   :  { %8773 = vmatprep.mubr.msk.f32.mxu1 %vm9418_vm2, %v9419_v4 }
 0x8da   :  { %v9954_v29 = vpop.f32.mrb[16].mxu0 }
 0x8db   :  { %v8730_v30 = vpop.f32.mrb[17].mxu0 }
 0x8de   :  { %v9956_v31 = vpop.f32.mrb[18].mxu0 }
 0x8df   :  { %v9958_v32 = vpop.f32.mrb[20].mxu1  ;;  %v8740_v33 = vpop.f32.mrb[19].mxu0 }
 0x8e0   :  { %v8735_v34 = vpop.f32.mrb[21].mxu1 }
 0x8e5   :  { %v2089_v35 = vpop.f32.mrb[20].mxu0 }
 0x8e6   :  { %v8750_v36 = vpop.f32.mrb[21].mxu0  ;;  %v2327_v38 = vsel %vm996_vm4, %v2089_v35, -inf }
 0x8e7   :  { %2328 = vmax.xlane.f32.xlu0 %v2327_v38 }
 0x8e9   :  { %v2245_v39 = vpop.f32.mrb[22].mxu0 }
 0x8ea   :  { %v8760_v40 = vpop.f32.mrb[23].mxu0  ;;  %v2333_v41 = vsel %vm996_vm4, %v2245_v39, -inf }
 0x8eb   :  { %2334 = vmax.xlane.f32.xlu0 %v2333_v41 }
 0x914   :  { %v9962_v42 = vpop.f32.mrb[22].mxu1 }
 0x915   :  { %v8745_v44 = vpop.f32.mrb[23].mxu1 }
 0x918   :  { %v2167_v45 = vpop.f32.mrb[24].mxu1 }
 0x919   :  { %v8755_v47 = vpop.f32.mrb[25].mxu1  ;;  %v2330_v48 = vsel %vm996_vm4, %v2167_v45, -inf }
 0x91a   :  { %2331 = vmax.xlane.f32.xlu1 %v2330_v48 }
 0x91c   :  { %v2323_v49 = vpop.f32.mrb[26].mxu1 }
 0x91d   :  { %v8765_v52 = vpop.f32.mrb[27].mxu1  ;;  %v2336_v53 = vsel %vm996_vm4, %v2323_v49, -inf }
 0x91e   :  { %2337 = vmax.xlane.f32.xlu0 %v2336_v53 }
 0x92b   :  { %2448 = vrot.lane.b32.xlu1 %v9759_v55, %s9428_s29 }
 0x92f   :  { %2525 = vrot.lane.b32.xlu1 %v9768_v1, %s9428_s29 }
 0x933   :  { %2602 = vrot.lane.b32.xlu1 %v9774_v6, %s9428_s29 }
 0x934   :  { %2371 = vrot.lane.b32.xlu0 %v9748_v37, %s9428_s29 }
 0x937   :  { %2759 = vrot.lane.b32.xlu1 %v9759_v55, %s9429_s1 }
 0x938   :  { %2681 = vrot.lane.b32.xlu0 %v9748_v37, %s9429_s1 }
 0x974   :  { %v2329_v54 = vpop.xlane.xlu0 %2328 }
 0x975   :  { %v2339_v56 = vsub.f32 %v2089_v35, %v2329_v54 }
 0x977   :  { %v2343_v58 = vmul.f32 1.442695, %v2339_v56 }
 0x978   :  { %v2335_v59 = vpop.xlane.xlu0 %2334 }
 0x979   :  { %9279 = vpow2.f32 %v2343_v58  ;;  %v2341_v60 = vsub.f32 %v2245_v39, %v2335_v59 }
 0x97b   :  { %v2347_v61 = vmul.f32 1.442695, %v2341_v60 }
 0x97d   :  { %9281 = vpow2.f32 %v2347_v61 }
 0x983   :  { %v9280_v62 = vpop.eup %9279 }
 0x984   :  { %v2351_v63 = vsel %vm996_vm4, %v9280_v62, 0.0 }
 0x985   :  { %2352 = vadd.xlane.f32.xlu0 %v2351_v63 }
 0x987   :  { %v9282_v2 = vpop.eup %9281 }
 0x988   :  { %v2357_v3 = vsel %vm996_vm4, %v9282_v2, 0.0 }
 0x989   :  { %2358 = vadd.xlane.f32.xlu0 %v2357_v3 }
 0x99f   :  { %2679 = vrot.lane.b32.xlu0 %v9748_v37, %s10964_s26 }
 0x9a3   :  { %2837 = vrot.lane.b32.xlu0 %v9768_v1, %s9429_s1 }
 0x9a7   :  { %v2332_v5 = vpop.xlane.xlu1 %2331  ;;  %2835 = vrot.lane.b32.xlu0 %v9768_v1, %s10964_s26 }
 0x9a8   :  { %v2340_v7 = vsub.f32 %v2167_v45, %v2332_v5 }
 0x9aa   :  { %v2345_v8 = vmul.f32 1.442695, %v2340_v7 }
 0x9ab   :  { %v2449_v9 = vpop.permute.xlu1 %2448  ;;  %v2338_v10 = vpop.xlane.xlu0 %2337 }
 0x9ac   :  { %9283 = vpow2.f32 %v2345_v8  ;;  %8772 = vmatpush3.msk.msra.mxu1 %vm1047_vm5, %v2449_v9  ;;  %v2342_v15 = vsub.f32 %v2323_v49, %v2338_v10 }
 0x9ad   :  { %8781 = vmatprep.subr.mxu1 %v9419_v4 }
 0x9ae   :  { %v2349_v17 = vmul.f32 1.442695, %v2342_v15 }
 0x9af   :  { %v2372_v11 = vpop.permute.xlu0 %2371  ;;  %v2526_v27 = vpop.permute.xlu1 %2525 }
 0x9b0   :  { %8767 = vmatpush3.msk.msra.mxu0 %vm1047_vm5, %v2372_v11  ;;  %9285 = vpow2.f32 %v2349_v17 }
 0x9b1   :  { %8776 = vmatprep.subr.mxu0 %v9419_v4 }
 0x9b3   :  { %v2682_v22 = vpop.permute.xlu0 %2681  ;;  %v2603_v36 = vpop.permute.xlu1 %2602 }
 0x9b6   :  { %v9284_v12 = vpop.eup %9283 }
 0x9b7   :  { %v2354_v13 = vsel %vm996_vm4, %v9284_v12, 0.0  ;;  %v2760_v38 = vpop.permute.xlu1 %2759 }
 0x9b8   :  { %2355 = vadd.xlane.f32.xlu1 %v2354_v13 }
 0x9ba   :  { %v9286_v19 = vpop.eup %9285 }
 0x9bb   :  { %v2360_v21 = vsel %vm996_vm4, %v9286_v19, 0.0 }
 0x9c9   :  { %2757 = vrot.lane.b32.xlu1 %v9759_v55, %s10964_s26 }
 0x9ed   :  { %2361 = vadd.xlane.f32.xlu1 %v2360_v21 }
 0x9fe   :  { %2915 = vrot.lane.b32.xlu1 %v9774_v6, %s9429_s1 }
 0xa02   :  { %2913 = vrot.lane.b32.xlu1 %v9774_v6, %s10964_s26 }
 0xa12   :  { %v2353_v23 = vpop.xlane.xlu0 %2352 }
 0xa13   :  { %9287 = vrcp.f32 %v2353_v23 }
 0xa16   :  { %v2359_v24 = vpop.xlane.xlu0 %2358 }
 0xa17   :  { %9289 = vrcp.f32 %v2359_v24 }
 0xa1a   :  { %v2680_v30 = vpop.permute.xlu0 %2679 }
 0xa1d   :  { %v9288_v25 = vpop.eup %9287 }
 0xa1e   :  { %v2367_v26 = vmul.f32 %v9288_v25, %v9280_v62  ;;  %v2838_v34 = vpop.permute.xlu0 %2837 }
 0xa20   :  { %8769 = vmatmul.mubr.msk.f32.vlgmr.msra.gmra.mrb[24].mxu0 %vm1043_vm6, %v2367_v26 }
 0xa21   :  { %v9290_v28 = vpop.eup %9289  ;;  %8777 = vmatpush3.msk.msra.mxu0 %vm1047_vm5, %v2526_v27  ;;  %8778 = vmatprep.mubr.msk.f32.mxu0 %vm9418_vm2, %v9419_v4 }
 0xa22   :  { %v2369_v33 = vmul.f32 %v9290_v28, %v9282_v2  ;;  %8786 = vmatprep.subr.mxu0 %v9419_v4  ;;  %v2836_v35 = vpop.permute.xlu0 %2835 }
 0xa24   :  { %8779 = vmatmul.mubr.msk.f32.vlgmr.msra.gmra.mrb[26].mxu0 %vm1043_vm6, %v2369_v33 }
 0xa25   :  { %8788 = vmatprep.mubr.msk.f32.mxu0 %vm9418_vm2, %v9419_v4 }
 0xa28   :  { %8787 = vmatpush3.xpose.msk.msra.mxu0 %vm576_vm3, %v2682_v22 }
 0xa29   :  { %8796 = vmatprep.subr.mxu0 %v9419_v4 }
 0xa2b   :  { %8789 = vmatmul.mubr.msk.f32.vlgmr.msra.gmra.mrb[28].mxu0 %vm576_vm3, %v2680_v30 }
 0xa2c   :  { %8797 = vmatpush3.xpose.msk.msra.mxu0 %vm576_vm3, %v2838_v34  ;;  %8798 = vmatprep.mubr.msk.f32.mxu0 %vm9418_vm2, %v9419_v4 }
 0xa2d   :  { %8806 = vmatprep.subr.mxu0 %v9419_v4 }
 0xa2f   :  { %8799 = vmatmul.mubr.msk.f32.vlgmr.msra.gmra.mrb[30].mxu0 %vm576_vm3, %v2836_v35 }
 0xa30   :  { %8808 = vmatprep.mubr.msk.f32.mxu0 %vm9418_vm2, %v9419_v4 }
 0xa45   :  { %v2356_v39 = vpop.xlane.xlu1 %2355 }
 0xa46   :  { %9291 = vrcp.f32 %v2356_v39 }
 0xa49   :  { %v2758_v44 = vpop.permute.xlu1 %2757 }
 0xa50   :  { %v9292_v40 = vpop.eup %9291 }
 0xa51   :  { %v2368_v41 = vmul.f32 %v9292_v40, %v9284_v12 }
 0xa53   :  { %8774 = vmatmul.mubr.msk.f32.vlgmr.msra.gmra.mrb[28].mxu1 %vm1043_vm6, %v2368_v41 }
 0xa54   :  { %8782 = vmatpush3.msk.msra.mxu1 %vm1047_vm5, %v2603_v36  ;;  %8783 = vmatprep.mubr.msk.f32.mxu1 %vm9418_vm2, %v9419_v4 }
 0xa55   :  { %8791 = vmatprep.subr.mxu1 %v9419_v4 }
 0xa7a   :  { %v2362_v45 = vpop.xlane.xlu1 %2361 }
 0xa7b   :  { %9293 = vrcp.f32 %v2362_v45 }
 0xa7e   :  { %v2916_v49 = vpop.permute.xlu1 %2915 }
 0xa82   :  { %v2914_v52 = vpop.permute.xlu1 %2913 }
 0xa85   :  { %v9294_v47 = vpop.eup %9293 }
 0xa86   :  { %v2370_v48 = vmul.f32 %v9294_v47, %v9286_v19 }
 0xa88   :  { %8784 = vmatmul.mubr.msk.f32.vlgmr.msra.gmra.mrb[30].mxu1 %vm1043_vm6, %v2370_v48 }
 0xa89   :  { %8792 = vmatpush3.xpose.msk.msra.mxu1 %vm576_vm3, %v2760_v38  ;;  %8793 = vmatprep.mubr.msk.f32.mxu1 %vm9418_vm2, %v9419_v4 }
 0xa8a   :  { %8801 = vmatprep.subr.mxu1 %v9419_v4 }
 0xa8c   :  { %8794 = vmatmul.mubr.msk.f32.vlgmr.msra.gmra.mrb[32].mxu1 %vm576_vm3, %v2758_v44 }
 0xa8d   :  { %8802 = vmatpush3.xpose.msk.msra.mxu1 %vm576_vm3, %v2916_v49  ;;  %8803 = vmatprep.mubr.msk.f32.mxu1 %vm9418_vm2, %v9419_v4 }
 0xa8e   :  { %8811 = vmatprep.subr.mxu1 %v9419_v4 }
 0xa90   :  { %8804 = vmatmul.mubr.msk.f32.vlgmr.msra.gmra.mrb[34].mxu1 %vm576_vm3, %v2914_v52 }
 0xa91   :  { %8813 = vmatprep.mubr.msk.f32.mxu1 %vm9418_vm2, %v9419_v4 }
 0xaf3   :  { %v2444_v53 = vpop.f32.mrb[24].mxu0 }
 0xaf4   :  { %v8770_v54 = vpop.f32.mrb[25].mxu0 }
 0xaf7   :  { %v10034_v56 = vpop.f32.mrb[26].mxu0 }
 0xaf8   :  { %v8780_v58 = vpop.f32.mrb[27].mxu0 }
 0xafe   :  { %v2753_v59 = vpop.f32.mrb[28].mxu0 }
 0xaff   :  { %v8790_v60 = vpop.f32.mrb[29].mxu0  ;;  %v2991_v61 = vsel %vm996_vm4, %v2753_v59, -inf }
 0xb00   :  { %2992 = vmax.xlane.f32.xlu0 %v2991_v61 }
 0xb02   :  { %v2909_v62 = vpop.f32.mrb[30].mxu0 }
 0xb03   :  { %v8800_v63 = vpop.f32.mrb[31].mxu0  ;;  %v2997_v2 = vsel %vm996_vm4, %v2909_v62, -inf }
 0xb04   :  { %2998 = vmax.xlane.f32.xlu0 %v2997_v2  ;;  %v3565_v63 = vld [vmem:[%s10947_s9] sm:$0xff]  ;;  %v3566_v2 = vld [vmem:[%s10947_s9 + $0x8] sm:$0xff] }
 0xb26   :  { %v2521_v3 = vpop.f32.mrb[28].mxu1 }
 0xb27   :  { %v8775_v5 = vpop.f32.mrb[29].mxu1 }
 0xb28   :  { %v9160_v5 = vpack.c.bf16 %v3566_v2, %v3565_v63 }
 0xb5b   :  { %v10038_v7 = vpop.f32.mrb[30].mxu1 }
 0xb5c   :  { %v8785_v8 = vpop.f32.mrb[31].mxu1 }
 0xb5f   :  { %v2831_v9 = vpop.f32.mrb[32].mxu1 }
 0xb60   :  { %v8795_v10 = vpop.f32.mrb[33].mxu1  ;;  %v2994_v11 = vsel %vm996_vm4, %v2831_v9, -inf }
 0xb61   :  { %2995 = vmax.xlane.f32.xlu1 %v2994_v11 }
 0xb63   :  { %v2987_v12 = vpop.f32.mrb[34].mxu1 }
 0xb64   :  { %v8805_v13 = vpop.f32.mrb[35].mxu1  ;;  %v3000_v15 = vsel %vm996_vm4, %v2987_v12, -inf }
 0xb65   :  { %3001 = vmax.xlane.f32.xlu0 %v3000_v15 }
 0xb8d   :  { %v2993_v17 = vpop.xlane.xlu0 %2992 }
 0xb8e   :  { %v3003_v19 = vsub.f32 %v2753_v59, %v2993_v17 }
 0xb90   :  { %v3007_v21 = vmul.f32 1.442695, %v3003_v19 }
 0xb91   :  { %v2999_v22 = vpop.xlane.xlu0 %2998 }
 0xb92   :  { %9295 = vpow2.f32 %v3007_v21  ;;  %v3005_v23 = vsub.f32 %v2909_v62, %v2999_v22 }
 0xb94   :  { %v3011_v24 = vmul.f32 1.442695, %v3005_v23 }
 0xb96   :  { %9297 = vpow2.f32 %v3011_v24 }
 0xb9c   :  { %v9296_v25 = vpop.eup %9295 }
 0xb9d   :  { %v3015_v26 = vsel %vm996_vm4, %v9296_v25, 0.0 }
 0xb9e   :  { %3016 = vadd.xlane.f32.xlu0 %v3015_v26 }
 0xba0   :  { %v9298_v27 = vpop.eup %9297 }
 0xba1   :  { %v3021_v28 = vsel %vm996_vm4, %v9298_v27, 0.0 }
 0xba2   :  { %3022 = vadd.xlane.f32.xlu0 %v3021_v28 }
 0xbb8   :  { %3035 = vrot.lane.b32.xlu0 %v9748_v37, %s10962_s30 }
 0xbbc   :  { %3347 = vrot.lane.b32.xlu0 %v9954_v29, %s10958_s18 }
 0xbc0   :  { %3363 = vrot.lane.b32.xlu0 %v2444_v53, %s10960_s19 }
 0xbc4   :  { %3351 = vrot.lane.b32.xlu0 %v9956_v31, %s10958_s18 }
 0xbee   :  { %v2996_v30 = vpop.xlane.xlu1 %2995 }
 0xbef   :  { %v3004_v33 = vsub.f32 %v2831_v9, %v2996_v30 }
 0xbf1   :  { %v3009_v34 = vmul.f32 1.442695, %v3004_v33 }
 0xbf2   :  { %v3002_v37 = vpop.xlane.xlu0 %3001 }
 0xbf3   :  { %9299 = vpow2.f32 %v3009_v34  ;;  %v3006_v29 = vsub.f32 %v2987_v12, %v3002_v37 }
 0xbf5   :  { %v3013_v38 = vmul.f32 1.442695, %v3006_v29 }
 0xbf7   :  { %9301 = vpow2.f32 %v3013_v38 }
 0xbfd   :  { %v9300_v35 = vpop.eup %9299 }
 0xbfe   :  { %v3018_v36 = vsel %vm996_vm4, %v9300_v35, 0.0 }
 0xbff   :  { %3019 = vadd.xlane.f32.xlu1 %v3018_v36 }
 0xc01   :  { %v9302_v41 = vpop.eup %9301 }
 0xc02   :  { %v3024_v45 = vsel %vm996_vm4, %v9302_v41, 0.0 }
 0xc10   :  { %3112 = vrot.lane.b32.xlu1 %v9759_v55, %s10962_s30 }
 0xc14   :  { %3189 = vrot.lane.b32.xlu1 %v9768_v1, %s10962_s30 }
 0xc2b   :  { %v3017_v39 = vpop.xlane.xlu0 %3016 }
 0xc2c   :  { %9303 = vrcp.f32 %v3017_v39 }
 0xc2f   :  { %v3023_v31 = vpop.xlane.xlu0 %3022 }
 0xc30   :  { %9305 = vrcp.f32 %v3023_v31 }
 0xc33   :  { %v3036_v40 = vpop.permute.xlu0 %3035 }
 0xc34   :  { %8807 = vmatpush3.msk.msra.mxu0 %vm1047_vm5, %v3036_v40 }
 0xc35   :  { %8816 = vmatprep.subr.mxu0 %v9419_v4 }
 0xc36   :  { %v9304_v44 = vpop.eup %9303 }
 0xc37   :  { %v3031_v55 = vmul.f32 %v9304_v44, %v9296_v25  ;;  %v3348_v12 = vpop.permute.xlu0 %3347 }
 0xc38   :  { %3025 = vadd.xlane.f32.xlu1 %v3024_v45  ;;  %v3391_v19 = vsel %vm576_vm3, %v9874_v14, %v3348_v12 }
 0xc39   :  { %8809 = vmatmul.mubr.msk.f32.vlgmr.msra.gmra.mrb[32].mxu0 %vm1043_vm6, %v3031_v55 }
 0xc3a   :  { %8818 = vmatprep.mubr.msk.f32.mxu0 %vm9418_vm2, %v9419_v4  ;;  %v9306_v48 = vpop.eup %9305 }
 0xc3b   :  { %v3033_v52 = vmul.f32 %v9306_v48, %v9298_v27  ;;  %v3364_v13 = vpop.permute.xlu0 %3363 }
 0xc3c   :  { %v3396_v22 = vsel %vm3395_vm7, %v3391_v19, %v3364_v13 }
 0xc3f   :  { %v3352_v15 = vpop.permute.xlu0 %3351 }
 0xc40   :  { %v3393_v40 = vsel %vm576_vm3, %v9878_v18, %v3352_v15 }
 0xc49   :  { %3266 = vrot.lane.b32.xlu1 %v9774_v6, %s10962_s30 }
 0xc4d   :  { %3349 = vrot.lane.b32.xlu1 %v9958_v32, %s10958_s18 }
 0xc51   :  { %3365 = vrot.lane.b32.xlu1 %v2521_v3, %s10960_s19 }
 0xc55   :  { %3367 = vrot.lane.b32.xlu1 %v10034_v56, %s10960_s19 }
 0xc8c   :  { %v3020_v1 = vpop.xlane.xlu1 %3019 }
 0xc8d   :  { %9307 = vrcp.f32 %v3020_v1 }
 0xc90   :  { %v3113_v47 = vpop.permute.xlu1 %3112 }
 0xc91   :  { %8812 = vmatpush3.msk.msra.mxu1 %vm1047_vm5, %v3113_v47 }
 0xc92   :  { %8821 = vmatprep.subr.mxu1 %v9419_v4 }
 0xc94   :  { %v3190_v49 = vpop.permute.xlu1 %3189 }
 0xc95   :  { %8817 = vmatpush3.msk.msra.mxu0 %vm1047_vm5, %v3190_v49 }
 0xc96   :  { %8819 = vmatmul.mubr.msk.f32.vlgmr.msra.gmra.mrb[34].mxu0 %vm1043_vm6, %v3033_v52  ;;  %9159 = vmatprep.subr.bf16.mxu0 %v9417_v0 }
 0xc97   :  { %v9308_v6 = vpop.eup %9307  ;;  %8834 = vmatprep.mubr.msk.f32.mxu0 %vm9418_vm2, %v9419_v4  ;;  %9161 = vmatpush3.bf16.msra.mxu0 %v9160_v5 }
 0xc98   :  { %v3032_v32 = vmul.f32 %v9308_v6, %v9300_v35  ;;  %9162 = vmatprep.subr.bf16.mxu0 %v9417_v0 }
 0xc9a   :  { %8814 = vmatmul.mubr.msk.f32.vlgmr.msra.gmra.mrb[36].mxu1 %vm1043_vm6, %v3032_v32 }
 0xc9b   :  { %8823 = vmatprep.mubr.msk.f32.mxu1 %vm9418_vm2, %v9419_v4 }
 0xcc5   :  { %v3026_v53 = vpop.xlane.xlu1 %3025 }
 0xcc6   :  { %9309 = vrcp.f32 %v3026_v53 }
 0xcc9   :  { %v3267_v54 = vpop.permute.xlu1 %3266 }
 0xcca   :  { %8822 = vmatpush3.msk.msra.mxu1 %vm1047_vm5, %v3267_v54 }
 0xccb   :  { %9165 = vmatprep.subr.bf16.mxu1 %v9417_v0 }
 0xccd   :  { %v3350_v21 = vpop.permute.xlu1 %3349 }
 0xcce   :  { %v3392_v33 = vsel %vm576_vm3, %v9876_v16, %v3350_v21 }
 0xcd0   :  { %v9310_v56 = vpop.eup %9309 }
 0xcd1   :  { %v3034_v58 = vmul.f32 %v9310_v56, %v9302_v41  ;;  %v3366_v25 = vpop.permute.xlu1 %3365 }
 0xcd2   :  { %v3397_v14 = vsel %vm3395_vm7, %v3392_v33, %v3366_v25 }
 0xcd3   :  { %8824 = vmatmul.mubr.msk.f32.vlgmr.msra.gmra.mrb[38].mxu1 %vm1043_vm6, %v3034_v58 }
 0xcd4   :  { %8851 = vmatprep.mubr.msk.f32.mxu1 %vm9418_vm2, %v9419_v4 }
 0xcd5   :  { %v3368_v27 = vpop.permute.xlu1 %3367 }
 0xcd6   :  { %v3398_v41 = vsel %vm3395_vm7, %v3393_v40, %v3368_v27 }
 0xd0c   :  { %v3108_v59 = vpop.f32.mrb[32].mxu0 }
 0xd0d   :  { %3379 = vrot.lane.b32.xlu0 %v3108_v59, %s9434_s0  ;;  %v8810_v60 = vpop.f32.mrb[33].mxu0 }
 0xd11   :  { %3353 = vrot.lane.b32.xlu0 %v9962_v42, %s10958_s18  ;;  %v3567_v42 = vld [vmem:[%s10947_s9 + $0x10] sm:$0xff] }
 0xd15   :  { %3369 = vrot.lane.b32.xlu0 %v10038_v7, %s10960_s19  ;;  %v3568_v7 = vld [vmem:[%s10947_s9 + $0x18] sm:$0xff] }
 0xd16   :  { %v9163_v9 = vpack.c.bf16 %v3568_v7, %v3567_v42 }
 0xd18   :  { %9164 = vmatpush3.bf16.msra.mxu0 %v9163_v9 }
 0xd19   :  { %9171 = vmatprep.subr.bf16.mxu0 %v9417_v0 }
 0xd69   :  { %v3262_v61 = vpop.f32.mrb[34].mxu0 }
 0xd6a   :  { %v8820_v62 = vpop.f32.mrb[35].mxu0 }
 0xd6d   :  { %v3185_v3 = vpop.f32.mrb[36].mxu1 }
 0xd6e   :  { %3381 = vrot.lane.b32.xlu1 %v3185_v3, %s9434_s0  ;;  %v8815_v8 = vpop.f32.mrb[37].mxu1 }
 0xd72   :  { %3383 = vrot.lane.b32.xlu1 %v3262_v61, %s9434_s0 }
 0xd7f   :  { %v3380_v17 = vpop.permute.xlu0 %3379 }
 0xd80   :  { %v3401_v23 = vsel %vm3400_vm8, %v3396_v22, %v3380_v17 }
 0xd81   :  { %v3416_v24 = vrot.slane %v3401_v23, %v9725_v50  ;;  %v3409_v28 = vcombine.high %v3401_v23, %v3401_v23 }
 0xd83   :  { %v3424_v26 = vcombine.high %v3416_v24, %v3416_v24  ;;  %v3431_v34 = vrot.slane %v3416_v24, %v9725_v50  ;;  %v3423_v35 = vrot.slane %v3409_v28, %v9725_v50  ;;  %v3354_v12 = vpop.permute.xlu0 %3353 }
 0xd84   :  { %v3394_v17 = vsel %vm576_vm3, %v9880_v20, %v3354_v12 }
 0xd85   :  { %v3445_v30 = vrot.slane %v3424_v26, %v9725_v50  ;;  %v3438_v16 = vrot.slane %v3423_v35, %v9725_v50 }
 0xd87   :  { %v3576_v37 = vcombine.low %v3431_v34, %v3445_v30  ;;  %v8279_v38 = vcombine.high %v3431_v34, %v3445_v30  ;;  %v3370_v15 = vpop.permute.xlu0 %3369 }
 0xd88   :  { %v3399_v19 = vsel %vm3395_vm7, %v3394_v17, %v3370_v15 }
 0xd89   :  { %v3586_v1 = vrot.slane %v3576_v37, %v9725_v50  ;;  %v3593_v49 = vrot.slane %v8279_v38, %v9725_v50 }
 0xd8b   :  { %v3608_v59 = vcombine.low %v3586_v1, %v3593_v49 }
 0xd8d   :  { %v3616_v8 = vrot.slane %v3608_v59, %v9725_v50  ;;  %v3855_v59 = vld [vmem:[%s10949_s13 + $0x18] sm:$0xff] }
 0xda6   :  { %v3339_v10 = vpop.f32.mrb[38].mxu1 }
 0xda7   :  { %3385 = vrot.lane.b32.xlu1 %v3339_v10, %s9434_s0  ;;  %v8825_v11 = vpop.f32.mrb[39].mxu1 }
 0xde0   :  { %v3382_v36 = vpop.permute.xlu1 %3381 }
 0xde1   :  { %v3402_v29 = vsel %vm3400_vm8, %v3397_v14, %v3382_v36 }
 0xde2   :  { %v3448_v39 = vcombine.high %v3402_v29, %v3402_v29  ;;  %v3455_v31 = vrot.slane %v3402_v29, %v9725_v50 }
 0xde4   :  { %v3463_v44 = vcombine.high %v3455_v31, %v3455_v31  ;;  %v3470_v45 = vrot.slane %v3455_v31, %v9725_v50  ;;  %v3384_v55 = vpop.permute.xlu1 %3383  ;;  %v3462_v47 = vrot.slane %v3448_v39, %v9725_v50 }
 0xde5   :  { %v3403_v48 = vsel %vm3400_vm8, %v3398_v41, %v3384_v55 }
 0xde6   :  { %v3484_v52 = vrot.slane %v3463_v44, %v9725_v50  ;;  %v3485_v6 = vcombine.high %v3470_v45, %v3470_v45  ;;  %v3578_v18 = vcombine.low %v3438_v16, %v3470_v45  ;;  %v3494_v32 = vrot.slane %v3403_v48, %v9725_v50 }
 0xde7   :  { %v3477_v56 = vrot.slane %v3462_v47, %v9725_v50  ;;  %v3487_v13 = vcombine.high %v3403_v48, %v3403_v48  ;;  %v8278_v47 = vld [vmem:[%s10948_s10] ss:$0 sm:$0xff] }
 0xde8   :  { %v3486_v53 = vcombine.high %v3484_v52, %v3484_v52  ;;  %v3579_v54 = vcombine.low %v3484_v52, %v3485_v6  ;;  %v3502_v58 = vcombine.high %v3494_v32, %v3494_v32  ;;  %v3600_v60 = vrot.slane %v3578_v18, %v9725_v50 }
 0xde9   :  { %v3509_v63 = vrot.slane %v3494_v32, %v9725_v50  ;;  %v3501_v21 = vrot.slane %v3487_v13, %v9725_v50 }
 0xdea   :  { %v3607_v61 = vrot.slane %v3579_v54, %v9725_v50  ;;  %v3625_v62 = vcombine.low %v3486_v53, %v3477_v56  ;;  %v3523_v2 = vrot.slane %v3502_v58, %v9725_v50  ;;  %v3852_v54 = vld [vmem:[%s10949_s13] sm:$0xff]  ;;  %v3853_v56 = vld [vmem:[%s10949_s13 + $0x8] sm:$0xff] }
 0xdeb   :  { %v3516_v27 = vrot.slane %v3501_v21, %v9725_v50  ;;  %v9166_v58 = vpack.c.bf16 %v3853_v56, %v3852_v54  ;;  %v3977_v54 = vld [vmem:[%s10952_s15 + $0x8] sm:$0xff] }
 0xdec   :  { %v3609_v3 = vcombine.low %v3600_v60, %v3607_v61  ;;  %v3626_v5 = vcombine.low %v3509_v63, %v3523_v2  ;;  %v3635_v7 = vrot.slane %v3625_v62, %v9725_v50  ;;  %v8280_v26 = vcombine.high %v3509_v63, %v3523_v2 }
 0xded   :  { %9167 = vmatpush3.bf16.msra.mxu1 %v9166_v58  ;;  %v3979_v58 = vld [vmem:[%s10952_s15 + $0x18] sm:$0xff] }
 0xdee   :  { %v3623_v42 = vrot.slane %v3609_v3, %v9725_v50  ;;  %v3642_v9 = vrot.slane %v3626_v5, %v9725_v50  ;;  %v3649_v35 = vrot.slane %v8280_v26, %v9725_v50  ;;  %9168 = vmatprep.subr.bf16.mxu1 %v9417_v0 }
 0xdf0   :  { %v3624_v10 = vcombine.low %v3616_v8, %v3623_v42  ;;  %v3657_v11 = vcombine.low %v3635_v7, %v3642_v9 }
 0xdf2   :  { %8835 = vmatmul.mubr.msk.f32.vlgmr.msra.gmra.mrb[36].mxu0 %vm179_vm0, %v3624_v10  ;;  %v3665_v16 = vrot.slane %v3657_v11, %v9725_v50 }
 0xdf3   :  { %8837 = vmatprep.mubr.msk.f32.mxu0 %vm9418_vm2, %v9419_v4 }
 0xe19   :  { %v3386_v22 = vpop.permute.xlu1 %3385 }
 0xe1a   :  { %v3404_v23 = vsel %vm3400_vm8, %v3399_v19, %v3386_v22 }
 0xe1b   :  { %v3526_v24 = vcombine.high %v3404_v23, %v3404_v23  ;;  %v3533_v25 = vrot.slane %v3404_v23, %v9725_v50 }
 0xe1d   :  { %v3540_v28 = vrot.slane %v3526_v24, %v9725_v50  ;;  %v3541_v30 = vcombine.high %v3533_v25, %v3533_v25  ;;  %v3548_v33 = vrot.slane %v3533_v25, %v9725_v50  ;;  %v8284_v25 = vld [vmem:[%s10950_s11] ss:$0 sm:$0xff] }
 0xe1f   :  { %v3562_v20 = vrot.slane %v3541_v30, %v9725_v50  ;;  %v3563_v34 = vcombine.high %v3548_v33, %v3548_v33  ;;  %v3628_v14 = vcombine.low %v3516_v27, %v3548_v33  ;;  %v3555_v36 = vrot.slane %v3540_v28, %v9725_v50  ;;  %v8285_v27 = vld [vmem:[%s10951_s12] ss:$0 sm:$0xff] }
 0xe21   :  { %v3564_v37 = vcombine.high %v3562_v20, %v3562_v20  ;;  %v3656_v29 = vrot.slane %v3628_v14, %v9725_v50  ;;  %v3674_v38 = vcombine.low %v3562_v20, %v3563_v34 }
 0xe23   :  { %v3658_v39 = vcombine.low %v3649_v35, %v3656_v29  ;;  %v3675_v31 = vcombine.low %v3564_v37, %v3555_v36  ;;  %v3682_v40 = vrot.slane %v3674_v38, %v9725_v50 }
 0xe25   :  { %v3689_v41 = vrot.slane %v3675_v31, %v9725_v50  ;;  %v3672_v44 = vrot.slane %v3658_v39, %v9725_v50 }
 0xe27   :  { %v3673_v45 = vcombine.low %v3665_v16, %v3672_v44  ;;  %v3690_v55 = vcombine.low %v3682_v40, %v3689_v41 }
 0xe29   :  { %8838 = vmatmul.mubr.msk.f32.gmra.mrb[38].mxu0 %vm179_vm0, %v3673_v45  ;;  %v3697_v1 = vrot.slane %v3690_v55, %v9725_v50 }
 0xe2a   :  { %8840 = vmatprep.mubr.msk.f32.mxu0 %vm9418_vm2, %v9419_v4 }
 0xe2d   :  { %8841 = vmatmul.mubr.msk.f32.gmra.mrb[40].mxu0 %vm179_vm0, %v3697_v1 }
 0xe2e   :  { %8876 = vmatprep.mubr.msk.f32.mxu0 %vm9418_vm2, %v9419_v4 }
 0xec5   :  { %v3770_v48 = vpop.f32.mrb[36].mxu0 }
 0xec6   :  { %v3771_v49 = vadd.f32 %v8278_v47, %v3770_v48  ;;  %v8836_v52 = vpop.f32.mrb[37].mxu0 }
 0xec8   :  { %v10170_v6 = vadd.f32 %v3771_v49, %v9660_v43  ;;  %v3854_v43 = vld [vmem:[%s10949_s13 + $0x10] sm:$0xff] }
 0xec9   :  { %v9169_v60 = vpack.c.bf16 %v3855_v59, %v3854_v43  ;;  %v3978_v43 = vld [vmem:[%s10952_s15 + $0x10] sm:$0xff] }
 0xeca   :  { %v3789_v18 = vsel %vm179_vm0, %v10170_v6, 0.0  ;;  %v3801_v32 = vmul.f32 %v10170_v6, %v10170_v6  ;;  %v9175_v59 = vpack.c.bf16 %v3979_v58, %v3978_v43 }
 0xecb   :  { %3790 = vadd.xlane.f32.xlu0 %v3789_v18  ;;  %9170 = vmatpush3.bf16.msra.mxu1 %v9169_v60  ;;  %v3980_v60 = vld [vmem:[%s10952_s15 + $0x20] sm:$0xff] }
 0xecc   :  { %v3804_v53 = vsel %vm179_vm0, %v3801_v32, 0.0  ;;  %9183 = vmatprep.subr.bf16.mxu1 %v9417_v0 }
 0xecd   :  { %3805 = vadd.xlane.f32.xlu1 %v3804_v53  ;;  %v3976_v53 = vld [vmem:[%s10952_s15] sm:$0xff] }
 0xece   :  { %v9172_v56 = vpack.c.bf16 %v3977_v54, %v3976_v53 }
 0xed0   :  { %9173 = vmatpush3.bf16.msra.mxu0 %v9172_v56 }
 0xed1   :  { %9174 = vmatprep.subr.bf16.mxu0 %v9417_v0 }
 0xed4   :  { %9176 = vmatpush3.bf16.msra.mxu0 %v9175_v59 }
 0xed5   :  { %9177 = vmatprep.subr.bf16.mxu0 %v9417_v0 }
 0xefc   :  { %v3775_v61 = vpop.f32.mrb[38].mxu0 }
 0xefd   :  { %v3776_v62 = vadd.f32 %v8278_v47, %v3775_v61  ;;  %v8839_v63 = vpop.f32.mrb[39].mxu0  ;;  %v3981_v61 = vld [vmem:[%s10952_s15 + $0x28] sm:$0xff] }
 0xefe   :  { %v3982_v63 = vld [vmem:[%s10952_s15 + $0x30] sm:$0xff] }
 0xeff   :  { %v10192_v2 = vadd.f32 %v3776_v62, %v9667_v51  ;;  %v9178_v62 = vpack.c.bf16 %v3981_v61, %v3980_v60 }
 0xf00   :  { %v3780_v3 = vpop.f32.mrb[40].mxu0 }
 0xf01   :  { %v3781_v5 = vadd.f32 %v8278_v47, %v3780_v3  ;;  %v8842_v8 = vpop.f32.mrb[41].mxu0  ;;  %v3792_v42 = vsel %vm179_vm0, %v10192_v2, 0.0  ;;  %v3802_v7 = vmul.f32 %v10192_v2, %v10192_v2  ;;  %9179 = vmatpush3.bf16.msra.mxu0 %v9178_v62  ;;  %v3983_v3 = vld [vmem:[%s10952_s15 + $0x38] sm:$0xff] }
 0xf02   :  { %3793 = vadd.xlane.f32.xlu0 %v3792_v42  ;;  %9180 = vmatprep.subr.bf16.mxu0 %v9417_v0  ;;  %v8286_v8 = vld [vmem:[%s10953_s14] ss:$0 sm:$0xff] }
 0xf03   :  { %v10199_v9 = vadd.f32 %v3781_v5, %v9674_v57  ;;  %v3807_v10 = vsel %vm179_vm0, %v3802_v7, 0.0  ;;  %v9181_v5 = vpack.c.bf16 %v3983_v3, %v3982_v63 }
 0xf05   :  { %v3803_v11 = vmul.f32 %v10199_v9, %v10199_v9  ;;  %v3795_v12 = vsel %vm186_vm1, %v10199_v9, 0.0  ;;  %9182 = vmatpush3.bf16.msra.mxu0 %v9181_v5 }
 0xf06   :  { %3808 = vadd.xlane.f32.xlu0 %v3807_v10  ;;  %8907 = vmatprep.subr.mxu0 %v9419_v4 }
 0xf07   :  { %v3810_v51 = vsel %vm186_vm1, %v3803_v11, 0.0 }
 0xf08   :  { %3811 = vadd.xlane.f32.xlu1 %v3810_v51 }
 0xf0a   :  { %3796 = vadd.xlane.f32.xlu0 %v3795_v12 }
 0xf58   :  { %v3791_v13 = vpop.xlane.xlu0 %3790 }
 0xf59   :  { %v3798_v15 = vmul.f32 0.03125, %v3791_v13 }
 0xf5a   :  { %v3806_v17 = vpop.xlane.xlu1 %3805 }
 0xf5b   :  { %v3816_v19 = vmul.f32 %v3798_v15, %v3798_v15  ;;  %v3813_v21 = vmul.f32 0.03125, %v3806_v17  ;;  %v3822_v23 = vsub.f32 %v10170_v6, %v3798_v15 }
 0xf5d   :  { %v3819_v57 = vsub.f32 %v3813_v21, %v3816_v19 }
 0xf5f   :  { %v3825_v22 = vadd.f32 1e-05, %v3819_v57 }
 0xf61   :  { %9311 = vrsqrt.f32 %v3825_v22 }
 0xf6b   :  { %v9312_v24 = vpop.eup %9311 }
 0xf6c   :  { %v3831_v26 = vmul.f32 %v9312_v24, %v3822_v23 }
 0xf6e   :  { %v3840_v28 = vmul.f32 %v8284_v25, %v3831_v26 }
 0xf70   :  { %v3849_v30 = vadd.f32 %v8285_v27, %v3840_v28 }
 0xf72   :  { %8852 = vmatmul.mubr.msk.f32.vlgmr.msra.gmra.mrb[40].mxu1 %vm179_vm0, %v3849_v30 }
 0xf73   :  { %8854 = vmatprep.mubr.msk.f32.mxu1 %vm9418_vm2, %v9419_v4 }
 0xf8f   :  { %v3794_v33 = vpop.xlane.xlu0 %3793 }
 0xf90   :  { %v3799_v20 = vmul.f32 0.03125, %v3794_v33 }
 0xf92   :  { %v3817_v14 = vmul.f32 %v3799_v20, %v3799_v20  ;;  %v3823_v44 = vsub.f32 %v10192_v2, %v3799_v20 }
 0xf93   :  { %v3809_v34 = vpop.xlane.xlu0 %3808 }
 0xf94   :  { %v3814_v35 = vmul.f32 0.03125, %v3809_v34 }
 0xf95   :  { %v3812_v37 = vpop.xlane.xlu1 %3811 }
 0xf96   :  { %v3820_v36 = vsub.f32 %v3814_v35, %v3817_v14  ;;  %v3815_v31 = vmul.f32 0.03125, %v3812_v37 }
 0xf97   :  { %v3797_v29 = vpop.xlane.xlu0 %3796 }
 0xf98   :  { %v3826_v38 = vadd.f32 1e-05, %v3820_v36  ;;  %v3800_v39 = vmul.f32 0.03125, %v3797_v29  ;;  %v8293_v29 = vld [vmem:[%s10954_s16] ss:$0 sm:$0xff] }
 0xf9a   :  { %9313 = vrsqrt.f32 %v3826_v38  ;;  %v3818_v40 = vmul.f32 %v3800_v39, %v3800_v39  ;;  %v3824_v47 = vsub.f32 %v10199_v9, %v3800_v39 }
 0xf9c   :  { %v3821_v41 = vsub.f32 %v3815_v31, %v3818_v40 }
 0xf9e   :  { %v3827_v16 = vadd.f32 1e-05, %v3821_v41 }
 0xfa0   :  { %9315 = vrsqrt.f32 %v3827_v16 }
 0xfa4   :  { %v9314_v45 = vpop.eup %9313 }
 0xfa5   :  { %v3832_v55 = vmul.f32 %v9314_v45, %v3823_v44  ;;  %v8301_v45 = vld [vmem:[%s10943_s7 + $0x20] sm:$0xff] }
 0xfa7   :  { %v3841_v1 = vmul.f32 %v8284_v25, %v3832_v55  ;;  %v8302_v55 = vld [vmem:[%s10943_s7 + $0x28] sm:$0xff] }
 0xfa9   :  { %v3850_v48 = vadd.f32 %v8285_v27, %v3841_v1  ;;  %v8303_v1 = vld [vmem:[%s10943_s7 + $0x30] sm:$0xff] }
 0xfaa   :  { %v9316_v49 = vpop.eup %9315 }
 0xfab   :  { %v3833_v52 = vmul.f32 %v9316_v49, %v3824_v47  ;;  %8855 = vmatmul.mubr.msk.f32.gmra.mrb[42].mxu1 %vm179_vm0, %v3850_v48  ;;  %v8304_v47 = vld [vmem:[%s10943_s7 + $0x38] sm:$0xff] }
 0xfac   :  { %8857 = vmatprep.mubr.msk.f32.mxu1 %vm9418_vm2, %v9419_v4  ;;  %v9187_v48 = vpack.c.bf16 %v8304_v47, %v8303_v1 }
 0xfad   :  { %v3842_v18 = vmul.f32 %v8284_v25, %v3833_v52 }
 0xfaf   :  { %v3851_v32 = vadd.f32 %v8285_v27, %v3842_v18 }
 0xfb1   :  { %8858 = vmatmul.mubr.msk.f32.gmra.mrb[44].mxu1 %vm179_vm0, %v3851_v32 }
 0xfb2   :  { %8893 = vmatprep.mubr.msk.f32.mxu1 %vm9418_vm2, %v9419_v4 }
0x1045   :  { %v3938_v42 = vpop.f32.mrb[40].mxu1 }
0x1046   :  { %v3939_v7 = vadd.f32 %v8286_v8, %v3938_v42  ;;  %v8853_v10 = vpop.f32.mrb[41].mxu1 }
0x1048   :  { %v8290_v11 = vmul.f32 -1.702, %v3939_v7 }
0x104a   :  { %v3958_v51 = vmul.f32 1.442695, %v8290_v11 }
0x104c   :  { %9317 = vpow2.f32 %v3958_v51  ;;  %v8299_v51 = vld [vmem:[%s10944_s5 + $0x1] ss:$0 sm:$0xff] }
0x1056   :  { %v9318_v12 = vpop.eup %9317 }
0x1057   :  { %v3964_v13 = vadd.f32 1.0, %v9318_v12 }
0x1059   :  { %9319 = vrcp.f32 %v3964_v13  ;;  %v8300_v13 = vld [vmem:[%s10945_s6 + $0x1] ss:$0 sm:$0xff] }
0x1063   :  { %v9320_v15 = vpop.eup %9319 }
0x1064   :  { %v3973_v17 = vmul.f32 %v9320_v15, %v3939_v7 }
0x1066   :  { %8877 = vmatmul.mubr.msk.f32.vlgmr.msra.gmra.mrb[42].mxu0 %vm3991_vm9, %v3973_v17 }
0x1067   :  { %8879 = vmatprep.mubr.msk.f32.mxu0 %vm9418_vm2, %v9419_v4 }
0x107e   :  { %v3943_v19 = vpop.f32.mrb[42].mxu1 }
0x107f   :  { %v3944_v21 = vadd.f32 %v8286_v8, %v3943_v19  ;;  %v8856_v57 = vpop.f32.mrb[43].mxu1 }
0x1081   :  { %v8291_v22 = vmul.f32 -1.702, %v3944_v21 }
0x1083   :  { %v3960_v23 = vmul.f32 1.442695, %v8291_v22 }
0x1084   :  { %v3948_v24 = vpop.f32.mrb[44].mxu1 }
0x1085   :  { %9321 = vpow2.f32 %v3960_v23  ;;  %v3949_v25 = vadd.f32 %v8286_v8, %v3948_v24  ;;  %v8859_v26 = vpop.f32.mrb[45].mxu1 }
0x1087   :  { %v8292_v27 = vmul.f32 -1.702, %v3949_v25 }
0x1089   :  { %v3962_v28 = vmul.f32 1.442695, %v8292_v27 }
0x108b   :  { %9323 = vpow2.f32 %v3962_v28 }
0x108f   :  { %v9322_v30 = vpop.eup %9321 }
0x1090   :  { %v3965_v33 = vadd.f32 1.0, %v9322_v30 }
0x1092   :  { %9325 = vrcp.f32 %v3965_v33 }
0x1095   :  { %v9324_v20 = vpop.eup %9323 }
0x1096   :  { %v3966_v34 = vadd.f32 1.0, %v9324_v20 }
0x1098   :  { %9327 = vrcp.f32 %v3966_v34 }
0x109c   :  { %v9326_v14 = vpop.eup %9325 }
0x109d   :  { %v3974_v35 = vmul.f32 %v9326_v14, %v3944_v21 }
0x109f   :  { %8880 = vmatmul.mubr.msk.f32.gmra.mrb[44].mxu0 %vm3991_vm9, %v3974_v35 }
0x10a0   :  { %8882 = vmatprep.mubr.msk.f32.mxu0 %vm9418_vm2, %v9419_v4 }
0x10a2   :  { %v9328_v36 = vpop.eup %9327 }
0x10a3   :  { %v3975_v37 = vmul.f32 %v9328_v36, %v3949_v25 }
0x10a5   :  { %8883 = vmatmul.mubr.msk.f32.gmra.mrb[46].mxu0 %vm3991_vm9, %v3975_v37 }
0x10a6   :  { %8909 = vmatprep.mubr.msk.f32.mxu0 %vm9418_vm2, %v9419_v4 }
0x1139   :  { %v4067_v38 = vpop.f32.mrb[42].mxu0 }
0x113a   :  { %v4068_v39 = vadd.f32 %v8293_v29, %v4067_v38  ;;  %v8878_v31 = vpop.f32.mrb[43].mxu0 }
0x113c   :  { %v10269_v40 = vadd.f32 %v4068_v39, %v10170_v6  ;;  %v9184_v6 = vpack.c.bf16 %v8302_v55, %v8301_v45 }
0x113e   :  { %v4088_v41 = vsel %vm179_vm0, %v10269_v40, 0.0  ;;  %v4100_v16 = vmul.f32 %v10269_v40, %v10269_v40  ;;  %9185 = vmatpush3.bf16.msra.mxu1 %v9184_v6 }
0x113f   :  { %4089 = vadd.xlane.f32.xlu0 %v4088_v41  ;;  %9186 = vmatprep.subr.bf16.mxu1 %v9417_v0 }
0x1140   :  { %v4103_v44 = vsel %vm179_vm0, %v4100_v16, 0.0 }
0x1141   :  { %4104 = vadd.xlane.f32.xlu1 %v4103_v44  ;;  %v8306_v44 = vld [vmem:[%s10946_s8 + $0x1] ss:$0 sm:$0xff]  ;;  %s10970_s8 = smov 104  }
0x1142   :  { %9188 = vmatpush3.bf16.msra.mxu1 %v9187_v48 }
0x1143   :  { %8902 = vmatprep.subr.mxu1 %v9419_v4 }
0x1172   :  { %v4072_v49 = vpop.f32.mrb[44].mxu0 }
0x1173   :  { %v4073_v52 = vadd.f32 %v8293_v29, %v4072_v49  ;;  %v8881_v18 = vpop.f32.mrb[45].mxu0 }
0x1175   :  { %v10291_v32 = vadd.f32 %v4073_v52, %v10192_v2 }
0x1177   :  { %v4091_v53 = vsel %vm179_vm0, %v10291_v32, 0.0  ;;  %v4101_v54 = vmul.f32 %v10291_v32, %v10291_v32 }
0x1178   :  { %4092 = vadd.xlane.f32.xlu0 %v4091_v53  ;;  %v4077_v56 = vpop.f32.mrb[46].mxu0 }
0x1179   :  { %v4078_v43 = vadd.f32 %v8293_v29, %v4077_v56  ;;  %v8884_v58 = vpop.f32.mrb[47].mxu0  ;;  %v4106_v59 = vsel %vm179_vm0, %v4101_v54, 0.0 }
0x117a   :  { %4107 = vadd.xlane.f32.xlu1 %v4106_v59 }
0x117b   :  { %v10299_v60 = vadd.f32 %v4078_v43, %v10199_v9 }
0x117d   :  { %v4094_v2 = vsel %vm186_vm1, %v10299_v60, 0.0  ;;  %v4102_v61 = vmul.f32 %v10299_v60, %v10299_v60 }
0x117e   :  { %4095 = vadd.xlane.f32.xlu0 %v4094_v2 }
0x117f   :  { %v4109_v62 = vsel %vm186_vm1, %v4102_v61, 0.0 }
0x1180   :  { %4110 = vadd.xlane.f32.xlu1 %v4109_v62 }
0x11cc   :  { %v4090_v63 = vpop.xlane.xlu0 %4089 }
0x11cd   :  { %v4097_v3 = vmul.f32 0.03125, %v4090_v63 }
0x11ce   :  { %v4105_v5 = vpop.xlane.xlu1 %4104 }
0x11cf   :  { %v4115_v8 = vmul.f32 %v4097_v3, %v4097_v3  ;;  %v4112_v42 = vmul.f32 0.03125, %v4105_v5  ;;  %v4121_v9 = vsub.f32 %v10269_v40, %v4097_v3 }
0x11d1   :  { %v4118_v7 = vsub.f32 %v4112_v42, %v4115_v8 }
0x11d3   :  { %v4124_v10 = vadd.f32 1e-05, %v4118_v7 }
0x11d5   :  { %9329 = vrsqrt.f32 %v4124_v10 }
0x11df   :  { %v9330_v11 = vpop.eup %9329 }
0x11e0   :  { %v4130_v12 = vmul.f32 %v9330_v11, %v4121_v9 }
0x11e2   :  { %v4139_v15 = vmul.f32 %v8299_v51, %v4130_v12 }
0x11e4   :  { %v4148_v17 = vadd.f32 %v8300_v13, %v4139_v15 }
0x11e6   :  { %8894 = vmatmul.mubr.msk.f32.vlgmr.msra.gmra.mrb[46].mxu1 %vm179_vm0, %v4148_v17 }
0x11e7   :  { %8896 = vmatprep.mubr.msk.f32.mxu1 %vm9418_vm2, %v9419_v4 }
0x1205   :  { %v4093_v19 = vpop.xlane.xlu0 %4092 }
0x1206   :  { %v4098_v21 = vmul.f32 0.03125, %v4093_v19 }
0x1207   :  { %v4108_v57 = vpop.xlane.xlu1 %4107 }
0x1208   :  { %v4116_v22 = vmul.f32 %v4098_v21, %v4098_v21  ;;  %v4113_v23 = vmul.f32 0.03125, %v4108_v57  ;;  %v4122_v14 = vsub.f32 %v10291_v32, %v4098_v21 }
0x120a   :  { %v4119_v24 = vsub.f32 %v4113_v23, %v4116_v22 }
0x120b   :  { %v4096_v25 = vpop.xlane.xlu0 %4095 }
0x120c   :  { %v4125_v26 = vadd.f32 1e-05, %v4119_v24  ;;  %v4099_v27 = vmul.f32 0.03125, %v4096_v25 }
0x120d   :  { %v4111_v28 = vpop.xlane.xlu1 %4110 }
0x120e   :  { %9331 = vrsqrt.f32 %v4125_v26  ;;  %v4117_v30 = vmul.f32 %v4099_v27, %v4099_v27  ;;  %v4114_v33 = vmul.f32 0.03125, %v4111_v28  ;;  %v4123_v29 = vsub.f32 %v10299_v60, %v4099_v27 }
0x1210   :  { %v4120_v20 = vsub.f32 %v4114_v33, %v4117_v30 }
0x1212   :  { %v4126_v34 = vadd.f32 1e-05, %v4120_v20 }
0x1214   :  { %9333 = vrsqrt.f32 %v4126_v34 }
0x1218   :  { %v9332_v35 = vpop.eup %9331 }
0x1219   :  { %v4131_v36 = vmul.f32 %v9332_v35, %v4122_v14 }
0x121b   :  { %v4140_v37 = vmul.f32 %v8299_v51, %v4131_v36 }
0x121d   :  { %v4149_v38 = vadd.f32 %v8300_v13, %v4140_v37 }
0x121e   :  { %v9334_v39 = vpop.eup %9333 }
0x121f   :  { %8897 = vmatmul.mubr.msk.f32.gmra.mrb[48].mxu1 %vm179_vm0, %v4149_v38  ;;  %v4132_v31 = vmul.f32 %v9334_v39, %v4123_v29 }
0x1220   :  { %8899 = vmatprep.mubr.msk.f32.mxu1 %vm9418_vm2, %v9419_v4 }
0x1221   :  { %v4141_v41 = vmul.f32 %v8299_v51, %v4132_v31 }
0x1223   :  { %v4150_v16 = vadd.f32 %v8300_v13, %v4141_v41 }
0x1225   :  { %8900 = vmatmul.mubr.msk.f32.gmra.mrb[50].mxu1 %vm179_vm0, %v4150_v16 }
0x1226   :  { %8904 = vmatprep.mubr.msk.f32.mxu1 %vm9418_vm2, %v9419_v4 }
0x12b9   :  { %v4239_v45 = vpop.f32.mrb[46].mxu1 }
0x12ba   :  { %v4240_v55 = vadd.f32 %v8306_v44, %v4239_v45  ;;  %v8895_v6 = vpop.f32.mrb[47].mxu1 }
0x12bc   :  { %v4256_v1 = vcombine.high %v4240_v55, %v4240_v55  ;;  %v4263_v47 = vrot.slane %v4240_v55, %v9725_v50 }
0x12be   :  { %v4270_v48 = vrot.slane %v4256_v1, %v9725_v50  ;;  %v4271_v49 = vcombine.high %v4263_v47, %v4263_v47  ;;  %v4279_v52 = vrot.slane %v4263_v47, %v9725_v50 }
0x12c0   :  { %v4286_v18 = vrot.slane %v4270_v48, %v9725_v50  ;;  %v4293_v53 = vrot.slane %v4271_v49, %v9725_v50  ;;  %v4272_v3 = vcombine.high %v4270_v48, %v4270_v48 }
0x12c2   :  { %v4378_v54 = vcombine.low %v4279_v52, %v4293_v53  ;;  %v8310_v56 = vcombine.high %v4279_v52, %v4293_v53  ;;  %v4400_v59 = vrot.slane %v4286_v18, %v9725_v50  ;;  %v4300_v5 = vrot.slane %v4272_v3, %v9725_v50 }
0x12c3   :  { %v4302_v8 = vcombine.high %v4286_v18, %v4286_v18 }
0x12c4   :  { %v4386_v43 = vrot.slane %v4378_v54, %v9725_v50  ;;  %v4393_v58 = vrot.slane %v8310_v56, %v9725_v50  ;;  %v4415_v62 = vrot.slane %v4400_v59, %v9725_v50  ;;  %v4304_v12 = vcombine.high %v4300_v5, %v4300_v5 }
0x12c5   :  { %v4493_v51 = vcombine.low %v4300_v5, %v4302_v8 }
0x12c6   :  { %v4401_v2 = vcombine.low %v4386_v43, %v4393_v58 }
0x12c7   :  { %v4501_v25 = vrot.slane %v4493_v51, %v9725_v50 }
0x12c8   :  { %v4408_v61 = vrot.slane %v4401_v2, %v9725_v50 }
0x12ca   :  { %v10337_v63 = vcombine.low %v4408_v61, %v4415_v62 }
0x12cc   :  { %4417 = vrot.lane.b32.xlu0 %v10337_v63, %s9421_s2 }
0x12f2   :  { %v4244_v42 = vpop.f32.mrb[48].mxu1 }
0x12f3   :  { %v4245_v7 = vadd.f32 %v8306_v44, %v4244_v42  ;;  %v8898_v10 = vpop.f32.mrb[49].mxu1 }
0x12f5   :  { %v4305_v9 = vcombine.high %v4245_v7, %v4245_v7  ;;  %v4312_v11 = vrot.slane %v4245_v7, %v9725_v50 }
0x12f7   :  { %v4319_v13 = vrot.slane %v4305_v9, %v9725_v50  ;;  %v4320_v15 = vcombine.high %v4312_v11, %v4312_v11  ;;  %v4328_v17 = vrot.slane %v4312_v11, %v9725_v50 }
0x12f8   :  { %v4249_v19 = vpop.f32.mrb[50].mxu1 }
0x12f9   :  { %v4321_v21 = vcombine.high %v4319_v13, %v4319_v13  ;;  %v4335_v57 = vrot.slane %v4319_v13, %v9725_v50  ;;  %v4342_v22 = vrot.slane %v4320_v15, %v9725_v50  ;;  %v4494_v23 = vcombine.low %v4304_v12, %v4328_v17  ;;  %v8901_v24 = vpop.f32.mrb[51].mxu1 }
0x12fa   :  { %v4250_v26 = vadd.f32 %v8306_v44, %v4249_v19 }
0x12fb   :  { %v4349_v27 = vrot.slane %v4321_v21, %v9725_v50  ;;  %v4351_v28 = vcombine.high %v4335_v57, %v4335_v57  ;;  %v4508_v30 = vrot.slane %v4494_v23, %v9725_v50  ;;  %v4515_v33 = vrot.slane %v4342_v22, %v9725_v50 }
0x12fc   :  { %v8315_v20 = vcombine.high %v4328_v17, %v4342_v22  ;;  %v4360_v34 = vrot.slane %v4250_v26, %v9725_v50 }
0x12fd   :  { %v4516_v14 = vcombine.low %v4501_v25, %v4508_v30  ;;  %v4609_v35 = vcombine.low %v4335_v57, %v4349_v27  ;;  %v4530_v36 = vrot.slane %v4515_v33, %v9725_v50  ;;  %v4353_v37 = vcombine.high %v4349_v27, %v4349_v27 }
0x12fe   :  { %v4361_v29 = vcombine.high %v4360_v34, %v4360_v34  ;;  %v4368_v38 = vrot.slane %v4360_v34, %v9725_v50  ;;  %v4616_v31 = vrot.slane %v8315_v20, %v9725_v50  ;;  %v4630_v16 = vrot.slane %v4351_v28, %v9725_v50 }
0x12ff   :  { %v4523_v39 = vrot.slane %v4516_v14, %v9725_v50  ;;  %v4623_v41 = vrot.slane %v4609_v35, %v9725_v50 }
0x1300   :  { %v4375_v44 = vrot.slane %v4361_v29, %v9725_v50  ;;  %v4376_v45 = vcombine.high %v4368_v38, %v4368_v38  ;;  %v4723_v55 = vcombine.low %v4353_v37, %v4368_v38  ;;  %v4645_v52 = vrot.slane %v4630_v16, %v9725_v50 }
0x1301   :  { %v10359_v6 = vcombine.low %v4523_v39, %v4530_v36  ;;  %v4631_v1 = vcombine.low %v4616_v31, %v4623_v41 }
0x1302   :  { %v4377_v47 = vcombine.high %v4375_v44, %v4375_v44  ;;  %v4724_v48 = vcombine.low %v4375_v44, %v4376_v45  ;;  %v4731_v18 = vrot.slane %v4723_v55, %v9725_v50 }
0x1303   :  { %v4638_v49 = vrot.slane %v4631_v1, %v9725_v50  ;;  %4532 = vrot.lane.b32.xlu1 %v10359_v6, %s9421_s2 }
0x1304   :  { %v4738_v53 = vrot.slane %v4724_v48, %v9725_v50  ;;  %v4745_v54 = vrot.slane %v4377_v47, %v9725_v50 }
0x1305   :  { %v10368_v56 = vcombine.low %v4638_v49, %v4645_v52 }
0x1306   :  { %v4746_v43 = vcombine.low %v4731_v18, %v4738_v53  ;;  %v4760_v59 = vrot.slane %v4745_v54, %v9725_v50 }
0x1307   :  { %4647 = vrot.lane.b32.xlu1 %v10368_v56, %s9421_s2 }
0x1308   :  { %v4753_v58 = vrot.slane %v4746_v43, %v9725_v50 }
0x130a   :  { %v10374_v2 = vcombine.low %v4753_v58, %v4760_v59 }
0x130c   :  { %4762 = vrot.lane.b32.xlu1 %v10374_v2, %s9421_s2  ;;  %s10971_s2 = smov 40  }
0x133e   :  { %v4418_v61 = vpop.permute.xlu0 %4417 }
0x133f   :  { %8903 = vmatpush3.xpose.msk.msra.mxu1 %vm576_vm3, %v4418_v61 }
0x1340   :  { %8912 = vmatprep.subr.mxu1 %v9419_v4 }
0x1342   :  { %8905 = vmatmul.mubr.msk.f32.vlgmr.msra.gmra.mrb[52].mxu1 %vm576_vm3, %v10337_v63 }
0x1343   :  { %8914 = vmatprep.mubr.msk.f32.mxu1 %vm9418_vm2, %v9419_v4 }
0x1375   :  { %v4533_v62 = vpop.permute.xlu1 %4532 }
0x1376   :  { %8908 = vmatpush3.xpose.msk.msra.mxu0 %vm576_vm3, %v4533_v62 }
0x1377   :  { %8917 = vmatprep.subr.mxu0 %v9419_v4 }
0x1379   :  { %8910 = vmatmul.mubr.msk.f32.vlgmr.msra.gmra.mrb[48].mxu0 %vm576_vm3, %v10359_v6  ;;  %v4648_v3 = vpop.permute.xlu1 %4647 }
0x137a   :  { %8913 = vmatpush3.xpose.msk.msra.mxu1 %vm576_vm3, %v4648_v3  ;;  %8919 = vmatprep.mubr.msk.f32.mxu0 %vm9418_vm2, %v9419_v4 }
0x137b   :  { %8922 = vmatprep.subr.mxu1 %v9419_v4 }
0x137d   :  { %8915 = vmatmul.mubr.msk.f32.vlgmr.msra.gmra.mrb[54].mxu1 %vm576_vm3, %v10368_v56 }
0x137e   :  { %v4763_v5 = vpop.permute.xlu1 %4762  ;;  %8924 = vmatprep.mubr.msk.f32.mxu1 %vm9418_vm2, %v9419_v4 }
0x137f   :  { %8918 = vmatpush3.xpose.msk.msra.mxu0 %vm576_vm3, %v4763_v5 }
0x1380   :  { %8927 = vmatprep.subr.mxu0 %v9419_v4 }
0x1382   :  { %8920 = vmatmul.mubr.msk.f32.vlgmr.msra.gmra.mrb[50].mxu0 %vm576_vm3, %v10374_v2 }
0x1383   :  { %8929 = vmatprep.mubr.msk.f32.mxu0 %vm9418_vm2, %v9419_v4 }
0x1415   :  { %v4489_v8 = vpop.f32.mrb[52].mxu1 }
0x1416   :  { %v8906_v42 = vpop.f32.mrb[53].mxu1  ;;  %v4838_v7 = vsel %vm996_vm4, %v4489_v8, -inf }
0x1417   :  { %4839 = vmax.xlane.f32.xlu0 %v4838_v7 }
0x144c   :  { %v4604_v10 = vpop.f32.mrb[48].mxu0 }
0x144d   :  { %v8911_v9 = vpop.f32.mrb[49].mxu0  ;;  %v4841_v11 = vsel %vm996_vm4, %v4604_v10, -inf }
0x144e   :  { %4842 = vmax.xlane.f32.xlu1 %v4841_v11 }
0x1450   :  { %v4719_v51 = vpop.f32.mrb[54].mxu1 }
0x1451   :  { %v8916_v12 = vpop.f32.mrb[55].mxu1  ;;  %v4844_v13 = vsel %vm996_vm4, %v4719_v51, -inf }
0x1452   :  { %4845 = vmax.xlane.f32.xlu0 %v4844_v13 }
0x1455   :  { %v4834_v15 = vpop.f32.mrb[50].mxu0 }
0x1456   :  { %v8921_v17 = vpop.f32.mrb[51].mxu0  ;;  %v4847_v19 = vsel %vm996_vm4, %v4834_v15, -inf }
0x1457   :  { %4848 = vmax.xlane.f32.xlu0 %v4847_v19 }
0x145f   :  { %4959 = vrot.lane.b32.xlu1 %v10359_v6, %s9422_s24 }
0x1463   :  { %5036 = vrot.lane.b32.xlu1 %v10368_v56, %s9422_s24 }
0x1467   :  { %5113 = vrot.lane.b32.xlu1 %v10374_v2, %s9422_s24 }
0x146b   :  { %5270 = vrot.lane.b32.xlu1 %v10359_v6, %s9423_s25 }
0x146d   :  { %4882 = vrot.lane.b32.xlu0 %v10337_v63, %s9422_s24  ;;  %s10972_s24 = smov 8  }
0x1471   :  { %5192 = vrot.lane.b32.xlu0 %v10337_v63, %s9423_s25 }
0x14a4   :  { %v4840_v21 = vpop.xlane.xlu0 %4839 }
0x14a5   :  { %v4850_v57 = vsub.f32 %v4489_v8, %v4840_v21 }
0x14a7   :  { %v4854_v22 = vmul.f32 1.442695, %v4850_v57 }
0x14a9   :  { %9335 = vpow2.f32 %v4854_v22 }
0x14b3   :  { %v9336_v23 = vpop.eup %9335 }
0x14b4   :  { %v4862_v24 = vsel %vm996_vm4, %v9336_v23, 0.0 }
0x14b5   :  { %4863 = vadd.xlane.f32.xlu0 %v4862_v24 }
0x14db   :  { %v4843_v25 = vpop.xlane.xlu1 %4842 }
0x14dc   :  { %v4851_v26 = vsub.f32 %v4604_v10, %v4843_v25 }
0x14de   :  { %v4856_v27 = vmul.f32 1.442695, %v4851_v26 }
0x14df   :  { %v4960_v28 = vpop.permute.xlu1 %4959  ;;  %v4846_v30 = vpop.xlane.xlu0 %4845 }
0x14e0   :  { %9337 = vpow2.f32 %v4856_v27  ;;  %v4852_v33 = vsub.f32 %v4719_v51, %v4846_v30  ;;  %8928 = vmatpush3.msk.msra.mxu0 %vm1047_vm5, %v4960_v28 }
0x14e1   :  { %8937 = vmatprep.subr.mxu0 %v9419_v4 }
0x14e2   :  { %v4858_v20 = vmul.f32 1.442695, %v4852_v33 }
0x14e3   :  { %v5037_v1 = vpop.permute.xlu1 %5036 }
0x14e4   :  { %9339 = vpow2.f32 %v4858_v20  ;;  %v4849_v34 = vpop.xlane.xlu0 %4848 }
0x14e5   :  { %v4853_v38 = vsub.f32 %v4834_v15, %v4849_v34 }
0x14e7   :  { %v4860_v39 = vmul.f32 1.442695, %v4853_v38  ;;  %v5114_v47 = vpop.permute.xlu1 %5113 }
0x14e8   :  { %v4883_v14 = vpop.permute.xlu0 %4882 }
0x14e9   :  { %8923 = vmatpush3.msk.msra.mxu1 %vm1047_vm5, %v4883_v14  ;;  %9341 = vpow2.f32 %v4860_v39 }
0x14ea   :  { %v9338_v35 = vpop.eup %9337  ;;  %8932 = vmatprep.subr.mxu1 %v9419_v4 }
0x14eb   :  { %v4865_v36 = vsel %vm996_vm4, %v9338_v35, 0.0  ;;  %v5271_v48 = vpop.permute.xlu1 %5270 }
0x14ec   :  { %4866 = vadd.xlane.f32.xlu1 %v4865_v36  ;;  %v5193_v16 = vpop.permute.xlu0 %5192 }
0x14ee   :  { %v9340_v37 = vpop.eup %9339 }
0x14ef   :  { %v4868_v29 = vsel %vm996_vm4, %v9340_v37, 0.0 }
0x14f0   :  { %4869 = vadd.xlane.f32.xlu0 %v4868_v29 }
0x14f3   :  { %v9342_v31 = vpop.eup %9341 }
0x14f4   :  { %v4871_v41 = vsel %vm996_vm4, %v9342_v31, 0.0 }
0x14fd   :  { %5268 = vrot.lane.b32.xlu1 %v10359_v6, %s9424_s27 }
0x1506   :  { %5190 = vrot.lane.b32.xlu0 %v10337_v63, %s9424_s27 }
0x150a   :  { %5348 = vrot.lane.b32.xlu0 %v10368_v56, %s9423_s25 }
0x150e   :  { %5346 = vrot.lane.b32.xlu0 %v10368_v56, %s9424_s27 }
0x1521   :  { %4872 = vadd.xlane.f32.xlu1 %v4871_v41 }
0x1532   :  { %5426 = vrot.lane.b32.xlu1 %v10374_v2, %s9423_s25  ;;  %s10973_s25 = smov 16  }
0x1536   :  { %5424 = vrot.lane.b32.xlu1 %v10374_v2, %s9424_s27 }
0x1542   :  { %v4864_v44 = vpop.xlane.xlu0 %4863 }
0x1543   :  { %9343 = vrcp.f32 %v4864_v44 }
0x154d   :  { %v9344_v45 = vpop.eup %9343 }
0x154e   :  { %v4878_v55 = vmul.f32 %v9344_v45, %v9336_v23 }
0x1550   :  { %8925 = vmatmul.mubr.msk.f32.vlgmr.msra.gmra.mrb[56].mxu1 %vm1043_vm6, %v4878_v55 }
0x1551   :  { %8933 = vmatpush3.msk.msra.mxu1 %vm1047_vm5, %v5037_v1  ;;  %8934 = vmatprep.mubr.msk.f32.mxu1 %vm9418_vm2, %v9419_v4 }
0x1552   :  { %8942 = vmatprep.subr.mxu1 %v9419_v4 }
0x1579   :  { %v4867_v49 = vpop.xlane.xlu1 %4866 }
0x157a   :  { %9345 = vrcp.f32 %v4867_v49 }
0x157d   :  { %v4870_v52 = vpop.xlane.xlu0 %4869  ;;  %v5269_v62 = vpop.permute.xlu1 %5268 }
0x157e   :  { %9347 = vrcp.f32 %v4870_v52 }
0x1581   :  { %v5191_v54 = vpop.permute.xlu0 %5190 }
0x1584   :  { %v9346_v18 = vpop.eup %9345 }
0x1585   :  { %v4879_v53 = vmul.f32 %v9346_v18, %v9338_v35  ;;  %v5349_v59 = vpop.permute.xlu0 %5348 }
0x1587   :  { %8930 = vmatmul.mubr.msk.f32.vlgmr.msra.gmra.mrb[52].mxu0 %vm1043_vm6, %v4879_v53 }
0x1588   :  { %v9348_v43 = vpop.eup %9347  ;;  %8938 = vmatpush3.msk.msra.mxu0 %vm1047_vm5, %v5114_v47  ;;  %8939 = vmatprep.mubr.msk.f32.mxu0 %vm9418_vm2, %v9419_v4 }
0x1589   :  { %v4880_v58 = vmul.f32 %v9348_v43, %v9340_v37  ;;  %8947 = vmatprep.subr.mxu0 %v9419_v4  ;;  %v5347_v61 = vpop.permute.xlu0 %5346 }
0x158b   :  { %8935 = vmatmul.mubr.msk.f32.vlgmr.msra.gmra.mrb[58].mxu1 %vm1043_vm6, %v4880_v58 }
0x158c   :  { %8943 = vmatpush3.xpose.msk.msra.mxu1 %vm576_vm3, %v5193_v16  ;;  %8944 = vmatprep.mubr.msk.f32.mxu1 %vm9418_vm2, %v9419_v4 }
0x158d   :  { %8952 = vmatprep.subr.mxu1 %v9419_v4 }
0x158f   :  { %8945 = vmatmul.mubr.msk.f32.vlgmr.msra.gmra.mrb[60].mxu1 %vm576_vm3, %v5191_v54 }
0x1590   :  { %8953 = vmatpush3.xpose.msk.msra.mxu1 %vm576_vm3, %v5349_v59  ;;  %8954 = vmatprep.mubr.msk.f32.mxu1 %vm9418_vm2, %v9419_v4 }
0x1591   :  { %8962 = vmatprep.subr.mxu1 %v9419_v4 }
0x1593   :  { %8955 = vmatmul.mubr.msk.f32.vlgmr.msra.gmra.mrb[62].mxu1 %vm576_vm3, %v5347_v61 }
0x1594   :  { %8964 = vmatprep.mubr.msk.f32.mxu1 %vm9418_vm2, %v9419_v4 }
0x15ae   :  { %v4873_v3 = vpop.xlane.xlu1 %4872 }
0x15af   :  { %9349 = vrcp.f32 %v4873_v3 }
0x15b2   :  { %v5427_v42 = vpop.permute.xlu1 %5426 }
0x15b6   :  { %v5425_v7 = vpop.permute.xlu1 %5424 }
0x15b9   :  { %v9350_v5 = vpop.eup %9349 }
0x15ba   :  { %v4881_v8 = vmul.f32 %v9350_v5, %v9342_v31 }
0x15bc   :  { %8940 = vmatmul.mubr.msk.f32.vlgmr.msra.gmra.mrb[54].mxu0 %vm1043_vm6, %v4881_v8 }
0x15bd   :  { %8948 = vmatpush3.xpose.msk.msra.mxu0 %vm576_vm3, %v5271_v48  ;;  %8949 = vmatprep.mubr.msk.f32.mxu0 %vm9418_vm2, %v9419_v4 }
0x15be   :  { %8957 = vmatprep.subr.mxu0 %v9419_v4 }
0x15c0   :  { %8950 = vmatmul.mubr.msk.f32.vlgmr.msra.gmra.mrb[56].mxu0 %vm576_vm3, %v5269_v62 }
0x15c1   :  { %8958 = vmatpush3.xpose.msk.msra.mxu0 %vm576_vm3, %v5427_v42  ;;  %8959 = vmatprep.mubr.msk.f32.mxu0 %vm9418_vm2, %v9419_v4 }
0x15c2   :  { %8967 = vmatprep.subr.mxu0 %v9419_v4 }
0x15c4   :  { %8960 = vmatmul.mubr.msk.f32.vlgmr.msra.gmra.mrb[58].mxu0 %vm576_vm3, %v5425_v7 }
0x15c5   :  { %8969 = vmatprep.mubr.msk.f32.mxu0 %vm9418_vm2, %v9419_v4 }
0x1623   :  { %v10474_v10 = vpop.f32.mrb[56].mxu1 }
0x1624   :  { %v8926_v9 = vpop.f32.mrb[57].mxu1 }
0x165a   :  { %v10476_v11 = vpop.f32.mrb[52].mxu0 }
0x165b   :  { %v8931_v51 = vpop.f32.mrb[53].mxu0 }
0x165e   :  { %v10478_v12 = vpop.f32.mrb[58].mxu1 }
0x165f   :  { %v8936_v13 = vpop.f32.mrb[59].mxu1 }
0x1662   :  { %v5264_v15 = vpop.f32.mrb[60].mxu1 }
0x1663   :  { %v8946_v17 = vpop.f32.mrb[61].mxu1  ;;  %v5502_v19 = vsel %vm996_vm4, %v5264_v15, -inf }
0x1664   :  { %5503 = vmax.xlane.f32.xlu0 %v5502_v19 }
0x1666   :  { %v5420_v21 = vpop.f32.mrb[62].mxu1 }
0x1667   :  { %v8956_v57 = vpop.f32.mrb[63].mxu1  ;;  %v5508_v22 = vsel %vm996_vm4, %v5420_v21, -inf }
0x1668   :  { %5509 = vmax.xlane.f32.xlu0 %v5508_v22 }
0x168f   :  { %v10482_v23 = vpop.f32.mrb[54].mxu0 }
0x1690   :  { %v8941_v24 = vpop.f32.mrb[55].mxu0 }
0x1693   :  { %v5342_v25 = vpop.f32.mrb[56].mxu0 }
0x1694   :  { %v8951_v26 = vpop.f32.mrb[57].mxu0  ;;  %v5505_v27 = vsel %vm996_vm4, %v5342_v25, -inf }
0x1695   :  { %5506 = vmax.xlane.f32.xlu1 %v5505_v27 }
0x1697   :  { %v5498_v28 = vpop.f32.mrb[58].mxu0 }
0x1698   :  { %v8961_v30 = vpop.f32.mrb[59].mxu0  ;;  %v5511_v33 = vsel %vm996_vm4, %v5498_v28, -inf }
0x1699   :  { %5512 = vmax.xlane.f32.xlu0 %v5511_v33 }
0x16a6   :  { %5623 = vrot.lane.b32.xlu1 %v10359_v6, %s9425_s3 }
0x16aa   :  { %5700 = vrot.lane.b32.xlu1 %v10368_v56, %s9425_s3 }
0x16ae   :  { %5777 = vrot.lane.b32.xlu1 %v10374_v2, %s9425_s3 }
0x16af   :  { %5546 = vrot.lane.b32.xlu0 %v10337_v63, %s9425_s3 }
0x16b2   :  { %5934 = vrot.lane.b32.xlu1 %v10359_v6, %s9426_s4 }
0x16b3   :  { %5856 = vrot.lane.b32.xlu0 %v10337_v63, %s9426_s4 }
0x16f1   :  { %v5504_v20 = vpop.xlane.xlu0 %5503 }
0x16f2   :  { %v5514_v34 = vsub.f32 %v5264_v15, %v5504_v20 }
0x16f4   :  { %v5518_v14 = vmul.f32 1.442695, %v5514_v34 }
0x16f5   :  { %v5510_v35 = vpop.xlane.xlu0 %5509 }
0x16f6   :  { %9351 = vpow2.f32 %v5518_v14  ;;  %v5516_v36 = vsub.f32 %v5420_v21, %v5510_v35 }
0x16f8   :  { %v5522_v37 = vmul.f32 1.442695, %v5516_v36 }
0x16fa   :  { %9353 = vpow2.f32 %v5522_v37 }
0x1700   :  { %v9352_v29 = vpop.eup %9351 }
0x1701   :  { %v5526_v38 = vsel %vm996_vm4, %v9352_v29, 0.0 }
0x1702   :  { %5527 = vadd.xlane.f32.xlu0 %v5526_v38 }
0x1704   :  { %v9354_v39 = vpop.eup %9353 }
0x1705   :  { %v5532_v31 = vsel %vm996_vm4, %v9354_v39, 0.0 }
0x1706   :  { %5533 = vadd.xlane.f32.xlu0 %v5532_v31 }
0x171c   :  { %5854 = vrot.lane.b32.xlu0 %v10337_v63, %s9427_s28 }
0x1720   :  { %6012 = vrot.lane.b32.xlu0 %v10368_v56, %s9426_s4 }
0x1722   :  { %v5507_v41 = vpop.xlane.xlu1 %5506 }
0x1723   :  { %v5515_v16 = vsub.f32 %v5342_v25, %v5507_v41 }
0x1724   :  { %6010 = vrot.lane.b32.xlu0 %v10368_v56, %s9427_s28 }
0x1725   :  { %v5520_v44 = vmul.f32 1.442695, %v5515_v16 }
0x1726   :  { %v5624_v45 = vpop.permute.xlu1 %5623  ;;  %v5513_v55 = vpop.xlane.xlu0 %5512 }
0x1727   :  { %9355 = vpow2.f32 %v5520_v44  ;;  %8968 = vmatpush3.msk.msra.mxu0 %vm1047_vm5, %v5624_v45  ;;  %v5517_v49 = vsub.f32 %v5498_v28, %v5513_v55 }
0x1728   :  { %8977 = vmatprep.subr.mxu0 %v9419_v4 }
0x1729   :  { %v5524_v52 = vmul.f32 1.442695, %v5517_v49 }
0x172a   :  { %v5547_v1 = vpop.permute.xlu0 %5546  ;;  %v5701_v62 = vpop.permute.xlu1 %5700 }
0x172b   :  { %8963 = vmatpush3.msk.msra.mxu1 %vm1047_vm5, %v5547_v1  ;;  %9357 = vpow2.f32 %v5524_v52 }
0x172c   :  { %8972 = vmatprep.subr.mxu1 %v9419_v4 }
0x172e   :  { %v5857_v54 = vpop.permute.xlu0 %5856  ;;  %v5778_v9 = vpop.permute.xlu1 %5777 }
0x1731   :  { %v9356_v47 = vpop.eup %9355 }
0x1732   :  { %v5529_v48 = vsel %vm996_vm4, %v9356_v47, 0.0  ;;  %v5935_v51 = vpop.permute.xlu1 %5934 }
0x1733   :  { %5530 = vadd.xlane.f32.xlu1 %v5529_v48 }
0x1735   :  { %v9358_v18 = vpop.eup %9357 }
0x1736   :  { %v5535_v53 = vsel %vm996_vm4, %v9358_v18, 0.0 }
0x1744   :  { %5932 = vrot.lane.b32.xlu1 %v10359_v6, %s9427_s28 }
0x1768   :  { %5536 = vadd.xlane.f32.xlu1 %v5535_v53 }
0x1779   :  { %6090 = vrot.lane.b32.xlu1 %v10374_v2, %s9426_s4 }
0x177d   :  { %6088 = vrot.lane.b32.xlu1 %v10374_v2, %s9427_s28 }
0x178f   :  { %v5528_v43 = vpop.xlane.xlu0 %5527 }
0x1790   :  { %9359 = vrcp.f32 %v5528_v43 }
0x1793   :  { %v5534_v58 = vpop.xlane.xlu0 %5533 }
0x1794   :  { %9361 = vrcp.f32 %v5534_v58 }
0x1797   :  { %v5855_v8 = vpop.permute.xlu0 %5854 }
0x179a   :  { %v9360_v59 = vpop.eup %9359 }
0x179b   :  { %v5542_v61 = vmul.f32 %v9360_v59, %v9352_v29  ;;  %v6013_v42 = vpop.permute.xlu0 %6012 }
0x179d   :  { %8965 = vmatmul.mubr.msk.f32.vlgmr.msra.gmra.mrb[64].mxu1 %vm1043_vm6, %v5542_v61 }
0x179e   :  { %v9362_v3 = vpop.eup %9361  ;;  %8973 = vmatpush3.msk.msra.mxu1 %vm1047_vm5, %v5701_v62  ;;  %8974 = vmatprep.mubr.msk.f32.mxu1 %vm9418_vm2, %v9419_v4 }
0x179f   :  { %v5544_v5 = vmul.f32 %v9362_v3, %v9354_v39  ;;  %8982 = vmatprep.subr.mxu1 %v9419_v4  ;;  %v6011_v7 = vpop.permute.xlu0 %6010 }
0x17a1   :  { %8975 = vmatmul.mubr.msk.f32.vlgmr.msra.gmra.mrb[66].mxu1 %vm1043_vm6, %v5544_v5 }
0x17a2   :  { %8984 = vmatprep.mubr.msk.f32.mxu1 %vm9418_vm2, %v9419_v4 }
0x17a5   :  { %8983 = vmatpush3.xpose.msk.msra.mxu1 %vm576_vm3, %v5857_v54 }
0x17a6   :  { %8992 = vmatprep.subr.mxu1 %v9419_v4 }
0x17a8   :  { %8985 = vmatmul.mubr.msk.f32.vlgmr.msra.gmra.mrb[68].mxu1 %vm576_vm3, %v5855_v8 }
0x17a9   :  { %8993 = vmatpush3.xpose.msk.msra.mxu1 %vm576_vm3, %v6013_v42  ;;  %8994 = vmatprep.mubr.msk.f32.mxu1 %vm9418_vm2, %v9419_v4 }
0x17aa   :  { %9002 = vmatprep.subr.mxu1 %v9419_v4 }
0x17ac   :  { %8995 = vmatmul.mubr.msk.f32.vlgmr.msra.gmra.mrb[70].mxu1 %vm576_vm3, %v6011_v7 }
0x17ad   :  { %9004 = vmatprep.mubr.msk.f32.mxu1 %vm9418_vm2, %v9419_v4 }
0x17c0   :  { %v5531_v13 = vpop.xlane.xlu1 %5530 }
0x17c1   :  { %9363 = vrcp.f32 %v5531_v13 }
0x17c4   :  { %v5933_v19 = vpop.permute.xlu1 %5932 }
0x17cb   :  { %v9364_v15 = vpop.eup %9363 }
0x17cc   :  { %v5543_v17 = vmul.f32 %v9364_v15, %v9356_v47 }
0x17ce   :  { %8970 = vmatmul.mubr.msk.f32.vlgmr.msra.gmra.mrb[60].mxu0 %vm1043_vm6, %v5543_v17 }
0x17cf   :  { %8978 = vmatpush3.msk.msra.mxu0 %vm1047_vm5, %v5778_v9  ;;  %8979 = vmatprep.mubr.msk.f32.mxu0 %vm9418_vm2, %v9419_v4 }
0x17d0   :  { %8987 = vmatprep.subr.mxu0 %v9419_v4 }
0x17f5   :  { %v5537_v21 = vpop.xlane.xlu1 %5536 }
0x17f6   :  { %9365 = vrcp.f32 %v5537_v21 }
0x17f9   :  { %v6091_v24 = vpop.permute.xlu1 %6090 }
0x17fd   :  { %v6089_v25 = vpop.permute.xlu1 %6088 }
0x1800   :  { %v9366_v57 = vpop.eup %9365 }
0x1801   :  { %v5545_v22 = vmul.f32 %v9366_v57, %v9358_v18 }
0x1803   :  { %8980 = vmatmul.mubr.msk.f32.vlgmr.msra.gmra.mrb[62].mxu0 %vm1043_vm6, %v5545_v22 }
0x1804   :  { %8988 = vmatpush3.xpose.msk.msra.mxu0 %vm576_vm3, %v5935_v51  ;;  %8989 = vmatprep.mubr.msk.f32.mxu0 %vm9418_vm2, %v9419_v4 }
0x1805   :  { %8997 = vmatprep.subr.mxu0 %v9419_v4 }
0x1807   :  { %8990 = vmatmul.mubr.msk.f32.vlgmr.msra.gmra.mrb[64].mxu0 %vm576_vm3, %v5933_v19 }
0x1808   :  { %8998 = vmatpush3.xpose.msk.msra.mxu0 %vm576_vm3, %v6091_v24  ;;  %8999 = vmatprep.mubr.msk.f32.mxu0 %vm9418_vm2, %v9419_v4 }
0x1809   :  { %9007 = vmatprep.subr.mxu0 %v9419_v4 }
0x180b   :  { %9000 = vmatmul.mubr.msk.f32.vlgmr.msra.gmra.mrb[66].mxu0 %vm576_vm3, %v6089_v25 }
0x180c   :  { %9009 = vmatprep.mubr.msk.f32.mxu0 %vm9418_vm2, %v9419_v4 }
0x1870   :  { %v10554_v26 = vpop.f32.mrb[64].mxu1 }
0x1871   :  { %v8966_v27 = vpop.f32.mrb[65].mxu1 }
0x1874   :  { %v10556_v28 = vpop.f32.mrb[66].mxu1 }
0x1875   :  { %v8976_v30 = vpop.f32.mrb[67].mxu1 }
0x187b   :  { %v5928_v33 = vpop.f32.mrb[68].mxu1 }
0x187c   :  { %v8986_v20 = vpop.f32.mrb[69].mxu1  ;;  %v6166_v34 = vsel %vm996_vm4, %v5928_v33, -inf }
0x187d   :  { %6167 = vmax.xlane.f32.xlu0 %v6166_v34 }
0x187f   :  { %v6084_v14 = vpop.f32.mrb[70].mxu1 }
0x1880   :  { %v8996_v35 = vpop.f32.mrb[71].mxu1  ;;  %v6172_v29 = vsel %vm996_vm4, %v6084_v14, -inf }
0x1893   :  { %6210 = vrot.lane.b32.xlu0 %v10337_v63, %s9428_s29 }
0x18a1   :  { %v10561_v36 = vpop.f32.mrb[60].mxu0 }
0x18a2   :  { %v8971_v37 = vpop.f32.mrb[61].mxu0 }
0x18b2   :  { %6173 = vmax.xlane.f32.xlu0 %v6172_v29 }
0x18d6   :  { %v10564_v38 = vpop.f32.mrb[62].mxu0 }
0x18d7   :  { %v8981_v39 = vpop.f32.mrb[63].mxu0 }
0x18da   :  { %v6006_v31 = vpop.f32.mrb[64].mxu0 }
0x18db   :  { %v8991_v41 = vpop.f32.mrb[65].mxu0  ;;  %v6169_v16 = vsel %vm996_vm4, %v6006_v31, -inf }
0x18dc   :  { %6170 = vmax.xlane.f32.xlu1 %v6169_v16 }
0x18de   :  { %v6162_v44 = vpop.f32.mrb[66].mxu0 }
0x18df   :  { %v9001_v45 = vpop.f32.mrb[67].mxu0  ;;  %v6175_v55 = vsel %vm996_vm4, %v6162_v44, -inf }
0x18e0   :  { %6176 = vmax.xlane.f32.xlu0 %v6175_v55 }
0x18ed   :  { %6287 = vrot.lane.b32.xlu1 %v10359_v6, %s9428_s29 }
0x18f1   :  { %6364 = vrot.lane.b32.xlu1 %v10368_v56, %s9428_s29 }
0x18f5   :  { %6441 = vrot.lane.b32.xlu1 %v10374_v2, %s9428_s29 }
0x18f6   :  { %6520 = vrot.lane.b32.xlu0 %v10337_v63, %s9429_s1 }
0x18f9   :  { %6598 = vrot.lane.b32.xlu1 %v10359_v6, %s9429_s1 }
0x18fd   :  { %6596 = vrot.lane.b32.xlu1 %v10359_v6, %s10970_s8 }
0x190a   :  { %v6168_v1 = vpop.xlane.xlu0 %6167 }
0x190b   :  { %v6178_v47 = vsub.f32 %v5928_v33, %v6168_v1 }
0x190d   :  { %v6182_v48 = vmul.f32 1.442695, %v6178_v47 }
0x190e   :  { %v6211_v49 = vpop.permute.xlu0 %6210 }
0x190f   :  { %9367 = vpow2.f32 %v6182_v48  ;;  %9003 = vmatpush3.msk.msra.mxu1 %vm1047_vm5, %v6211_v49 }
0x1910   :  { %9012 = vmatprep.subr.mxu1 %v9419_v4 }
0x1919   :  { %v9368_v52 = vpop.eup %9367 }
0x191a   :  { %v6190_v18 = vsel %vm996_vm4, %v9368_v52, 0.0 }
0x191b   :  { %6191 = vadd.xlane.f32.xlu0 %v6190_v18 }
0x1931   :  { %6518 = vrot.lane.b32.xlu0 %v10337_v63, %s10970_s8 }
0x193f   :  { %v6174_v53 = vpop.xlane.xlu0 %6173 }
0x1940   :  { %v6180_v54 = vsub.f32 %v6084_v14, %v6174_v53 }
0x1942   :  { %v6186_v43 = vmul.f32 1.442695, %v6180_v54 }
0x1944   :  { %9369 = vpow2.f32 %v6186_v43 }
0x194e   :  { %v9370_v58 = vpop.eup %9369 }
0x194f   :  { %v6196_v59 = vsel %vm996_vm4, %v9370_v58, 0.0 }
0x1950   :  { %6197 = vadd.xlane.f32.xlu0 %v6196_v59 }
0x1966   :  { %6676 = vrot.lane.b32.xlu0 %v10368_v56, %s9429_s1 }
0x1969   :  { %v6171_v61 = vpop.xlane.xlu1 %6170 }
0x196a   :  { %v6179_v62 = vsub.f32 %v6006_v31, %v6171_v61  ;;  %6674 = vrot.lane.b32.xlu0 %v10368_v56, %s10970_s8 }
0x196c   :  { %v6184_v3 = vmul.f32 1.442695, %v6179_v62 }
0x196d   :  { %v6288_v5 = vpop.permute.xlu1 %6287  ;;  %v6177_v8 = vpop.xlane.xlu0 %6176 }
0x196e   :  { %9371 = vpow2.f32 %v6184_v3  ;;  %v6181_v42 = vsub.f32 %v6162_v44, %v6177_v8  ;;  %9008 = vmatpush3.msk.msra.mxu0 %vm1047_vm5, %v6288_v5 }
0x196f   :  { %9017 = vmatprep.subr.mxu0 %v9419_v4 }
0x1970   :  { %v6188_v7 = vmul.f32 1.442695, %v6181_v42 }
0x1971   :  { %v6521_v17 = vpop.permute.xlu0 %6520  ;;  %v6365_v22 = vpop.permute.xlu1 %6364 }
0x1972   :  { %9373 = vpow2.f32 %v6188_v7 }
0x1975   :  { %v6442_v34 = vpop.permute.xlu1 %6441 }
0x1978   :  { %v9372_v9 = vpop.eup %9371 }
0x1979   :  { %v6193_v51 = vsel %vm996_vm4, %v9372_v9, 0.0  ;;  %v6599_v14 = vpop.permute.xlu1 %6598 }
0x197a   :  { %6194 = vadd.xlane.f32.xlu1 %v6193_v51 }
0x197c   :  { %v9374_v13 = vpop.eup %9373 }
0x197d   :  { %v6199_v15 = vsel %vm996_vm4, %v9374_v13, 0.0  ;;  %v6597_v35 = vpop.permute.xlu1 %6596 }
0x197e   :  { %6200 = vadd.xlane.f32.xlu1 %v6199_v15 }
0x198f   :  { %6754 = vrot.lane.b32.xlu1 %v10374_v2, %s9429_s1 }
0x1993   :  { %6752 = vrot.lane.b32.xlu1 %v10374_v2, %s10970_s8 }
0x19a8   :  { %v6192_v19 = vpop.xlane.xlu0 %6191 }
0x19a9   :  { %9375 = vrcp.f32 %v6192_v19 }
0x19ac   :  { %v6519_v24 = vpop.permute.xlu0 %6518 }
0x19b3   :  { %v9376_v21 = vpop.eup %9375 }
0x19b4   :  { %v6206_v57 = vmul.f32 %v9376_v21, %v9368_v52 }
0x19b6   :  { %9005 = vmatmul.mubr.msk.f32.vlgmr.msra.gmra.mrb[72].mxu1 %vm1043_vm6, %v6206_v57 }
0x19b7   :  { %9013 = vmatpush3.msk.msra.mxu1 %vm1047_vm5, %v6365_v22  ;;  %9014 = vmatprep.mubr.msk.f32.mxu1 %vm9418_vm2, %v9419_v4 }
0x19b8   :  { %9022 = vmatprep.subr.mxu1 %v9419_v4 }
0x19dd   :  { %v6198_v25 = vpop.xlane.xlu0 %6197 }
0x19de   :  { %9377 = vrcp.f32 %v6198_v25 }
0x19e1   :  { %v6677_v33 = vpop.permute.xlu0 %6676 }
0x19e5   :  { %v6675_v20 = vpop.permute.xlu0 %6674 }
0x19e8   :  { %v9378_v27 = vpop.eup %9377 }
0x19e9   :  { %v6208_v30 = vmul.f32 %v9378_v27, %v9370_v58 }
0x19eb   :  { %9015 = vmatmul.mubr.msk.f32.vlgmr.msra.gmra.mrb[74].mxu1 %vm1043_vm6, %v6208_v30 }
0x19ec   :  { %9023 = vmatpush3.xpose.msk.msra.mxu1 %vm576_vm3, %v6521_v17  ;;  %9024 = vmatprep.mubr.msk.f32.mxu1 %vm9418_vm2, %v9419_v4 }
0x19ed   :  { %9032 = vmatprep.subr.mxu1 %v9419_v4 }
0x19ef   :  { %9025 = vmatmul.mubr.msk.f32.vlgmr.msra.gmra.mrb[76].mxu1 %vm576_vm3, %v6519_v24 }
0x19f0   :  { %9033 = vmatpush3.xpose.msk.msra.mxu1 %vm576_vm3, %v6677_v33  ;;  %9034 = vmatprep.mubr.msk.f32.mxu1 %vm9418_vm2, %v9419_v4 }
0x19f1   :  { %9042 = vmatprep.subr.mxu1 %v9419_v4 }
0x19f3   :  { %9035 = vmatmul.mubr.msk.f32.vlgmr.msra.gmra.mrb[78].mxu1 %vm576_vm3, %v6675_v20 }
0x19f4   :  { %9044 = vmatprep.mubr.msk.f32.mxu1 %vm9418_vm2, %v9419_v4 }
0x1a07   :  { %v6195_v37 = vpop.xlane.xlu1 %6194 }
0x1a08   :  { %9379 = vrcp.f32 %v6195_v37 }
0x1a0b   :  { %v6201_v29 = vpop.xlane.xlu1 %6200 }
0x1a0c   :  { %9381 = vrcp.f32 %v6201_v29 }
0x1a0f   :  { %v6755_v44 = vpop.permute.xlu1 %6754 }
0x1a12   :  { %v9380_v39 = vpop.eup %9379 }
0x1a13   :  { %v6207_v31 = vmul.f32 %v9380_v39, %v9372_v9  ;;  %v6753_v45 = vpop.permute.xlu1 %6752 }
0x1a15   :  { %9010 = vmatmul.mubr.msk.f32.vlgmr.msra.gmra.mrb[68].mxu0 %vm1043_vm6, %v6207_v31 }
0x1a16   :  { %v9382_v41 = vpop.eup %9381  ;;  %9018 = vmatpush3.msk.msra.mxu0 %vm1047_vm5, %v6442_v34  ;;  %9019 = vmatprep.mubr.msk.f32.mxu0 %vm9418_vm2, %v9419_v4 }
0x1a17   :  { %v6209_v16 = vmul.f32 %v9382_v41, %v9374_v13  ;;  %9027 = vmatprep.subr.mxu0 %v9419_v4 }
0x1a19   :  { %9020 = vmatmul.mubr.msk.f32.vlgmr.msra.gmra.mrb[70].mxu0 %vm1043_vm6, %v6209_v16 }
0x1a1a   :  { %9029 = vmatprep.mubr.msk.f32.mxu0 %vm9418_vm2, %v9419_v4 }
0x1a1d   :  { %9028 = vmatpush3.xpose.msk.msra.mxu0 %vm576_vm3, %v6599_v14 }
0x1a1e   :  { %9037 = vmatprep.subr.mxu0 %v9419_v4 }
0x1a20   :  { %9030 = vmatmul.mubr.msk.f32.vlgmr.msra.gmra.mrb[72].mxu0 %vm576_vm3, %v6597_v35 }
0x1a21   :  { %9038 = vmatpush3.xpose.msk.msra.mxu0 %vm576_vm3, %v6755_v44  ;;  %9039 = vmatprep.mubr.msk.f32.mxu0 %vm9418_vm2, %v9419_v4 }
0x1a22   :  { %9047 = vmatprep.subr.mxu0 %v9419_v4 }
0x1a24   :  { %9040 = vmatmul.mubr.msk.f32.vlgmr.msra.gmra.mrb[74].mxu0 %vm576_vm3, %v6753_v45 }
0x1a25   :  { %9049 = vmatprep.mubr.msk.f32.mxu0 %vm9418_vm2, %v9419_v4 }
0x1a89   :  { %v6283_v55 = vpop.f32.mrb[72].mxu1 }
0x1a8a   :  { %v9006_v1 = vpop.f32.mrb[73].mxu1 }
0x1abe   :  { %v6437_v47 = vpop.f32.mrb[74].mxu1 }
0x1abf   :  { %v9016_v48 = vpop.f32.mrb[75].mxu1 }
0x1ac2   :  { %v6592_v49 = vpop.f32.mrb[76].mxu1 }
0x1ac3   :  { %v9026_v52 = vpop.f32.mrb[77].mxu1  ;;  %v6830_v18 = vsel %vm996_vm4, %v6592_v49, -inf }
0x1ac4   :  { %6831 = vmax.xlane.f32.xlu0 %v6830_v18 }
0x1ac6   :  { %v6748_v53 = vpop.f32.mrb[78].mxu1 }
0x1ac7   :  { %v9036_v54 = vpop.f32.mrb[79].mxu1  ;;  %v6836_v43 = vsel %vm996_vm4, %v6748_v53, -inf }
0x1ac8   :  { %6837 = vmax.xlane.f32.xlu0 %v6836_v43  ;;  %v8376_v54 = vld [vmem:[%s10947_s9 + $0x20] sm:$0xff]  ;;  %v8377_v43 = vld [vmem:[%s10947_s9 + $0x28] sm:$0xff] }
0x1ae8   :  { %v6360_v58 = vpop.f32.mrb[68].mxu0 }
0x1ae9   :  { %v9011_v59 = vpop.f32.mrb[69].mxu0 }
0x1aec   :  { %v10636_v61 = vpop.f32.mrb[70].mxu0 }
0x1aed   :  { %v9021_v62 = vpop.f32.mrb[71].mxu0 }
0x1af3   :  { %v6670_v3 = vpop.f32.mrb[72].mxu0 }
0x1af4   :  { %v9031_v5 = vpop.f32.mrb[73].mxu0  ;;  %v6833_v8 = vsel %vm996_vm4, %v6670_v3, -inf }
0x1af5   :  { %6834 = vmax.xlane.f32.xlu1 %v6833_v8 }
0x1af7   :  { %v6826_v42 = vpop.f32.mrb[74].mxu0 }
0x1af8   :  { %v9041_v7 = vpop.f32.mrb[75].mxu0  ;;  %v6839_v9 = vsel %vm996_vm4, %v6826_v42, -inf }
0x1af9   :  { %6840 = vmax.xlane.f32.xlu0 %v6839_v9 }
0x1b51   :  { %v6832_v51 = vpop.xlane.xlu0 %6831 }
0x1b52   :  { %v6842_v13 = vsub.f32 %v6592_v49, %v6832_v51 }
0x1b54   :  { %v6846_v15 = vmul.f32 1.442695, %v6842_v13 }
0x1b55   :  { %v6838_v17 = vpop.xlane.xlu0 %6837 }
0x1b56   :  { %9383 = vpow2.f32 %v6846_v15  ;;  %v6844_v19 = vsub.f32 %v6748_v53, %v6838_v17 }
0x1b58   :  { %v6850_v21 = vmul.f32 1.442695, %v6844_v19 }
0x1b5a   :  { %9385 = vpow2.f32 %v6850_v21 }
0x1b60   :  { %v9384_v57 = vpop.eup %9383 }
0x1b61   :  { %v6854_v22 = vsel %vm996_vm4, %v9384_v57, 0.0 }
0x1b62   :  { %6855 = vadd.xlane.f32.xlu0 %v6854_v22 }
0x1b64   :  { %v9386_v24 = vpop.eup %9385 }
0x1b65   :  { %v6860_v25 = vsel %vm996_vm4, %v9386_v24, 0.0 }
0x1b66   :  { %6861 = vadd.xlane.f32.xlu0 %v6860_v25 }
0x1b7c   :  { %6874 = vrot.lane.b32.xlu0 %v10337_v63, %s10971_s2 }
0x1b80   :  { %7186 = vrot.lane.b32.xlu0 %v10554_v26, %s10972_s24 }
0x1b82   :  { %v6835_v27 = vpop.xlane.xlu1 %6834 }
0x1b83   :  { %v6843_v30 = vsub.f32 %v6670_v3, %v6835_v27 }
0x1b84   :  { %7202 = vrot.lane.b32.xlu0 %v6283_v55, %s10973_s25 }
0x1b85   :  { %v6848_v33 = vmul.f32 1.442695, %v6843_v30 }
0x1b86   :  { %v6841_v63 = vpop.xlane.xlu0 %6840 }
0x1b87   :  { %9387 = vpow2.f32 %v6848_v33  ;;  %v6845_v26 = vsub.f32 %v6826_v42, %v6841_v63 }
0x1b88   :  { %7190 = vrot.lane.b32.xlu0 %v10556_v28, %s10972_s24 }
0x1b89   :  { %v6852_v14 = vmul.f32 1.442695, %v6845_v26 }
0x1b8b   :  { %9389 = vpow2.f32 %v6852_v14 }
0x1b91   :  { %v9388_v20 = vpop.eup %9387 }
0x1b92   :  { %v6857_v34 = vsel %vm996_vm4, %v9388_v20, 0.0 }
0x1b93   :  { %6858 = vadd.xlane.f32.xlu1 %v6857_v34 }
0x1b95   :  { %v9390_v35 = vpop.eup %9389 }
0x1b96   :  { %v6863_v37 = vsel %vm996_vm4, %v9390_v35, 0.0 }
0x1ba4   :  { %6951 = vrot.lane.b32.xlu1 %v10359_v6, %s10971_s2 }
0x1ba8   :  { %7028 = vrot.lane.b32.xlu1 %v10368_v56, %s10971_s2 }
0x1bcc   :  { %6864 = vadd.xlane.f32.xlu1 %v6863_v37 }
0x1bdd   :  { %7105 = vrot.lane.b32.xlu1 %v10374_v2, %s10971_s2 }
0x1be1   :  { %7188 = vrot.lane.b32.xlu1 %v10561_v36, %s10972_s24 }
0x1be5   :  { %7204 = vrot.lane.b32.xlu1 %v6360_v58, %s10973_s25  ;;  %v9190_v58 = vpack.c.bf16 %v8377_v43, %v8376_v54 }
0x1be9   :  { %7206 = vrot.lane.b32.xlu1 %v6437_v47, %s10973_s25 }
0x1bef   :  { %v6856_v6 = vpop.xlane.xlu0 %6855 }
0x1bf0   :  { %9391 = vrcp.f32 %v6856_v6 }
0x1bf3   :  { %v6862_v56 = vpop.xlane.xlu0 %6861 }
0x1bf4   :  { %9393 = vrcp.f32 %v6862_v56 }
0x1bf7   :  { %v6875_v28 = vpop.permute.xlu0 %6874 }
0x1bf8   :  { %9043 = vmatpush3.msk.msra.mxu1 %vm1047_vm5, %v6875_v28 }
0x1bf9   :  { %9052 = vmatprep.subr.mxu1 %v9419_v4 }
0x1bfa   :  { %v9392_v29 = vpop.eup %9391 }
0x1bfb   :  { %v6870_v39 = vmul.f32 %v9392_v29, %v9384_v57  ;;  %v7187_v42 = vpop.permute.xlu0 %7186 }
0x1bfc   :  { %v7230_v13 = vsel %vm576_vm3, %v10474_v10, %v7187_v42 }
0x1bfd   :  { %9045 = vmatmul.mubr.msk.f32.vlgmr.msra.gmra.mrb[80].mxu1 %vm1043_vm6, %v6870_v39 }
0x1bfe   :  { %9054 = vmatprep.mubr.msk.f32.mxu1 %vm9418_vm2, %v9419_v4  ;;  %v9394_v31 = vpop.eup %9393 }
0x1bff   :  { %v6872_v41 = vmul.f32 %v9394_v31, %v9386_v24  ;;  %v7203_v7 = vpop.permute.xlu0 %7202 }
0x1c00   :  { %v7234_v17 = vsel %vm3395_vm7, %v7230_v13, %v7203_v7 }
0x1c03   :  { %v7191_v9 = vpop.permute.xlu0 %7190 }
0x1c04   :  { %v7232_v6 = vsel %vm576_vm3, %v10478_v12, %v7191_v9 }
0x1c20   :  { %v6859_v2 = vpop.xlane.xlu1 %6858 }
0x1c21   :  { %9395 = vrcp.f32 %v6859_v2 }
0x1c24   :  { %v6952_v36 = vpop.permute.xlu1 %6951 }
0x1c25   :  { %9048 = vmatpush3.msk.msra.mxu0 %vm1047_vm5, %v6952_v36 }
0x1c26   :  { %9057 = vmatprep.subr.mxu0 %v9419_v4 }
0x1c28   :  { %v7029_v16 = vpop.permute.xlu1 %7028 }
0x1c29   :  { %9053 = vmatpush3.msk.msra.mxu1 %vm1047_vm5, %v7029_v16 }
0x1c2a   :  { %9055 = vmatmul.mubr.msk.f32.vlgmr.msra.gmra.mrb[82].mxu1 %vm1043_vm6, %v6872_v41  ;;  %9189 = vmatprep.subr.bf16.mxu1 %v9417_v0 }
0x1c2b   :  { %v9396_v44 = vpop.eup %9395  ;;  %9070 = vmatprep.mubr.msk.f32.mxu1 %vm9418_vm2, %v9419_v4  ;;  %9191 = vmatpush3.bf16.msra.mxu1 %v9190_v58 }
0x1c2c   :  { %v6871_v45 = vmul.f32 %v9396_v44, %v9388_v20  ;;  %9192 = vmatprep.subr.bf16.mxu1 %v9417_v0 }
0x1c2e   :  { %9050 = vmatmul.mubr.msk.f32.vlgmr.msra.gmra.mrb[76].mxu0 %vm1043_vm6, %v6871_v45 }
0x1c2f   :  { %9059 = vmatprep.mubr.msk.f32.mxu0 %vm9418_vm2, %v9419_v4 }
0x1c59   :  { %v6865_v55 = vpop.xlane.xlu1 %6864 }
0x1c5a   :  { %9397 = vrcp.f32 %v6865_v55 }
0x1c5d   :  { %v7106_v1 = vpop.permute.xlu1 %7105 }
0x1c5e   :  { %9058 = vmatpush3.msk.msra.mxu0 %vm1047_vm5, %v7106_v1 }
0x1c5f   :  { %9195 = vmatprep.subr.bf16.mxu0 %v9417_v0 }
0x1c61   :  { %v7189_v15 = vpop.permute.xlu1 %7188 }
0x1c62   :  { %v7231_v30 = vsel %vm576_vm3, %v10476_v11, %v7189_v15 }
0x1c64   :  { %v9398_v47 = vpop.eup %9397 }
0x1c65   :  { %v6873_v48 = vmul.f32 %v9398_v47, %v9390_v35  ;;  %v7205_v57 = vpop.permute.xlu1 %7204 }
0x1c66   :  { %v7235_v10 = vsel %vm3395_vm7, %v7231_v30, %v7205_v57 }
0x1c67   :  { %9060 = vmatmul.mubr.msk.f32.vlgmr.msra.gmra.mrb[78].mxu0 %vm1043_vm6, %v6873_v48 }
0x1c68   :  { %9087 = vmatprep.mubr.msk.f32.mxu0 %vm9418_vm2, %v9419_v4 }
0x1c69   :  { %v7207_v24 = vpop.permute.xlu1 %7206 }
0x1c6a   :  { %v7236_v56 = vsel %vm3395_vm7, %v7232_v6, %v7207_v24 }
0x1cd0   :  { %v6947_v49 = vpop.f32.mrb[80].mxu1 }
0x1cd1   :  { %7218 = vrot.lane.b32.xlu0 %v6947_v49, %s9434_s0  ;;  %v9046_v52 = vpop.f32.mrb[81].mxu1 }
0x1cd5   :  { %7192 = vrot.lane.b32.xlu0 %v10564_v38, %s10972_s24  ;;  %v8378_v38 = vld [vmem:[%s10947_s9 + $0x30] sm:$0xff] }
0x1cd9   :  { %7208 = vrot.lane.b32.xlu0 %v10636_v61, %s10973_s25  ;;  %v8379_v61 = vld [vmem:[%s10947_s9 + $0x38] sm:$0xff] }
0x1cda   :  { %v9193_v3 = vpack.c.bf16 %v8379_v61, %v8378_v38 }
0x1cdc   :  { %9194 = vmatpush3.bf16.msra.mxu1 %v9193_v3 }
0x1cdd   :  { %9201 = vmatprep.subr.bf16.mxu1 %v9417_v0 }
0x1cfd   :  { %v7101_v18 = vpop.f32.mrb[82].mxu1 }
0x1cfe   :  { %v9056_v53 = vpop.f32.mrb[83].mxu1 }
0x1d01   :  { %v7024_v59 = vpop.f32.mrb[76].mxu0 }
0x1d02   :  { %v9051_v62 = vpop.f32.mrb[77].mxu0  ;;  %7220 = vrot.lane.b32.xlu1 %v7024_v59, %s9434_s0 }
0x1d06   :  { %7222 = vrot.lane.b32.xlu1 %v7101_v18, %s9434_s0 }
0x1d3a   :  { %v7178_v5 = vpop.f32.mrb[78].mxu0 }
0x1d3b   :  { %v9061_v8 = vpop.f32.mrb[79].mxu0  ;;  %7224 = vrot.lane.b32.xlu1 %v7178_v5, %s9434_s0 }
0x1d43   :  { %v7219_v51 = vpop.permute.xlu0 %7218 }
0x1d44   :  { %v7238_v19 = vsel %vm3400_vm8, %v7234_v17, %v7219_v51 }
0x1d45   :  { %v7253_v21 = vrot.slane %v7238_v19, %v9725_v50  ;;  %v7246_v25 = vcombine.high %v7238_v19, %v7238_v19 }
0x1d47   :  { %v7261_v22 = vcombine.high %v7253_v21, %v7253_v21  ;;  %v7268_v33 = vrot.slane %v7253_v21, %v9725_v50  ;;  %v7260_v20 = vrot.slane %v7246_v25, %v9725_v50  ;;  %v7193_v42 = vpop.permute.xlu0 %7192 }
0x1d48   :  { %v7233_v51 = vsel %vm576_vm3, %v10482_v23, %v7193_v42 }
0x1d49   :  { %v7282_v27 = vrot.slane %v7261_v22, %v9725_v50  ;;  %v7275_v11 = vrot.slane %v7260_v20, %v9725_v50 }
0x1d4b   :  { %v7415_v63 = vcombine.low %v7268_v33, %v7282_v27  ;;  %v8382_v14 = vcombine.high %v7268_v33, %v7282_v27  ;;  %v7209_v9 = vpop.permute.xlu0 %7208 }
0x1d4c   :  { %v7237_v13 = vsel %vm3395_vm7, %v7233_v51, %v7209_v9 }
0x1d4d   :  { %v7425_v2 = vrot.slane %v7415_v63, %v9725_v50  ;;  %v7432_v41 = vrot.slane %v8382_v14, %v9725_v50 }
0x1d4f   :  { %v7447_v49 = vcombine.low %v7425_v2, %v7432_v41 }
0x1d51   :  { %v7455_v62 = vrot.slane %v7447_v49, %v9725_v50  ;;  %v8394_v49 = vld [vmem:[%s10949_s13 + $0x38] sm:$0xff] }
0x1d74   :  { %v7221_v34 = vpop.permute.xlu1 %7220 }
0x1d75   :  { %v7239_v26 = vsel %vm3400_vm8, %v7235_v10, %v7221_v34 }
0x1d76   :  { %v7285_v35 = vcombine.high %v7239_v26, %v7239_v26  ;;  %v7292_v37 = vrot.slane %v7239_v26, %v9725_v50 }
0x1d78   :  { %v7300_v28 = vcombine.high %v7292_v37, %v7292_v37  ;;  %v7307_v29 = vrot.slane %v7292_v37, %v9725_v50  ;;  %v7223_v39 = vpop.permute.xlu1 %7222  ;;  %v7299_v36 = vrot.slane %v7285_v35, %v9725_v50 }
0x1d79   :  { %v7240_v31 = vsel %vm3400_vm8, %v7236_v56, %v7223_v39 }
0x1d7a   :  { %v7321_v16 = vrot.slane %v7300_v28, %v9725_v50  ;;  %v7322_v44 = vcombine.high %v7307_v29, %v7307_v29  ;;  %v7417_v12 = vcombine.low %v7275_v11, %v7307_v29  ;;  %v7331_v45 = vrot.slane %v7240_v31, %v9725_v50 }
0x1d7b   :  { %v7314_v47 = vrot.slane %v7299_v36, %v9725_v50  ;;  %v7324_v7 = vcombine.high %v7240_v31, %v7240_v31  ;;  %v8381_v36 = vld [vmem:[%s10948_s10 + $0x1] ss:$0 sm:$0xff] }
0x1d7c   :  { %v7323_v55 = vcombine.high %v7321_v16, %v7321_v16  ;;  %v7418_v1 = vcombine.low %v7321_v16, %v7322_v44  ;;  %v7339_v48 = vcombine.high %v7331_v45, %v7331_v45  ;;  %v7439_v52 = vrot.slane %v7417_v12, %v9725_v50 }
0x1d7d   :  { %v7346_v54 = vrot.slane %v7331_v45, %v9725_v50  ;;  %v7338_v15 = vrot.slane %v7324_v7, %v9725_v50 }
0x1d7e   :  { %v7446_v18 = vrot.slane %v7418_v1, %v9725_v50  ;;  %v7464_v53 = vcombine.low %v7323_v55, %v7314_v47  ;;  %v7360_v43 = vrot.slane %v7339_v48, %v9725_v50  ;;  %v8391_v1 = vld [vmem:[%s10949_s13 + $0x20] sm:$0xff]  ;;  %v8392_v47 = vld [vmem:[%s10949_s13 + $0x28] sm:$0xff]  ;;  %v8393_v48 = vld [vmem:[%s10949_s13 + $0x30] sm:$0xff] }
0x1d7f   :  { %v7353_v24 = vrot.slane %v7338_v15, %v9725_v50 }
0x1d80   :  { %v7448_v58 = vcombine.low %v7439_v52, %v7446_v18  ;;  %v7465_v59 = vcombine.low %v7346_v54, %v7360_v43  ;;  %v7474_v61 = vrot.slane %v7464_v53, %v9725_v50  ;;  %v8383_v22 = vcombine.high %v7346_v54, %v7360_v43 }
0x1d81   :  { %v9199_v52 = vpack.c.bf16 %v8394_v49, %v8393_v48  ;;  %v8406_v48 = vld [vmem:[%s10952_s15 + $0x58] sm:$0xff] }
0x1d82   :  { %v7462_v38 = vrot.slane %v7448_v58, %v9725_v50  ;;  %v7481_v3 = vrot.slane %v7465_v59, %v9725_v50  ;;  %v7488_v20 = vrot.slane %v8383_v22, %v9725_v50 }
0x1d84   :  { %v7463_v5 = vcombine.low %v7455_v62, %v7462_v38  ;;  %v7496_v8 = vcombine.low %v7474_v61, %v7481_v3 }
0x1d86   :  { %9071 = vmatmul.mubr.msk.f32.vlgmr.msra.gmra.mrb[84].mxu1 %vm179_vm0, %v7463_v5  ;;  %v7504_v11 = vrot.slane %v7496_v8, %v9725_v50 }
0x1d87   :  { %9073 = vmatprep.mubr.msk.f32.mxu1 %vm9418_vm2, %v9419_v4 }
0x1dad   :  { %v7225_v17 = vpop.permute.xlu1 %7224 }
0x1dae   :  { %v7241_v19 = vsel %vm3400_vm8, %v7237_v13, %v7225_v17 }
0x1daf   :  { %v7363_v21 = vcombine.high %v7241_v19, %v7241_v19  ;;  %v7370_v57 = vrot.slane %v7241_v19, %v9725_v50 }
0x1db1   :  { %v7377_v25 = vrot.slane %v7363_v21, %v9725_v50  ;;  %v7378_v27 = vcombine.high %v7370_v57, %v7370_v57  ;;  %v7385_v30 = vrot.slane %v7370_v57, %v9725_v50  ;;  %v8389_v57 = vld [vmem:[%s10950_s11 + $0x1] ss:$0 sm:$0xff] }
0x1db3   :  { %v7399_v23 = vrot.slane %v7378_v27, %v9725_v50  ;;  %v7400_v33 = vcombine.high %v7385_v30, %v7385_v30  ;;  %v7467_v10 = vcombine.low %v7353_v24, %v7385_v30  ;;  %v7392_v34 = vrot.slane %v7377_v25, %v9725_v50  ;;  %v8390_v24 = vld [vmem:[%s10951_s12 + $0x1] ss:$0 sm:$0xff] }
0x1db5   :  { %v7401_v63 = vcombine.high %v7399_v23, %v7399_v23  ;;  %v7495_v26 = vrot.slane %v7467_v10, %v9725_v50  ;;  %v7513_v14 = vcombine.low %v7399_v23, %v7400_v33 }
0x1db7   :  { %v7497_v35 = vcombine.low %v7488_v20, %v7495_v26  ;;  %v7514_v37 = vcombine.low %v7401_v63, %v7392_v34  ;;  %v7521_v6 = vrot.slane %v7513_v14, %v9725_v50 }
0x1db9   :  { %v7528_v56 = vrot.slane %v7514_v37, %v9725_v50  ;;  %v7511_v28 = vrot.slane %v7497_v35, %v9725_v50 }
0x1dbb   :  { %v7512_v29 = vcombine.low %v7504_v11, %v7511_v28  ;;  %v7529_v39 = vcombine.low %v7521_v6, %v7528_v56 }
0x1dbd   :  { %9074 = vmatmul.mubr.msk.f32.gmra.mrb[86].mxu1 %vm179_vm0, %v7512_v29  ;;  %v7536_v2 = vrot.slane %v7529_v39, %v9725_v50 }
0x1dbe   :  { %9076 = vmatprep.mubr.msk.f32.mxu1 %vm9418_vm2, %v9419_v4 }
0x1dc1   :  { %9077 = vmatmul.mubr.msk.f32.gmra.mrb[88].mxu1 %vm179_vm0, %v7536_v2 }
0x1dc2   :  { %9112 = vmatprep.mubr.msk.f32.mxu1 %vm9418_vm2, %v9419_v4 }
0x1e59   :  { %v7609_v31 = vpop.f32.mrb[84].mxu1 }
0x1e5a   :  { %v7610_v41 = vadd.f32 %v8381_v36, %v7609_v31  ;;  %v9072_v16 = vpop.f32.mrb[85].mxu1 }
0x1e5c   :  { %v10767_v44 = vadd.f32 %v7610_v41, %v10269_v40  ;;  %v9196_v40 = vpack.c.bf16 %v8392_v47, %v8391_v1  ;;  %v8404_v1 = vld [vmem:[%s10952_s15 + $0x48] sm:$0xff] }
0x1e5e   :  { %v7630_v12 = vsel %vm179_vm0, %v10767_v44, 0.0  ;;  %v7642_v45 = vmul.f32 %v10767_v44, %v10767_v44  ;;  %9197 = vmatpush3.bf16.msra.mxu0 %v9196_v40  ;;  %v8405_v40 = vld [vmem:[%s10952_s15 + $0x50] sm:$0xff] }
0x1e5f   :  { %7631 = vadd.xlane.f32.xlu0 %v7630_v12  ;;  %9198 = vmatprep.subr.bf16.mxu0 %v9417_v0  ;;  %v9205_v49 = vpack.c.bf16 %v8406_v48, %v8405_v40 }
0x1e60   :  { %v7645_v55 = vsel %vm179_vm0, %v7642_v45, 0.0 }
0x1e61   :  { %7646 = vadd.xlane.f32.xlu1 %v7645_v55  ;;  %v8403_v55 = vld [vmem:[%s10952_s15 + $0x40] sm:$0xff] }
0x1e62   :  { %9200 = vmatpush3.bf16.msra.mxu0 %v9199_v52  ;;  %v9202_v47 = vpack.c.bf16 %v8404_v1, %v8403_v55  ;;  %v8407_v52 = vld [vmem:[%s10952_s15 + $0x60] sm:$0xff] }
0x1e64   :  { %9203 = vmatpush3.bf16.msra.mxu1 %v9202_v47 }
0x1e65   :  { %9204 = vmatprep.subr.bf16.mxu1 %v9417_v0 }
0x1e68   :  { %9206 = vmatpush3.bf16.msra.mxu1 %v9205_v49 }
0x1e69   :  { %9207 = vmatprep.subr.bf16.mxu1 %v9417_v0 }
0x1e90   :  { %v7614_v18 = vpop.f32.mrb[86].mxu1 }
0x1e91   :  { %v7615_v53 = vadd.f32 %v8381_v36, %v7614_v18  ;;  %v9075_v54 = vpop.f32.mrb[87].mxu1  ;;  %v8408_v18 = vld [vmem:[%s10952_s15 + $0x68] sm:$0xff] }
0x1e92   :  { %v8409_v54 = vld [vmem:[%s10952_s15 + $0x70] sm:$0xff] }
0x1e93   :  { %v10788_v43 = vadd.f32 %v7615_v53, %v10291_v32  ;;  %v9208_v53 = vpack.c.bf16 %v8408_v18, %v8407_v52 }
0x1e94   :  { %v7619_v58 = vpop.f32.mrb[88].mxu1 }
0x1e95   :  { %v7620_v59 = vadd.f32 %v8381_v36, %v7619_v58  ;;  %v9078_v62 = vpop.f32.mrb[89].mxu1  ;;  %v7633_v38 = vsel %vm179_vm0, %v10788_v43, 0.0  ;;  %v7643_v61 = vmul.f32 %v10788_v43, %v10788_v43  ;;  %9209 = vmatpush3.bf16.msra.mxu1 %v9208_v53  ;;  %v8410_v58 = vld [vmem:[%s10952_s15 + $0x78] sm:$0xff] }
0x1e96   :  { %7634 = vadd.xlane.f32.xlu0 %v7633_v38  ;;  %9210 = vmatprep.subr.bf16.mxu1 %v9417_v0  ;;  %v8396_v62 = vld [vmem:[%s10953_s14 + $0x1] ss:$0 sm:$0xff] }
0x1e97   :  { %v10795_v3 = vadd.f32 %v7620_v59, %v10299_v60  ;;  %v7648_v5 = vsel %vm179_vm0, %v7643_v61, 0.0  ;;  %v9211_v59 = vpack.c.bf16 %v8410_v58, %v8409_v54 }
0x1e99   :  { %v7644_v8 = vmul.f32 %v10795_v3, %v10795_v3  ;;  %v7636_v42 = vsel %vm186_vm1, %v10795_v3, 0.0  ;;  %9212 = vmatpush3.bf16.msra.mxu1 %v9211_v59 }
0x1e9a   :  { %7649 = vadd.xlane.f32.xlu0 %v7648_v5 }
0x1e9b   :  { %v7651_v32 = vsel %vm186_vm1, %v7644_v8, 0.0 }
0x1e9c   :  { %7652 = vadd.xlane.f32.xlu1 %v7651_v32 }
0x1e9e   :  { %7637 = vadd.xlane.f32.xlu0 %v7636_v42 }
0x1eec   :  { %v7632_v7 = vpop.xlane.xlu0 %7631 }
0x1eed   :  { %v7639_v9 = vmul.f32 0.03125, %v7632_v7 }
0x1eee   :  { %v7647_v51 = vpop.xlane.xlu1 %7646 }
0x1eef   :  { %v7657_v13 = vmul.f32 %v7639_v9, %v7639_v9  ;;  %v7654_v15 = vmul.f32 0.03125, %v7647_v51  ;;  %v7663_v19 = vsub.f32 %v10767_v44, %v7639_v9 }
0x1ef1   :  { %v7660_v60 = vsub.f32 %v7654_v15, %v7657_v13 }
0x1ef3   :  { %v7666_v17 = vadd.f32 1e-05, %v7660_v60 }
0x1ef5   :  { %9399 = vrsqrt.f32 %v7666_v17 }
0x1eff   :  { %v9400_v21 = vpop.eup %9399 }
0x1f00   :  { %v7672_v22 = vmul.f32 %v9400_v21, %v7663_v19 }
0x1f02   :  { %v7681_v25 = vmul.f32 %v8389_v57, %v7672_v22 }
0x1f04   :  { %v7690_v27 = vadd.f32 %v8390_v24, %v7681_v25 }
0x1f06   :  { %9088 = vmatmul.mubr.msk.f32.vlgmr.msra.gmra.mrb[80].mxu0 %vm179_vm0, %v7690_v27 }
0x1f07   :  { %9090 = vmatprep.mubr.msk.f32.mxu0 %vm9418_vm2, %v9419_v4 }
0x1f23   :  { %v7635_v30 = vpop.xlane.xlu0 %7634 }
0x1f24   :  { %v7640_v23 = vmul.f32 0.03125, %v7635_v30 }
0x1f26   :  { %v7658_v10 = vmul.f32 %v7640_v23, %v7640_v23  ;;  %v7664_v28 = vsub.f32 %v10788_v43, %v7640_v23 }
0x1f27   :  { %v7650_v33 = vpop.xlane.xlu0 %7649 }
0x1f28   :  { %v7655_v20 = vmul.f32 0.03125, %v7650_v33 }
0x1f29   :  { %v7653_v63 = vpop.xlane.xlu1 %7652 }
0x1f2a   :  { %v7661_v34 = vsub.f32 %v7655_v20, %v7658_v10  ;;  %v7656_v37 = vmul.f32 0.03125, %v7653_v63 }
0x1f2b   :  { %v7638_v26 = vpop.xlane.xlu0 %7637 }
0x1f2c   :  { %v7667_v14 = vadd.f32 1e-05, %v7661_v34  ;;  %v7641_v35 = vmul.f32 0.03125, %v7638_v26 }
0x1f2e   :  { %9401 = vrsqrt.f32 %v7667_v14  ;;  %v7659_v6 = vmul.f32 %v7641_v35, %v7641_v35  ;;  %v7665_v36 = vsub.f32 %v10795_v3, %v7641_v35  ;;  %v8412_v14 = vld [vmem:[%s10954_s16 + $0x1] ss:$0 sm:$0xff] }
0x1f30   :  { %v7662_v56 = vsub.f32 %v7656_v37, %v7659_v6 }
0x1f32   :  { %v7668_v11 = vadd.f32 1e-05, %v7662_v56 }
0x1f34   :  { %9403 = vrsqrt.f32 %v7668_v11 }
0x1f38   :  { %v9402_v29 = vpop.eup %9401 }
0x1f39   :  { %v7673_v39 = vmul.f32 %v9402_v29, %v7664_v28 }
0x1f3b   :  { %v7682_v2 = vmul.f32 %v8389_v57, %v7673_v39 }
0x1f3d   :  { %v7691_v31 = vadd.f32 %v8390_v24, %v7682_v2 }
0x1f3e   :  { %v9404_v41 = vpop.eup %9403 }
0x1f3f   :  { %v7674_v16 = vmul.f32 %v9404_v41, %v7665_v36  ;;  %9091 = vmatmul.mubr.msk.f32.gmra.mrb[82].mxu0 %vm179_vm0, %v7691_v31 }
0x1f40   :  { %9093 = vmatprep.mubr.msk.f32.mxu0 %vm9418_vm2, %v9419_v4 }
0x1f41   :  { %v7683_v12 = vmul.f32 %v8389_v57, %v7674_v16 }
0x1f43   :  { %v7692_v45 = vadd.f32 %v8390_v24, %v7683_v12 }
0x1f45   :  { %9094 = vmatmul.mubr.msk.f32.gmra.mrb[84].mxu0 %vm179_vm0, %v7692_v45 }
0x1fd9   :  { %v7781_v38 = vpop.f32.mrb[80].mxu0 }
0x1fda   :  { %v7782_v61 = vadd.f32 %v8396_v62, %v7781_v38  ;;  %v9089_v5 = vpop.f32.mrb[81].mxu0 }
0x1fdc   :  { %v8400_v8 = vmul.f32 -1.702, %v7782_v61 }
0x1fde   :  { %v7801_v32 = vmul.f32 1.442695, %v8400_v8 }
0x1fe0   :  { %9405 = vpow2.f32 %v7801_v32 }
0x1fea   :  { %v9406_v0 = vpop.eup %9405 }
0x1feb   :  { %v7807_v42 = vadd.f32 1.0, %v9406_v0 }
0x1fed   :  { %9407 = vrcp.f32 %v7807_v42 }
0x1ff7   :  { %v9408_v7 = vpop.eup %9407 }
0x1ff8   :  { %v7816_v9 = vmul.f32 %v9408_v7, %v7782_v61 }
0x1ffa   :  { %9113 = vmatmul.mubr.msk.f32.vlgmr.msra.gmra.mrb[90].mxu1 %vm3991_vm9, %v7816_v9 }
0x1ffb   :  { %9115 = vmatprep.mubr.msk.f32.mxu1 %vm9418_vm2, %v9419_v4 }
0x2012   :  { %v7786_v51 = vpop.f32.mrb[82].mxu0 }
0x2013   :  { %v7787_v13 = vadd.f32 %v8396_v62, %v7786_v51  ;;  %v9092_v15 = vpop.f32.mrb[83].mxu0 }
0x2015   :  { %v8401_v60 = vmul.f32 -1.702, %v7787_v13 }
0x2017   :  { %v7803_v17 = vmul.f32 1.442695, %v8401_v60 }
0x2018   :  { %v7791_v19 = vpop.f32.mrb[84].mxu0 }
0x2019   :  { %9409 = vpow2.f32 %v7803_v17  ;;  %v7792_v21 = vadd.f32 %v8396_v62, %v7791_v19  ;;  %v9095_v57 = vpop.f32.mrb[85].mxu0 }
0x201b   :  { %v8402_v22 = vmul.f32 -1.702, %v7792_v21 }
0x201d   :  { %v7805_v24 = vmul.f32 1.442695, %v8402_v22 }
0x201f   :  { %9411 = vpow2.f32 %v7805_v24 }
0x2023   :  { %v9410_v25 = vpop.eup %9409 }
0x2024   :  { %v7808_v27 = vadd.f32 1.0, %v9410_v25 }
0x2026   :  { %9413 = vrcp.f32 %v7808_v27 }
0x2029   :  { %v9412_v30 = vpop.eup %9411 }
0x202a   :  { %v7809_v23 = vadd.f32 1.0, %v9412_v30 }
0x202c   :  { %9415 = vrcp.f32 %v7809_v23 }
0x2030   :  { %v9414_v33 = vpop.eup %9413 }
0x2031   :  { %v7817_v10 = vmul.f32 %v9414_v33, %v7787_v13 }
0x2033   :  { %9116 = vmatmul.mubr.msk.f32.gmra.mrb[92].mxu1 %vm3991_vm9, %v7817_v10 }
0x2034   :  { %9118 = vmatprep.mubr.msk.f32.mxu1 %vm9418_vm2, %v9419_v4 }
0x2036   :  { %v9416_v20 = vpop.eup %9415 }
0x2037   :  { %v7818_v34 = vmul.f32 %v9416_v20, %v7792_v21 }
0x2039   :  { %9119 = vmatmul.mubr.msk.f32.gmra.mrb[94].mxu1 %vm3991_vm9, %v7818_v34 }
0x20cd   :  { %v7911_v63 = vpop.f32.mrb[90].mxu1 }
0x20ce   :  { %v9114_v26 = vpop.f32.mrb[91].mxu1  ;;  %v7912_v35 = vadd.f32 %v8412_v14, %v7911_v63 }
0x20d0   :  { %v7925_v37 = vadd.f32 %v7912_v35, %v10767_v44 }
0x20d2   :  { %v7931_v6 = vcombine.high %v7925_v37, %v7925_v37  ;;  %v7938_v11 = vrot.slane %v7925_v37, %v9725_v50 }
0x20d4   :  { %v7945_v56 = vrot.slane %v7931_v6, %v9725_v50  ;;  %v7946_v29 = vcombine.high %v7938_v11, %v7938_v11  ;;  %v7954_v36 = vrot.slane %v7938_v11, %v9725_v50 }
0x20d6   :  { %v7947_v28 = vcombine.high %v7945_v56, %v7945_v56  ;;  %v7961_v4 = vrot.slane %v7945_v56, %v9725_v50  ;;  %v7968_v31 = vrot.slane %v7946_v29, %v9725_v50  ;;  %v7976_v1 = vcombine.high %v7954_v36, %v7954_v36 }
0x20d7   :  { %v8077_v49 = vsel %vm10867_vm10, %v7954_v36, -inf }
0x20d8   :  { %v7975_v39 = vrot.slane %v7947_v28, %v9725_v50  ;;  %v7977_v2 = vcombine.high %v7961_v4, %v7961_v4  ;;  %v7978_v40 = vcombine.high %v7968_v31, %v7968_v31  ;;  %v8080_v46 = vsel %vm10867_vm10, %v7968_v31, -inf }
0x20d9   :  { %v8083_v5 = vsel %vm10867_vm10, %v7976_v1, -inf  ;;  %v8089_v57 = vsel %vm10867_vm10, %v7961_v4, -inf }
0x20da   :  { %v8078_v45 = vsel %vm10867_vm10, %v7975_v39, -inf  ;;  %v8081_v55 = vsel %vm10867_vm10, %v7977_v2, -inf  ;;  %v7979_v48 = vcombine.high %v7975_v39, %v7975_v39  ;;  %v8086_v7 = vsel %vm10867_vm10, %v7978_v40, -inf }
0x20db   :  { %v8079_v52 = vmax.f32 %v8077_v49, %v8078_v45  ;;  %v8082_v18 = vmax.f32 %v8080_v46, %v8081_v55 }
0x20dc   :  { %v8084_v8 = vsel %vm10867_vm10, %v7979_v48, -inf }
0x20dd   :  { %v8117_v32 = vcombine.low %v8079_v52, %v8082_v18  ;;  %v8085_v60 = vmax.f32 %v8083_v5, %v8084_v8 }
0x20df   :  { %v8125_v25 = vrot.slane %v8117_v32, %v9725_v50 }
0x2106   :  { %v7916_v41 = vpop.f32.mrb[92].mxu1 }
0x2107   :  { %v7917_v16 = vadd.f32 %v8412_v14, %v7916_v41  ;;  %v9117_v12 = vpop.f32.mrb[93].mxu1 }
0x2109   :  { %v7926_v47 = vadd.f32 %v7917_v16, %v10788_v43 }
0x210b   :  { %v7980_v53 = vcombine.high %v7926_v47, %v7926_v47  ;;  %v7987_v54 = vrot.slane %v7926_v47, %v9725_v50 }
0x210c   :  { %v7921_v58 = vpop.f32.mrb[94].mxu1 }
0x210d   :  { %v7994_v59 = vrot.slane %v7980_v53, %v9725_v50  ;;  %v7995_v62 = vcombine.high %v7987_v54, %v7987_v54  ;;  %v8003_v38 = vrot.slane %v7987_v54, %v9725_v50  ;;  %v7922_v43 = vadd.f32 %v8412_v14, %v7921_v58  ;;  %v9120_v61 = vpop.f32.mrb[95].mxu1 }
0x210f   :  { %v7996_v0 = vcombine.high %v7994_v59, %v7994_v59  ;;  %v8017_v42 = vrot.slane %v7995_v62, %v9725_v50  ;;  %v8010_v9 = vrot.slane %v7994_v59, %v9725_v50  ;;  %v8025_v51 = vcombine.high %v8003_v38, %v8003_v38 }
0x2110   :  { %v8087_v13 = vsel %vm10867_vm10, %v8003_v38, -inf  ;;  %v7927_v15 = vadd.f32 %v7922_v43, %v10795_v3 }
0x2111   :  { %v8024_v17 = vrot.slane %v7996_v0, %v9725_v50  ;;  %v8027_v19 = vcombine.high %v8017_v42, %v8017_v42  ;;  %v8088_v21 = vmax.f32 %v8086_v7, %v8087_v13  ;;  %v8090_v22 = vsel %vm10867_vm10, %v8017_v42, -inf }
0x2112   :  { %v8035_v24 = vrot.slane %v7927_v15, %v9725_v50  ;;  %v8091_v30 = vmax.f32 %v8089_v57, %v8090_v22  ;;  %v8026_v33 = vcombine.high %v8010_v9, %v8010_v9  ;;  %v8092_v3 = vsel %vm10867_vm10, %v8025_v51, -inf }
0x2113   :  { %v8028_v27 = vcombine.high %v8024_v17, %v8024_v17  ;;  %v8118_v23 = vcombine.low %v8085_v60, %v8088_v21  ;;  %v8095_v14 = vsel %vm10867_vm10, %v8027_v19, -inf  ;;  %v8098_v11 = vsel %vm10867_vm10, %v8010_v9, -inf }
0x2114   :  { %v8036_v10 = vcombine.high %v8035_v24, %v8035_v24  ;;  %v8043_v20 = vrot.slane %v8035_v24, %v9725_v50  ;;  %v8139_v26 = vrot.slane %v8091_v30, %v9725_v50  ;;  %v8101_v29 = vsel %vm10867_vm10, %v8024_v17, -inf }
0x2115   :  { %v8093_v34 = vsel %vm10867_vm10, %v8028_v27, -inf  ;;  %v8132_v63 = vrot.slane %v8118_v23, %v9725_v50  ;;  %v8104_v55 = vsel %vm10867_vm10, %v8026_v33, -inf }
0x2116   :  { %v8094_v35 = vmax.f32 %v8092_v3, %v8093_v34  ;;  %v8050_v37 = vrot.slane %v8036_v10, %v9725_v50  ;;  %v8051_v6 = vcombine.high %v8043_v20, %v8043_v20  ;;  %v8096_v56 = vsel %vm10867_vm10, %v8043_v20, -inf }
0x2117   :  { %v8140_v28 = vcombine.low %v8125_v25, %v8132_v63  ;;  %v8097_v4 = vmax.f32 %v8095_v14, %v8096_v56  ;;  %v8154_v39 = vrot.slane %v8139_v26, %v9725_v50 }
0x2118   :  { %v8052_v2 = vcombine.high %v8050_v37, %v8050_v37  ;;  %v8099_v36 = vsel %vm10867_vm10, %v8050_v37, -inf  ;;  %v8102_v31 = vsel %vm10867_vm10, %v8051_v6, -inf }
0x2119   :  { %v8147_v41 = vrot.slane %v8140_v28, %v9725_v50  ;;  %v8100_v16 = vmax.f32 %v8098_v11, %v8099_v36  ;;  %v8103_v12 = vmax.f32 %v8101_v29, %v8102_v31  ;;  %v8156_v45 = vcombine.low %v8094_v35, %v8097_v4 }
0x211a   :  { %v8105_v1 = vsel %vm10867_vm10, %v8052_v2, -inf }
0x211b   :  { %v8155_v47 = vcombine.low %v8147_v41, %v8154_v39  ;;  %v8106_v40 = vmax.f32 %v8104_v55, %v8105_v1  ;;  %v8157_v48 = vcombine.low %v8100_v16, %v8103_v12  ;;  %v8164_v49 = vrot.slane %v8156_v45, %v9725_v50 }
0x211d   :  { %8198 = vst.msk [vmem:[%s10955_s17] sm:$0x1f] %vm8197_vm11, %v8155_v47  ;;  %v8171_v46 = vrot.slane %v8157_v48, %v9725_v50  ;;  %v8178_v52 = vrot.slane %v8106_v40, %v9725_v50 }
0x211f   :  { %v8179_v18 = vcombine.low %v8164_v49, %v8171_v46  ;;  %v8193_v54 = vrot.slane %v8178_v52, %v9725_v50 }
0x2121   :  { %v8186_v53 = vrot.slane %v8179_v18, %v9725_v50 }
0x2123   :  { %v8194_v44 = vcombine.low %v8186_v53, %v8193_v54 }
0x2125   :  { %8199 = vst.msk [vmem:[%s10955_s17 + $0x8] sm:$0x1f] %vm8197_vm11, %v8194_v44 }

</bundles_post_ra>
